<compile_context>
chip_gen: v6e
topology: v6e:2x2x1
jax: 0.10.0
libtpu: 0.0.40
codegen_flags: <defaults>
</compile_context>

<pallas_src>
import functools

import jax
import jax.numpy as jnp
from jax.experimental import pallas as pl
from jax.experimental.pallas import tpu as pltpu

_IN_EPS = 1e-3            # InstanceNorm1d eps used by PointCN
_BN_EPS = 1e-5            # BatchNorm1d default eps
_VMEM_LIMIT = 48 * 1024 * 1024


def _stable_sigmoid(v):
    z = jnp.exp(-jnp.abs(v))
    return jnp.where(v >= 0, 1.0 / (1.0 + z), z / (1.0 + z))


def _in_affine(v, gamma, beta, eps):
    """One-pass InstanceNorm stats folded with a per-channel affine.

    Returns (a, b) such that InstanceNorm(v) * gamma + beta == v * a + b.
    """
    inv_n = 1.0 / v.shape[-1]
    mu = jnp.sum(v, axis=-1, keepdims=True) * inv_n
    ex2 = jnp.sum(v * v, axis=-1, keepdims=True) * inv_n
    var = jnp.maximum(ex2 - mu * mu, 0.0)
    a = jax.lax.rsqrt(var + eps) * gamma
    return a, beta - mu * a


# ---------------------------------------------------------------------------
# Kernel 1: node scores (proj + sigmoid) and PointCN features, fused.
# One grid step = one batch element; x block = full (C, N) row.
# ---------------------------------------------------------------------------
def _score_pointcn_kernel(x_ref, pk_ref, bp_ref, w1_ref, w2_ref,
                          scores_ref, xf_ref):
    f32, bf16 = jnp.float32, jnp.bfloat16
    x = x_ref[...]                                        # (C, N) f32

    pk = pk_ref[...]                                      # (C, 6) packed columns
    wp = pk[:, 0:1]
    s1, t1 = pk[:, 1:2], pk[:, 2:3]
    s2, t2 = pk[:, 3:4], pk[:, 4:5]
    b2 = pk[:, 5:6]

    # proj(C->1) + sigmoid: single output row -> VPU mul + sublane reduce.
    logits = jnp.sum(x * wp, axis=0, keepdims=True) + bp_ref[...]
    scores_ref[...] = _stable_sigmoid(logits)             # (1, N) f32

    # PointCN (eval): IN+BN folded to one per-channel FMA; conv1 bias dropped
    # (exactly no effect: IN is shift-invariant per channel).
    a, b = _in_affine(x, s1, t1, _IN_EPS)
    h = jnp.maximum(x * a + b, 0.0)
    h = jnp.dot(w1_ref[...], h.astype(bf16), preferred_element_type=f32)
    a, b = _in_affine(h, s2, t2, _IN_EPS)
    h = jnp.maximum(h * a + b, 0.0)
    h = jnp.dot(w2_ref[...], h.astype(bf16), preferred_element_type=f32) + b2
    xf_ref[...] = (h + x).astype(xf_ref.dtype)            # (C, N) bf16


# ---------------------------------------------------------------------------
# Kernel 2: AttentionPropagation(motion1 = x_new (C,M), motion2 = x (C,N)).
# One grid step = one batch element.
# ---------------------------------------------------------------------------
def _attention_kernel(m1_ref, m2_ref, wm1_ref, wkv_ref, watt_ref, wc2_ref,
                      pb_ref, o_ref, *, head, head_dim):
    f32, bf16 = jnp.float32, jnp.bfloat16
    C = m1_ref.shape[0]
    N = m2_ref.shape[1]

    m1 = m1_ref[...]                                      # (C, M) bf16
    m2 = m2_ref[...]                                      # (C, N) f32

    pb = pb_ref[...]                                      # (3C, 3) packed biases
    b_m1 = pb[:, 0:1]                                     # [bq/sqrt(d); bc1f + wc1b@bm]
    b_kv = pb[:2 * C, 1:2]                                # [bk; bv]
    b_c2 = pb[:C, 2:3]                                    # bc2

    # Stacked projections sharing a RHS (one tall MXU pass each).
    pm1 = jnp.dot(wm1_ref[...], m1, preferred_element_type=f32) + b_m1   # (3C, M)
    q = pm1[:C, :]                                        # already scaled by 1/sqrt(d)
    h1a = pm1[C:, :]                                      # wc1a@m1 + folded bias (2C, M)

    kv = jnp.dot(wkv_ref[...], m2.astype(bf16), preferred_element_type=f32) + b_kv
    k = kv[:C, :]
    v = kv[C:, :]

    ones_row = jnp.ones((1, N), dtype=bf16)
    o_parts = []
    for hd in range(head):
        sl = slice(hd * head_dim, (hd + 1) * head_dim)
        qh = q[sl, :].astype(bf16)                        # (d, M)
        kh = k[sl, :].astype(bf16)                        # (d, N)
        s = jax.lax.dot_general(qh, kh, (((0,), (0,)), ((), ())),
                                preferred_element_type=f32)          # (M, N)
        p = jnp.exp(s - jnp.max(s, axis=-1, keepdims=True)).astype(bf16)
        # Appended ones-row: row `head_dim` of the PV result is the softmax
        # denominator, already lane-dense, so normalization is deferred to the
        # small (d, M) output (EUP reciprocal instead of dividing (M, N)).
        vh = jnp.concatenate([v[sl, :].astype(bf16), ones_row], axis=0)  # (d+1, N)
        oa = jax.lax.dot_general(vh, p, (((1,), (1,)), ((), ())),
                                 preferred_element_type=f32)          # (d+1, M)
        inv_l = pl.reciprocal(oa[head_dim:head_dim + 1, :], approx=True)
        o_parts.append(oa[:head_dim, :] * inv_l)
    o_all = jnp.concatenate(o_parts, axis=0).astype(bf16)             # (C, M)

    # cat_filter: mh_filter + BN already folded into w_att / the packed bias.
    h1 = jnp.maximum(
        h1a + jnp.dot(watt_ref[...], o_all, preferred_element_type=f32), 0.0)
    h2 = jnp.dot(wc2_ref[...], h1.astype(bf16), preferred_element_type=f32) + b_c2
    o_ref[...] = (m1.astype(f32) + h2).astype(o_ref.dtype)            # (C, M)


# ---------------------------------------------------------------------------
# Wrapper
# ---------------------------------------------------------------------------
def _bn_fold(g, b, m, v, eps=_BN_EPS):
    s = g / jnp.sqrt(v + eps)
    return s, b - m * s


def pool_forward(x, p, *, head, k_ratio):
    """Pool.forward. x: (B, C, N) float32 NCL. Returns (B, C, int(k*N)) float32."""
    f32, bf16 = jnp.float32, jnp.bfloat16
    B, C, N = x.shape
    assert C % head == 0
    d = C // head
    M = int(k_ratio * N)
    x = x.astype(f32)
    inv_scale = 1.0 / (d ** 0.5)

    full2 = lambda shape: pl.BlockSpec(shape, lambda b: (0, 0))
    cparams = pltpu.CompilerParams(dimension_semantics=("parallel",),
                                   vmem_limit_bytes=_VMEM_LIMIT)

    # Fold eval-mode BatchNorms.
    s1, t1 = _bn_fold(p['bn1_g'], p['bn1_b'], p['bn1_m'], p['bn1_v'])
    s2, t2 = _bn_fold(p['bn2_g'], p['bn2_b'], p['bn2_m'], p['bn2_v'])
    sc, tc = _bn_fold(p['bnc_g'], p['bnc_b'], p['bnc_m'], p['bnc_v'])

    # ---------------- kernel 1: scores + PointCN ----------------
    pk1 = jnp.stack([p['proj_w'][0], s1, t1, s2, t2, p['cn_b2']], axis=1).astype(f32)
    bp = jnp.reshape(p['proj_b'], (1, 1)).astype(f32)
    w1 = p['cn_w1'].astype(bf16)
    w2 = p['cn_w2'].astype(bf16)

    scores3, xf = pl.pallas_call(
        _score_pointcn_kernel,
        out_shape=(jax.ShapeDtypeStruct((B, 1, N), f32),
                   jax.ShapeDtypeStruct((B, C, N), bf16)),
        grid_spec=pltpu.PrefetchScalarGridSpec(
            num_scalar_prefetch=0,
            grid=(B,),
            in_specs=[
                pl.BlockSpec((None, C, N), lambda b: (b, 0, 0)),   # x
                full2((C, 6)),                                     # packed columns
                full2((1, 1)),                                     # proj bias
                full2((C, C)),                                     # conv1 W (bf16)
                full2((C, C)),                                     # conv2 W (bf16)
            ],
            out_specs=[
                pl.BlockSpec((None, 1, N), lambda b: (b, 0, 0)),   # scores (f32)
                pl.BlockSpec((None, C, N), lambda b: (b, 0, 0)),   # xf (bf16)
            ],
        ),
        compiler_params=cparams,
    )(x, pk1, bp, w1, w2)
    scores = scores3[:, 0, :]                                       # (B, N) f32

    # ---------------- top-k node selection ----------------
    # TODO(synk): torch.topk + torch.gather have no clean Pallas TPU equivalent
    # (sort); they stay as jax.lax.top_k / take_along_axis between the kernels.
    values, idx = jax.lax.top_k(scores, M)                          # (B, M)
    idx_g = jnp.broadcast_to(idx[:, None, :], (B, C, M))
    x_new = (jnp.take_along_axis(xf, idx_g, axis=2)
             * values[:, None, :]).astype(bf16)                     # (B, C, M) bf16

    # ---------------- kernel 2: attention propagation ----------------
    # Fold BN into cat conv1, fold mh_filter into cat conv1's second half, fold
    # 1/sqrt(d) into the query filter; stack weights sharing a RHS.
    wc1f = p['wc1'] * sc[:, None]
    bc1f = p['bc1'] * sc + tc
    wc1a, wc1b = wc1f[:, :C], wc1f[:, C:]
    w_att = (wc1b @ p['wm']).astype(bf16)                           # (2C, C)
    b_cat = bc1f + wc1b @ p['bm']                                   # (2C,)
    w_m1 = jnp.concatenate([p['wq'] * inv_scale, wc1a], axis=0).astype(bf16)  # (3C, C)
    w_kv = jnp.concatenate([p['wk'], p['wv']], axis=0).astype(bf16)           # (2C, C)
    w_c2 = p['wc2'].astype(bf16)                                    # (C, 2C)

    zc = jnp.zeros((C,), f32)
    pb = jnp.stack([
        jnp.concatenate([p['bq'] * inv_scale, b_cat]),
        jnp.concatenate([p['bk'], p['bv'], zc]),
        jnp.concatenate([p['bc2'], zc, zc]),
    ], axis=1).astype(f32)                                          # (3C, 3)

    out = pl.pallas_call(
        functools.partial(_attention_kernel, head=head, head_dim=d),
        out_shape=jax.ShapeDtypeStruct((B, C, M), f32),
        grid_spec=pltpu.PrefetchScalarGridSpec(
            num_scalar_prefetch=0,
            grid=(B,),
            in_specs=[
                pl.BlockSpec((None, C, M), lambda b: (b, 0, 0)),    # x_new (bf16)
                pl.BlockSpec((None, C, N), lambda b: (b, 0, 0)),    # x (f32)
                full2((3 * C, C)),                                  # [wq/sqrt(d); wc1a]
                full2((2 * C, C)),                                  # [wk; wv]
                full2((2 * C, C)),                                  # wc1b @ wm
                full2((C, 2 * C)),                                  # cat conv2
                full2((3 * C, 3)),                                  # packed biases
            ],
            out_specs=pl.BlockSpec((None, C, M), lambda b: (b, 0, 0)),
        ),
        compiler_params=cparams,
    )(x_new, x, w_m1, w_kv, w_att, w_c2, pb)
    return out


# ---------------------------------------------------------------------------
# Synthetic parameters (torch-shaped, eval-mode BN stats) + pure-JAX reference
# ---------------------------------------------------------------------------
def make_params(key, channels):
    C = channels
    ks = iter(jax.random.split(key, 32))

    def conv(cin, cout):
        w = (1.0 / (cin ** 0.5)) * jax.random.normal(next(ks), (cout, cin), jnp.float32)
        b = 0.1 * jax.random.normal(next(ks), (cout,), jnp.float32)
        return w, b

    def bn(c):
        g = 1.0 + 0.1 * jax.random.normal(next(ks), (c,), jnp.float32)
        be = 0.1 * jax.random.normal(next(ks), (c,), jnp.float32)
        rm = 0.1 * jax.random.normal(next(ks), (c,), jnp.float32)
        rv = jnp.abs(jax.random.normal(next(ks), (c,), jnp.float32)) + 0.5
        return g, be, rm, rv

    p = {}
    p['proj_w'], p['proj_b'] = conv(C, 1)
    p['cn_w1'], p['cn_b1'] = conv(C, C)
    p['bn1_g'], p['bn1_b'], p['bn1_m'], p['bn1_v'] = bn(C)
    p['cn_w2'], p['cn_b2'] = conv(C, C)
    p['bn2_g'], p['bn2_b'], p['bn2_m'], p['bn2_v'] = bn(C)
    p['wq'], p['bq'] = conv(C, C)
    p['wk'], p['bk'] = conv(C, C)
    p['wv'], p['bv'] = conv(C, C)
    p['wm'], p['bm'] = conv(C, C)
    p['wc1'], p['bc1'] = conv(2 * C, 2 * C)
    p['bnc_g'], p['bnc_b'], p['bnc_m'], p['bnc_v'] = bn(2 * C)
    p['wc2'], p['bc2'] = conv(2 * C, C)
    return p


def _reference(x, p, *, head, k_ratio):
    """Pure-JAX mirror of Pool.forward (eval mode), f32 HIGHEST precision."""
    B, C, N = x.shape
    d = C // head
    hp = jax.lax.Precision.HIGHEST

    def conv1x1(w, b, v):
        return jnp.einsum('oi,bil->bol', w, v, precision=hp) + b[None, :, None]

    def instnorm(v, eps):
        mu = jnp.mean(v, axis=-1, keepdims=True)
        var = jnp.mean((v - mu) ** 2, axis=-1, keepdims=True)
        return (v - mu) / jnp.sqrt(var + eps)

    def batchnorm(v, g, be, rm, rv, eps=_BN_EPS):
        return ((v - rm[None, :, None]) / jnp.sqrt(rv[None, :, None] + eps)
                * g[None, :, None] + be[None, :, None])

    # scores (Dropout p=0 -> identity)
    logits = jnp.sum(x * p['proj_w'][0][None, :, None], axis=1) + p['proj_b'][0]
    scores = _stable_sigmoid(logits)                                  # (B, N)

    # PointCN
    h = instnorm(x, _IN_EPS)
    h = batchnorm(h, p['bn1_g'], p['bn1_b'], p['bn1_m'], p['bn1_v'])
    h = jnp.maximum(h, 0.0)
    h = conv1x1(p['cn_w1'], p['cn_b1'], h)
    h = instnorm(h, _IN_EPS)
    h = batchnorm(h, p['bn2_g'], p['bn2_b'], p['bn2_m'], p['bn2_v'])
    h = jnp.maximum(h, 0.0)
    h = conv1x1(p['cn_w2'], p['cn_b2'], h)
    xf = h + x

    # top-k graph
    M = int(k_ratio * N)
    vals, idx = jax.lax.top_k(scores, M)
    x_new = jnp.take_along_axis(xf, jnp.broadcast_to(idx[:, None, :], (B, C, M)),
                                axis=2) * vals[:, None, :]

    # AttentionPropagation(x_new, x)
    q = conv1x1(p['wq'], p['bq'], x_new).reshape(B, head, d, M)
    kk = conv1x1(p['wk'], p['bk'], x).reshape(B, head, d, N)
    v = conv1x1(p['wv'], p['bv'], x).reshape(B, head, d, N)
    s = jnp.einsum('bhdn,bhdm->bhnm', q, kk, precision=hp) / (d ** 0.5)
    s = s - jnp.max(s, axis=-1, keepdims=True)
    pr = jnp.exp(s)
    pr = pr / jnp.sum(pr, axis=-1, keepdims=True)
    av = jnp.einsum('bhnm,bhdm->bhdn', pr, v, precision=hp).reshape(B, C, M)
    av = conv1x1(p['wm'], p['bm'], av)
    cat = jnp.concatenate([x_new, av], axis=1)
    h = conv1x1(p['wc1'], p['bc1'], cat)
    h = batchnorm(h, p['bnc_g'], p['bnc_b'], p['bnc_m'], p['bnc_v'])
    h = jnp.maximum(h, 0.0)
    h = conv1x1(p['wc2'], p['bc2'], h)
    return x_new + h


if __name__ == "__main__":
    key = jax.random.PRNGKey(0)
    kx, kp = jax.random.split(key)

    B, C, N = 2, 64, 256          # small demo shapes; N, M lane-dense multiples of 128
    head, k_ratio = 4, 0.5
    M = int(k_ratio * N)

    x = jax.random.normal(kx, (B, C, N), jnp.float32)
    params = make_params(kp, C)

    fwd = jax.jit(functools.partial(pool_forward, head=head, k_ratio=k_ratio))
    out = jax.block_until_ready(fwd(x, params))

    ref = _reference(x, params, head=head, k_ratio=k_ratio)
    assert out.shape == (B, C, M)
    # Tolerance reflects bf16 MXU operands + bf16 pooled-feature intermediate
    # vs. an f32 HIGHEST-precision reference (f32 accumulation throughout).
    assert jnp.allclose(out, ref, atol=5e-2, rtol=5e-2), \
        float(jnp.max(jnp.abs(out - ref)))

    print("KERNEL_OK")
</pallas_src>

<mosaic_0001>
module attributes {stable_mosaic.version = 11 : i64} {
  func.func @_score_pointcn_kernel(%arg0: i32, %arg1: memref<1x64x256xf32, #tpu.memory_space<vmem>>, %arg2: memref<64x6xf32, #tpu.memory_space<vmem>>, %arg3: memref<1x1xf32, #tpu.memory_space<vmem>>, %arg4: memref<64x64xbf16, #tpu.memory_space<vmem>>, %arg5: memref<64x64xbf16, #tpu.memory_space<vmem>>, %arg6: memref<1x1x256xf32, #tpu.memory_space<vmem>>, %arg7: memref<1x64x256xbf16, #tpu.memory_space<vmem>>) attributes {dimension_semantics = [#tpu.dimension_semantics<parallel>], iteration_bounds = array<i64: 2>, scalar_prefetch = 0 : i64, scratch_operands = 0 : i64, tpu.core_type = #tpu.core_type<tc>, window_params = [{transform_indices = @transform_0, window_bounds = array<i64: 1, 64, 256>}, {pipeline_mode = #tpu.pipeline_mode<synchronous>, transform_indices = @transform_1, window_bounds = array<i64: 64, 6>}, {pipeline_mode = #tpu.pipeline_mode<synchronous>, transform_indices = @transform_2, window_bounds = array<i64: 1, 1>}, {pipeline_mode = #tpu.pipeline_mode<synchronous>, transform_indices = @transform_3, window_bounds = array<i64: 64, 64>}, {pipeline_mode = #tpu.pipeline_mode<synchronous>, transform_indices = @transform_4, window_bounds = array<i64: 64, 64>}, {transform_indices = @transform_5, window_bounds = array<i64: 1, 1, 256>}, {transform_indices = @transform_6, window_bounds = array<i64: 1, 64, 256>}]} {
    %c0 = arith.constant 0 : index
    %c0_0 = arith.constant 0 : index
    %c0_1 = arith.constant 0 : index
    %0 = vector.load %arg1[%c0, %c0_0, %c0_1] : memref<1x64x256xf32, #tpu.memory_space<vmem>>, vector<1x64x256xf32>
    %1 = vector.shape_cast %0 : vector<1x64x256xf32> to vector<64x256xf32>
    %c0_2 = arith.constant 0 : index
    %c0_3 = arith.constant 0 : index
    %2 = vector.load %arg2[%c0_2, %c0_3] : memref<64x6xf32, #tpu.memory_space<vmem>>, vector<64x6xf32>
    %3 = vector.extract_strided_slice %2 {offsets = [0, 0], sizes = [64, 1], strides = [1, 1]} : vector<64x6xf32> to vector<64x1xf32>
    %4 = vector.extract_strided_slice %2 {offsets = [0, 1], sizes = [64, 1], strides = [1, 1]} : vector<64x6xf32> to vector<64x1xf32>
    %5 = vector.extract_strided_slice %2 {offsets = [0, 2], sizes = [64, 1], strides = [1, 1]} : vector<64x6xf32> to vector<64x1xf32>
    %6 = vector.extract_strided_slice %2 {offsets = [0, 3], sizes = [64, 1], strides = [1, 1]} : vector<64x6xf32> to vector<64x1xf32>
    %7 = vector.extract_strided_slice %2 {offsets = [0, 4], sizes = [64, 1], strides = [1, 1]} : vector<64x6xf32> to vector<64x1xf32>
    %8 = vector.extract_strided_slice %2 {offsets = [0, 5], sizes = [64, 1], strides = [1, 1]} : vector<64x6xf32> to vector<64x1xf32>
    %9 = vector.broadcast %3 : vector<64x1xf32> to vector<64x256xf32>
    %10 = arith.mulf %1, %9 : vector<64x256xf32>
    %cst = arith.constant dense<0.000000e+00> : vector<256xf32>
    %11 = vector.multi_reduction <add>, %10, %cst [0] : vector<64x256xf32> to vector<256xf32>
    %12 = vector.shape_cast %11 : vector<256xf32> to vector<1x256xf32>
    %c0_4 = arith.constant 0 : index
    %c0_5 = arith.constant 0 : index
    %13 = vector.load %arg3[%c0_4, %c0_5] : memref<1x1xf32, #tpu.memory_space<vmem>>, vector<1x1xf32>
    %14 = vector.broadcast %13 : vector<1x1xf32> to vector<1x256xf32>
    %15 = arith.addf %12, %14 : vector<1x256xf32>
    %16 = math.absf %15 : vector<1x256xf32>
    %cst_6 = arith.constant 0.000000e+00 : f32
    %17 = vector.broadcast %cst_6 : f32 to vector<1x256xf32>
    %18 = arith.subf %17, %16 : vector<1x256xf32>
    %19 = math.exp %18 : vector<1x256xf32>
    %cst_7 = arith.constant 0.000000e+00 : f32
    %20 = vector.broadcast %cst_7 : f32 to vector<1x256xf32>
    %21 = arith.cmpf oge, %15, %20 : vector<1x256xf32>
    %cst_8 = arith.constant 1.000000e+00 : f32
    %22 = vector.broadcast %cst_8 : f32 to vector<1x256xf32>
    %23 = arith.addf %22, %19 : vector<1x256xf32>
    %cst_9 = arith.constant 1.000000e+00 : f32
    %24 = vector.broadcast %cst_9 : f32 to vector<1x256xf32>
    %25 = arith.divf %24, %23 : vector<1x256xf32>
    %cst_10 = arith.constant 1.000000e+00 : f32
    %26 = vector.broadcast %cst_10 : f32 to vector<1x256xf32>
    %27 = arith.addf %26, %19 : vector<1x256xf32>
    %28 = arith.divf %19, %27 : vector<1x256xf32>
    %29 = arith.select %21, %25, %28 : vector<1x256xi1>, vector<1x256xf32>
    %c0_11 = arith.constant 0 : index
    %c0_12 = arith.constant 0 : index
    %c0_13 = arith.constant 0 : index
    %30 = vector.load %arg6[%c0_11, %c0_12, %c0_13] : memref<1x1x256xf32, #tpu.memory_space<vmem>>, vector<1x1x256xf32>
    %31 = vector.shape_cast %30 : vector<1x1x256xf32> to vector<1x256xf32>
    %32 = vector.shape_cast %29 : vector<1x256xf32> to vector<1x1x256xf32>
    tpu.vector_store %arg6[%c0_11, %c0_12, %c0_13], %32 {strides = array<i32>} : memref<1x1x256xf32, #tpu.memory_space<vmem>>, vector<1x1x256xf32>,
    %cst_14 = arith.constant dense<0.000000e+00> : vector<64xf32>
    %33 = vector.multi_reduction <add>, %1, %cst_14 [1] : vector<64x256xf32> to vector<64xf32>
    %34 = vector.shape_cast %33 : vector<64xf32> to vector<64x1xf32>
    %cst_15 = arith.constant 3.906250e-03 : f32
    %35 = vector.broadcast %cst_15 : f32 to vector<64x1xf32>
    %36 = arith.mulf %34, %35 : vector<64x1xf32>
    %37 = arith.mulf %1, %1 : vector<64x256xf32>
    %cst_16 = arith.constant dense<0.000000e+00> : vector<64xf32>
    %38 = vector.multi_reduction <add>, %37, %cst_16 [1] : vector<64x256xf32> to vector<64xf32>
    %39 = vector.shape_cast %38 : vector<64xf32> to vector<64x1xf32>
    %cst_17 = arith.constant 3.906250e-03 : f32
    %40 = vector.broadcast %cst_17 : f32 to vector<64x1xf32>
    %41 = arith.mulf %39, %40 : vector<64x1xf32>
    %42 = arith.mulf %36, %36 : vector<64x1xf32>
    %43 = arith.subf %41, %42 : vector<64x1xf32>
    %cst_18 = arith.constant 0.000000e+00 : f32
    %44 = vector.broadcast %cst_18 : f32 to vector<64x1xf32>
    %45 = arith.maximumf %43, %44 : vector<64x1xf32>
    %cst_19 = arith.constant 1.000000e-03 : f32
    %46 = vector.broadcast %cst_19 : f32 to vector<64x1xf32>
    %47 = arith.addf %45, %46 : vector<64x1xf32>
    %48 = math.rsqrt %47 : vector<64x1xf32>
    %49 = arith.mulf %48, %4 : vector<64x1xf32>
    %50 = arith.mulf %36, %49 : vector<64x1xf32>
    %51 = arith.subf %5, %50 : vector<64x1xf32>
    %52 = vector.broadcast %49 : vector<64x1xf32> to vector<64x256xf32>
    %53 = arith.mulf %1, %52 : vector<64x256xf32>
    %54 = vector.broadcast %51 : vector<64x1xf32> to vector<64x256xf32>
    %55 = arith.addf %53, %54 : vector<64x256xf32>
    %cst_20 = arith.constant 0.000000e+00 : f32
    %56 = vector.broadcast %cst_20 : f32 to vector<64x256xf32>
    %57 = arith.maximumf %55, %56 : vector<64x256xf32>
    %c0_21 = arith.constant 0 : index
    %c0_22 = arith.constant 0 : index
    %58 = vector.load %arg4[%c0_21, %c0_22] : memref<64x64xbf16, #tpu.memory_space<vmem>>, vector<64x64xbf16>
    %59 = arith.truncf %57 : vector<64x256xf32> to vector<64x256xbf16>
    %cst_23 = arith.constant dense<0.000000e+00> : vector<64x256xf32>
    %60 = tpu.matmul %58, %59, %cst_23 {dimension_numbers = #tpu.dot_dimension_numbers<[1], [0], [0], [1], [0, 0, 1, 1], [], []>} : vector<64x64xbf16>, vector<64x256xbf16>, vector<64x256xf32> -> vector<64x256xf32>
    %cst_24 = arith.constant dense<0.000000e+00> : vector<64xf32>
    %61 = vector.multi_reduction <add>, %60, %cst_24 [1] : vector<64x256xf32> to vector<64xf32>
    %62 = vector.shape_cast %61 : vector<64xf32> to vector<64x1xf32>
    %cst_25 = arith.constant 3.906250e-03 : f32
    %63 = vector.broadcast %cst_25 : f32 to vector<64x1xf32>
    %64 = arith.mulf %62, %63 : vector<64x1xf32>
    %65 = arith.mulf %60, %60 : vector<64x256xf32>
    %cst_26 = arith.constant dense<0.000000e+00> : vector<64xf32>
    %66 = vector.multi_reduction <add>, %65, %cst_26 [1] : vector<64x256xf32> to vector<64xf32>
    %67 = vector.shape_cast %66 : vector<64xf32> to vector<64x1xf32>
    %cst_27 = arith.constant 3.906250e-03 : f32
    %68 = vector.broadcast %cst_27 : f32 to vector<64x1xf32>
    %69 = arith.mulf %67, %68 : vector<64x1xf32>
    %70 = arith.mulf %64, %64 : vector<64x1xf32>
    %71 = arith.subf %69, %70 : vector<64x1xf32>
    %cst_28 = arith.constant 0.000000e+00 : f32
    %72 = vector.broadcast %cst_28 : f32 to vector<64x1xf32>
    %73 = arith.maximumf %71, %72 : vector<64x1xf32>
    %cst_29 = arith.constant 1.000000e-03 : f32
    %74 = vector.broadcast %cst_29 : f32 to vector<64x1xf32>
    %75 = arith.addf %73, %74 : vector<64x1xf32>
    %76 = math.rsqrt %75 : vector<64x1xf32>
    %77 = arith.mulf %76, %6 : vector<64x1xf32>
    %78 = arith.mulf %64, %77 : vector<64x1xf32>
    %79 = arith.subf %7, %78 : vector<64x1xf32>
    %80 = vector.broadcast %77 : vector<64x1xf32> to vector<64x256xf32>
    %81 = arith.mulf %60, %80 : vector<64x256xf32>
    %82 = vector.broadcast %79 : vector<64x1xf32> to vector<64x256xf32>
    %83 = arith.addf %81, %82 : vector<64x256xf32>
    %cst_30 = arith.constant 0.000000e+00 : f32
    %84 = vector.broadcast %cst_30 : f32 to vector<64x256xf32>
    %85 = arith.maximumf %83, %84 : vector<64x256xf32>
    %c0_31 = arith.constant 0 : index
    %c0_32 = arith.constant 0 : index
    %86 = vector.load %arg5[%c0_31, %c0_32] : memref<64x64xbf16, #tpu.memory_space<vmem>>, vector<64x64xbf16>
    %87 = arith.truncf %85 : vector<64x256xf32> to vector<64x256xbf16>
    %cst_33 = arith.constant dense<0.000000e+00> : vector<64x256xf32>
    %88 = tpu.matmul %86, %87, %cst_33 {dimension_numbers = #tpu.dot_dimension_numbers<[1], [0], [0], [1], [0, 0, 1, 1], [], []>} : vector<64x64xbf16>, vector<64x256xbf16>, vector<64x256xf32> -> vector<64x256xf32>
    %89 = vector.broadcast %8 : vector<64x1xf32> to vector<64x256xf32>
    %90 = arith.addf %88, %89 : vector<64x256xf32>
    %91 = arith.addf %90, %1 : vector<64x256xf32>
    %92 = arith.truncf %91 : vector<64x256xf32> to vector<64x256xbf16>
    %c0_34 = arith.constant 0 : index
    %c0_35 = arith.constant 0 : index
    %c0_36 = arith.constant 0 : index
    %93 = vector.load %arg7[%c0_34, %c0_35, %c0_36] : memref<1x64x256xbf16, #tpu.memory_space<vmem>>, vector<1x64x256xbf16>
    %94 = vector.shape_cast %93 : vector<1x64x256xbf16> to vector<64x256xbf16>
    %95 = vector.shape_cast %92 : vector<64x256xbf16> to vector<1x64x256xbf16>
    tpu.vector_store %arg7[%c0_34, %c0_35, %c0_36], %95 {strides = array<i32>} : memref<1x64x256xbf16, #tpu.memory_space<vmem>>, vector<1x64x256xbf16>,
    return
  }
  func.func @transform_0(%arg0: i32) -> (i32, i32, i32) {
    %c0_i32 = arith.constant 0 : i32
    %c0_i32_0 = arith.constant 0 : i32
    %c0_i32_1 = arith.constant 0 : i32
    return %arg0, %c0_i32, %c0_i32_0 : i32, i32, i32
  }
  func.func @transform_1(%arg0: i32) -> (i32, i32) {
    %c0_i32 = arith.constant 0 : i32
    %c0_i32_0 = arith.constant 0 : i32
    %c0_i32_1 = arith.constant 0 : i32
    return %c0_i32, %c0_i32_0 : i32, i32
  }
  func.func @transform_2(%arg0: i32) -> (i32, i32) {
    %c0_i32 = arith.constant 0 : i32
    %c0_i32_0 = arith.constant 0 : i32
    %c0_i32_1 = arith.constant 0 : i32
    return %c0_i32, %c0_i32_0 : i32, i32
  }
  func.func @transform_3(%arg0: i32) -> (i32, i32) {
    %c0_i32 = arith.constant 0 : i32
    %c0_i32_0 = arith.constant 0 : i32
    %c0_i32_1 = arith.constant 0 : i32
    return %c0_i32, %c0_i32_0 : i32, i32
  }
  func.func @transform_4(%arg0: i32) -> (i32, i32) {
    %c0_i32 = arith.constant 0 : i32
    %c0_i32_0 = arith.constant 0 : i32
    %c0_i32_1 = arith.constant 0 : i32
    return %c0_i32, %c0_i32_0 : i32, i32
  }
  func.func @transform_5(%arg0: i32) -> (i32, i32, i32) {
    %c0_i32 = arith.constant 0 : i32
    %c0_i32_0 = arith.constant 0 : i32
    %c0_i32_1 = arith.constant 0 : i32
    return %arg0, %c0_i32, %c0_i32_0 : i32, i32, i32
  }
  func.func @transform_6(%arg0: i32) -> (i32, i32, i32) {
    %c0_i32 = arith.constant 0 : i32
    %c0_i32_0 = arith.constant 0 : i32
    %c0_i32_1 = arith.constant 0 : i32
    return %arg0, %c0_i32, %c0_i32_0 : i32, i32, i32
  }
}

module attributes {stable_mosaic.version = 11 : i64} {
  func.func @_attention_kernel(%arg0: i32, %arg1: memref<1x64x128xbf16, #tpu.memory_space<vmem>>, %arg2: memref<1x64x256xf32, #tpu.memory_space<vmem>>, %arg3: memref<192x64xbf16, #tpu.memory_space<vmem>>, %arg4: memref<128x64xbf16, #tpu.memory_space<vmem>>, %arg5: memref<128x64xbf16, #tpu.memory_space<vmem>>, %arg6: memref<64x128xbf16, #tpu.memory_space<vmem>>, %arg7: memref<192x3xf32, #tpu.memory_space<vmem>>, %arg8: memref<1x64x128xf32, #tpu.memory_space<vmem>>) attributes {dimension_semantics = [#tpu.dimension_semantics<parallel>], iteration_bounds = array<i64: 2>, scalar_prefetch = 0 : i64, scratch_operands = 0 : i64, tpu.core_type = #tpu.core_type<tc>, window_params = [{transform_indices = @transform_0, window_bounds = array<i64: 1, 64, 128>}, {transform_indices = @transform_1, window_bounds = array<i64: 1, 64, 256>}, {pipeline_mode = #tpu.pipeline_mode<synchronous>, transform_indices = @transform_2, window_bounds = array<i64: 192, 64>}, {pipeline_mode = #tpu.pipeline_mode<synchronous>, transform_indices = @transform_3, window_bounds = array<i64: 128, 64>}, {pipeline_mode = #tpu.pipeline_mode<synchronous>, transform_indices = @transform_4, window_bounds = array<i64: 128, 64>}, {pipeline_mode = #tpu.pipeline_mode<synchronous>, transform_indices = @transform_5, window_bounds = array<i64: 64, 128>}, {pipeline_mode = #tpu.pipeline_mode<synchronous>, transform_indices = @transform_6, window_bounds = array<i64: 192, 3>}, {transform_indices = @transform_7, window_bounds = array<i64: 1, 64, 128>}]} {
    %c0 = arith.constant 0 : index
    %c0_0 = arith.constant 0 : index
    %c0_1 = arith.constant 0 : index
    %0 = vector.load %arg1[%c0, %c0_0, %c0_1] : memref<1x64x128xbf16, #tpu.memory_space<vmem>>, vector<1x64x128xbf16>
    %1 = vector.shape_cast %0 : vector<1x64x128xbf16> to vector<64x128xbf16>
    %c0_2 = arith.constant 0 : index
    %c0_3 = arith.constant 0 : index
    %c0_4 = arith.constant 0 : index
    %2 = vector.load %arg2[%c0_2, %c0_3, %c0_4] : memref<1x64x256xf32, #tpu.memory_space<vmem>>, vector<1x64x256xf32>
    %3 = vector.shape_cast %2 : vector<1x64x256xf32> to vector<64x256xf32>
    %c0_5 = arith.constant 0 : index
    %c0_6 = arith.constant 0 : index
    %4 = vector.load %arg7[%c0_5, %c0_6] : memref<192x3xf32, #tpu.memory_space<vmem>>, vector<192x3xf32>
    %5 = vector.extract_strided_slice %4 {offsets = [0, 0], sizes = [192, 1], strides = [1, 1]} : vector<192x3xf32> to vector<192x1xf32>
    %6 = vector.extract_strided_slice %4 {offsets = [0, 1], sizes = [128, 1], strides = [1, 1]} : vector<192x3xf32> to vector<128x1xf32>
    %7 = vector.extract_strided_slice %4 {offsets = [0, 2], sizes = [64, 1], strides = [1, 1]} : vector<192x3xf32> to vector<64x1xf32>
    %c0_7 = arith.constant 0 : index
    %c0_8 = arith.constant 0 : index
    %8 = vector.load %arg3[%c0_7, %c0_8] : memref<192x64xbf16, #tpu.memory_space<vmem>>, vector<192x64xbf16>
    %cst = arith.constant dense<0.000000e+00> : vector<192x128xf32>
    %9 = tpu.matmul %8, %1, %cst {dimension_numbers = #tpu.dot_dimension_numbers<[1], [0], [0], [1], [0, 0, 1, 1], [], []>} : vector<192x64xbf16>, vector<64x128xbf16>, vector<192x128xf32> -> vector<192x128xf32>
    %10 = vector.broadcast %5 : vector<192x1xf32> to vector<192x128xf32>
    %11 = arith.addf %9, %10 : vector<192x128xf32>
    %12 = vector.extract_strided_slice %11 {offsets = [0, 0], sizes = [64, 128], strides = [1, 1]} : vector<192x128xf32> to vector<64x128xf32>
    %13 = vector.extract_strided_slice %11 {offsets = [64, 0], sizes = [128, 128], strides = [1, 1]} : vector<192x128xf32> to vector<128x128xf32>
    %c0_9 = arith.constant 0 : index
    %c0_10 = arith.constant 0 : index
    %14 = vector.load %arg4[%c0_9, %c0_10] : memref<128x64xbf16, #tpu.memory_space<vmem>>, vector<128x64xbf16>
    %15 = arith.truncf %3 : vector<64x256xf32> to vector<64x256xbf16>
    %cst_11 = arith.constant dense<0.000000e+00> : vector<128x256xf32>
    %16 = tpu.matmul %14, %15, %cst_11 {dimension_numbers = #tpu.dot_dimension_numbers<[1], [0], [0], [1], [0, 0, 1, 1], [], []>} : vector<128x64xbf16>, vector<64x256xbf16>, vector<128x256xf32> -> vector<128x256xf32>
    %17 = vector.broadcast %6 : vector<128x1xf32> to vector<128x256xf32>
    %18 = arith.addf %16, %17 : vector<128x256xf32>
    %19 = vector.extract_strided_slice %18 {offsets = [0, 0], sizes = [64, 256], strides = [1, 1]} : vector<128x256xf32> to vector<64x256xf32>
    %20 = vector.extract_strided_slice %18 {offsets = [64, 0], sizes = [64, 256], strides = [1, 1]} : vector<128x256xf32> to vector<64x256xf32>
    %cst_12 = arith.constant 1.000000e+00 : bf16
    %21 = vector.broadcast %cst_12 : bf16 to vector<1x256xbf16>
    %22 = vector.extract_strided_slice %12 {offsets = [0, 0], sizes = [16, 128], strides = [1, 1]} : vector<64x128xf32> to vector<16x128xf32>
    %23 = arith.truncf %22 : vector<16x128xf32> to vector<16x128xbf16>
    %24 = vector.extract_strided_slice %19 {offsets = [0, 0], sizes = [16, 256], strides = [1, 1]} : vector<64x256xf32> to vector<16x256xf32>
    %25 = arith.truncf %24 : vector<16x256xf32> to vector<16x256xbf16>
    %cst_13 = arith.constant dense<0.000000e+00> : vector<128x256xf32>
    %26 = tpu.matmul %23, %25, %cst_13 {dimension_numbers = #tpu.dot_dimension_numbers<[0], [0], [1], [1], [0, 1, 1, 1], [], []>} : vector<16x128xbf16>, vector<16x256xbf16>, vector<128x256xf32> -> vector<128x256xf32>
    %cst_14 = arith.constant dense<0xFF800000> : vector<128xf32>
    %27 = vector.multi_reduction <maximumf>, %26, %cst_14 [1] : vector<128x256xf32> to vector<128xf32>
    %28 = vector.shape_cast %27 : vector<128xf32> to vector<128x1xf32>
    %29 = vector.broadcast %28 : vector<128x1xf32> to vector<128x256xf32>
    %30 = arith.subf %26, %29 : vector<128x256xf32>
    %31 = math.exp %30 : vector<128x256xf32>
    %32 = arith.truncf %31 : vector<128x256xf32> to vector<128x256xbf16>
    %33 = vector.extract_strided_slice %20 {offsets = [0, 0], sizes = [16, 256], strides = [1, 1]} : vector<64x256xf32> to vector<16x256xf32>
    %34 = arith.truncf %33 : vector<16x256xf32> to vector<16x256xbf16>
    %35 = tpu.concatenate %34, %21 in 0 : vector<16x256xbf16>, vector<1x256xbf16> -> vector<17x256xbf16>
    %cst_15 = arith.constant dense<0.000000e+00> : vector<17x128xf32>
    %36 = tpu.matmul %35, %32, %cst_15 {dimension_numbers = #tpu.dot_dimension_numbers<[1], [1], [0], [0], [0, 0, 1, 0], [], []>} : vector<17x256xbf16>, vector<128x256xbf16>, vector<17x128xf32> -> vector<17x128xf32>
    %37 = vector.extract_strided_slice %36 {offsets = [16, 0], sizes = [1, 128], strides = [1, 1]} : vector<17x128xf32> to vector<1x128xf32>
    %38 = tpu.reciprocal %37 {approx = true} : vector<1x128xf32> -> vector<1x128xf32>
    %39 = vector.extract_strided_slice %36 {offsets = [0, 0], sizes = [16, 128], strides = [1, 1]} : vector<17x128xf32> to vector<16x128xf32>
    %40 = vector.broadcast %38 : vector<1x128xf32> to vector<16x128xf32>
    %41 = arith.mulf %39, %40 : vector<16x128xf32>
    %42 = vector.extract_strided_slice %12 {offsets = [16, 0], sizes = [16, 128], strides = [1, 1]} : vector<64x128xf32> to vector<16x128xf32>
    %43 = arith.truncf %42 : vector<16x128xf32> to vector<16x128xbf16>
    %44 = vector.extract_strided_slice %19 {offsets = [16, 0], sizes = [16, 256], strides = [1, 1]} : vector<64x256xf32> to vector<16x256xf32>
    %45 = arith.truncf %44 : vector<16x256xf32> to vector<16x256xbf16>
    %cst_16 = arith.constant dense<0.000000e+00> : vector<128x256xf32>
    %46 = tpu.matmul %43, %45, %cst_16 {dimension_numbers = #tpu.dot_dimension_numbers<[0], [0], [1], [1], [0, 1, 1, 1], [], []>} : vector<16x128xbf16>, vector<16x256xbf16>, vector<128x256xf32> -> vector<128x256xf32>
    %cst_17 = arith.constant dense<0xFF800000> : vector<128xf32>
    %47 = vector.multi_reduction <maximumf>, %46, %cst_17 [1] : vector<128x256xf32> to vector<128xf32>
    %48 = vector.shape_cast %47 : vector<128xf32> to vector<128x1xf32>
    %49 = vector.broadcast %48 : vector<128x1xf32> to vector<128x256xf32>
    %50 = arith.subf %46, %49 : vector<128x256xf32>
    %51 = math.exp %50 : vector<128x256xf32>
    %52 = arith.truncf %51 : vector<128x256xf32> to vector<128x256xbf16>
    %53 = vector.extract_strided_slice %20 {offsets = [16, 0], sizes = [16, 256], strides = [1, 1]} : vector<64x256xf32> to vector<16x256xf32>
    %54 = arith.truncf %53 : vector<16x256xf32> to vector<16x256xbf16>
    %55 = tpu.concatenate %54, %21 in 0 : vector<16x256xbf16>, vector<1x256xbf16> -> vector<17x256xbf16>
    %cst_18 = arith.constant dense<0.000000e+00> : vector<17x128xf32>
    %56 = tpu.matmul %55, %52, %cst_18 {dimension_numbers = #tpu.dot_dimension_numbers<[1], [1], [0], [0], [0, 0, 1, 0], [], []>} : vector<17x256xbf16>, vector<128x256xbf16>, vector<17x128xf32> -> vector<17x128xf32>
    %57 = vector.extract_strided_slice %56 {offsets = [16, 0], sizes = [1, 128], strides = [1, 1]} : vector<17x128xf32> to vector<1x128xf32>
    %58 = tpu.reciprocal %57 {approx = true} : vector<1x128xf32> -> vector<1x128xf32>
    %59 = vector.extract_strided_slice %56 {offsets = [0, 0], sizes = [16, 128], strides = [1, 1]} : vector<17x128xf32> to vector<16x128xf32>
    %60 = vector.broadcast %58 : vector<1x128xf32> to vector<16x128xf32>
    %61 = arith.mulf %59, %60 : vector<16x128xf32>
    %62 = vector.extract_strided_slice %12 {offsets = [32, 0], sizes = [16, 128], strides = [1, 1]} : vector<64x128xf32> to vector<16x128xf32>
    %63 = arith.truncf %62 : vector<16x128xf32> to vector<16x128xbf16>
    %64 = vector.extract_strided_slice %19 {offsets = [32, 0], sizes = [16, 256], strides = [1, 1]} : vector<64x256xf32> to vector<16x256xf32>
    %65 = arith.truncf %64 : vector<16x256xf32> to vector<16x256xbf16>
    %cst_19 = arith.constant dense<0.000000e+00> : vector<128x256xf32>
    %66 = tpu.matmul %63, %65, %cst_19 {dimension_numbers = #tpu.dot_dimension_numbers<[0], [0], [1], [1], [0, 1, 1, 1], [], []>} : vector<16x128xbf16>, vector<16x256xbf16>, vector<128x256xf32> -> vector<128x256xf32>
    %cst_20 = arith.constant dense<0xFF800000> : vector<128xf32>
    %67 = vector.multi_reduction <maximumf>, %66, %cst_20 [1] : vector<128x256xf32> to vector<128xf32>
    %68 = vector.shape_cast %67 : vector<128xf32> to vector<128x1xf32>
    %69 = vector.broadcast %68 : vector<128x1xf32> to vector<128x256xf32>
    %70 = arith.subf %66, %69 : vector<128x256xf32>
    %71 = math.exp %70 : vector<128x256xf32>
    %72 = arith.truncf %71 : vector<128x256xf32> to vector<128x256xbf16>
    %73 = vector.extract_strided_slice %20 {offsets = [32, 0], sizes = [16, 256], strides = [1, 1]} : vector<64x256xf32> to vector<16x256xf32>
    %74 = arith.truncf %73 : vector<16x256xf32> to vector<16x256xbf16>
    %75 = tpu.concatenate %74, %21 in 0 : vector<16x256xbf16>, vector<1x256xbf16> -> vector<17x256xbf16>
    %cst_21 = arith.constant dense<0.000000e+00> : vector<17x128xf32>
    %76 = tpu.matmul %75, %72, %cst_21 {dimension_numbers = #tpu.dot_dimension_numbers<[1], [1], [0], [0], [0, 0, 1, 0], [], []>} : vector<17x256xbf16>, vector<128x256xbf16>, vector<17x128xf32> -> vector<17x128xf32>
    %77 = vector.extract_strided_slice %76 {offsets = [16, 0], sizes = [1, 128], strides = [1, 1]} : vector<17x128xf32> to vector<1x128xf32>
    %78 = tpu.reciprocal %77 {approx = true} : vector<1x128xf32> -> vector<1x128xf32>
    %79 = vector.extract_strided_slice %76 {offsets = [0, 0], sizes = [16, 128], strides = [1, 1]} : vector<17x128xf32> to vector<16x128xf32>
    %80 = vector.broadcast %78 : vector<1x128xf32> to vector<16x128xf32>
    %81 = arith.mulf %79, %80 : vector<16x128xf32>
    %82 = vector.extract_strided_slice %12 {offsets = [48, 0], sizes = [16, 128], strides = [1, 1]} : vector<64x128xf32> to vector<16x128xf32>
    %83 = arith.truncf %82 : vector<16x128xf32> to vector<16x128xbf16>
    %84 = vector.extract_strided_slice %19 {offsets = [48, 0], sizes = [16, 256], strides = [1, 1]} : vector<64x256xf32> to vector<16x256xf32>
    %85 = arith.truncf %84 : vector<16x256xf32> to vector<16x256xbf16>
    %cst_22 = arith.constant dense<0.000000e+00> : vector<128x256xf32>
    %86 = tpu.matmul %83, %85, %cst_22 {dimension_numbers = #tpu.dot_dimension_numbers<[0], [0], [1], [1], [0, 1, 1, 1], [], []>} : vector<16x128xbf16>, vector<16x256xbf16>, vector<128x256xf32> -> vector<128x256xf32>
    %cst_23 = arith.constant dense<0xFF800000> : vector<128xf32>
    %87 = vector.multi_reduction <maximumf>, %86, %cst_23 [1] : vector<128x256xf32> to vector<128xf32>
    %88 = vector.shape_cast %87 : vector<128xf32> to vector<128x1xf32>
    %89 = vector.broadcast %88 : vector<128x1xf32> to vector<128x256xf32>
    %90 = arith.subf %86, %89 : vector<128x256xf32>
    %91 = math.exp %90 : vector<128x256xf32>
    %92 = arith.truncf %91 : vector<128x256xf32> to vector<128x256xbf16>
    %93 = vector.extract_strided_slice %20 {offsets = [48, 0], sizes = [16, 256], strides = [1, 1]} : vector<64x256xf32> to vector<16x256xf32>
    %94 = arith.truncf %93 : vector<16x256xf32> to vector<16x256xbf16>
    %95 = tpu.concatenate %94, %21 in 0 : vector<16x256xbf16>, vector<1x256xbf16> -> vector<17x256xbf16>
    %cst_24 = arith.constant dense<0.000000e+00> : vector<17x128xf32>
    %96 = tpu.matmul %95, %92, %cst_24 {dimension_numbers = #tpu.dot_dimension_numbers<[1], [1], [0], [0], [0, 0, 1, 0], [], []>} : vector<17x256xbf16>, vector<128x256xbf16>, vector<17x128xf32> -> vector<17x128xf32>
    %97 = vector.extract_strided_slice %96 {offsets = [16, 0], sizes = [1, 128], strides = [1, 1]} : vector<17x128xf32> to vector<1x128xf32>
    %98 = tpu.reciprocal %97 {approx = true} : vector<1x128xf32> -> vector<1x128xf32>
    %99 = vector.extract_strided_slice %96 {offsets = [0, 0], sizes = [16, 128], strides = [1, 1]} : vector<17x128xf32> to vector<16x128xf32>
    %100 = vector.broadcast %98 : vector<1x128xf32> to vector<16x128xf32>
    %101 = arith.mulf %99, %100 : vector<16x128xf32>
    %102 = tpu.concatenate %41, %61, %81, %101 in 0 : vector<16x128xf32>, vector<16x128xf32>, vector<16x128xf32>, vector<16x128xf32> -> vector<64x128xf32>
    %103 = arith.truncf %102 : vector<64x128xf32> to vector<64x128xbf16>
    %c0_25 = arith.constant 0 : index
    %c0_26 = arith.constant 0 : index
    %104 = vector.load %arg5[%c0_25, %c0_26] : memref<128x64xbf16, #tpu.memory_space<vmem>>, vector<128x64xbf16>
    %cst_27 = arith.constant dense<0.000000e+00> : vector<128x128xf32>
    %105 = tpu.matmul %104, %103, %cst_27 {dimension_numbers = #tpu.dot_dimension_numbers<[1], [0], [0], [1], [0, 0, 1, 1], [], []>} : vector<128x64xbf16>, vector<64x128xbf16>, vector<128x128xf32> -> vector<128x128xf32>
    %106 = arith.addf %13, %105 : vector<128x128xf32>
    %cst_28 = arith.constant 0.000000e+00 : f32
    %107 = vector.broadcast %cst_28 : f32 to vector<128x128xf32>
    %108 = arith.maximumf %106, %107 : vector<128x128xf32>
    %c0_29 = arith.constant 0 : index
    %c0_30 = arith.constant 0 : index
    %109 = vector.load %arg6[%c0_29, %c0_30] : memref<64x128xbf16, #tpu.memory_space<vmem>>, vector<64x128xbf16>
    %110 = arith.truncf %108 : vector<128x128xf32> to vector<128x128xbf16>
    %cst_31 = arith.constant dense<0.000000e+00> : vector<64x128xf32>
    %111 = tpu.matmul %109, %110, %cst_31 {dimension_numbers = #tpu.dot_dimension_numbers<[1], [0], [0], [1], [0, 0, 1, 1], [], []>} : vector<64x128xbf16>, vector<128x128xbf16>, vector<64x128xf32> -> vector<64x128xf32>
    %112 = vector.broadcast %7 : vector<64x1xf32> to vector<64x128xf32>
    %113 = arith.addf %111, %112 : vector<64x128xf32>
    %114 = arith.extf %1 : vector<64x128xbf16> to vector<64x128xf32>
    %115 = arith.addf %114, %113 : vector<64x128xf32>
    %c0_32 = arith.constant 0 : index
    %c0_33 = arith.constant 0 : index
    %c0_34 = arith.constant 0 : index
    %116 = vector.load %arg8[%c0_32, %c0_33, %c0_34] : memref<1x64x128xf32, #tpu.memory_space<vmem>>, vector<1x64x128xf32>
    %117 = vector.shape_cast %116 : vector<1x64x128xf32> to vector<64x128xf32>
    %118 = vector.shape_cast %115 : vector<64x128xf32> to vector<1x64x128xf32>
    tpu.vector_store %arg8[%c0_32, %c0_33, %c0_34], %118 {strides = array<i32>} : memref<1x64x128xf32, #tpu.memory_space<vmem>>, vector<1x64x128xf32>,
    return
  }
  func.func @transform_0(%arg0: i32) -> (i32, i32, i32) {
    %c0_i32 = arith.constant 0 : i32
    %c0_i32_0 = arith.constant 0 : i32
    %c0_i32_1 = arith.constant 0 : i32
    return %arg0, %c0_i32, %c0_i32_0 : i32, i32, i32
  }
  func.func @transform_1(%arg0: i32) -> (i32, i32, i32) {
    %c0_i32 = arith.constant 0 : i32
    %c0_i32_0 = arith.constant 0 : i32
    %c0_i32_1 = arith.constant 0 : i32
    return %arg0, %c0_i32, %c0_i32_0 : i32, i32, i32
  }
  func.func @transform_2(%arg0: i32) -> (i32, i32) {
    %c0_i32 = arith.constant 0 : i32
    %c0_i32_0 = arith.constant 0 : i32
    %c0_i32_1 = arith.constant 0 : i32
    return %c0_i32, %c0_i32_0 : i32, i32
  }
  func.func @transform_3(%arg0: i32) -> (i32, i32) {
    %c0_i32 = arith.constant 0 : i32
    %c0_i32_0 = arith.constant 0 : i32
    %c0_i32_1 = arith.constant 0 : i32
    return %c0_i32, %c0_i32_0 : i32, i32
  }
  func.func @transform_4(%arg0: i32) -> (i32, i32) {
    %c0_i32 = arith.constant 0 : i32
    %c0_i32_0 = arith.constant 0 : i32
    %c0_i32_1 = arith.constant 0 : i32
    return %c0_i32, %c0_i32_0 : i32, i32
  }
  func.func @transform_5(%arg0: i32) -> (i32, i32) {
    %c0_i32 = arith.constant 0 : i32
    %c0_i32_0 = arith.constant 0 : i32
    %c0_i32_1 = arith.constant 0 : i32
    return %c0_i32, %c0_i32_0 : i32, i32
  }
  func.func @transform_6(%arg0: i32) -> (i32, i32) {
    %c0_i32 = arith.constant 0 : i32
    %c0_i32_0 = arith.constant 0 : i32
    %c0_i32_1 = arith.constant 0 : i32
    return %c0_i32, %c0_i32_0 : i32, i32
  }
  func.func @transform_7(%arg0: i32) -> (i32, i32, i32) {
    %c0_i32 = arith.constant 0 : i32
    %c0_i32_0 = arith.constant 0 : i32
    %c0_i32_1 = arith.constant 0 : i32
    return %arg0, %c0_i32, %c0_i32_0 : i32, i32, i32
  }
}

</mosaic_0001>

<bundles_post_ra>
// kernel: pool_forward.2
= control target key start
LH: loop header
LB: loop body
LE: loop exit
PB: predicated region body
PF: predicated region fallthrough
CT: control target
= control target key end

     0   :  { %s1664_s23 = smov 0   ;;  %s2194_s0 = inlined_call_operand.vmem [shape: f32[2,64,256], index: 0, kind: input, shape index: {}]   ;;  %s2195_s1 = inlined_call_operand.vmem [shape: f32[64,6], index: 1, kind: input, shape index: {}]   ;;  %s2196_s2 = inlined_call_operand.<no memory space> [shape: f32[1,1], index: 2, kind: input, shape index: {}]   ;;  %s2197_s3 = inlined_call_operand.vmem [shape: bf16[64,64], index: 3, kind: input, shape index: {}]   ;;  %s2198_s4 = inlined_call_operand.vmem [shape: bf16[64,64], index: 4, kind: input, shape index: {}]   ;;  %s2199_s5 = inlined_call_operand.vmem [shape: f32[2,1,256], index: 5, kind: output, shape index: {0}]   ;;  %s2200_s6 = inlined_call_operand.vmem [shape: bf16[2,64,256], index: 6, kind: output, shape index: {1}]  }
   0x1   :  { %v12_v0 = vstv %s2196_s2 }
   0x2   :  { %13 = vst [vmem:[#allocation2] sm:$0x1] %v12_v0 }
   0x3 LB: > { %s1468_s24 = sadd.s32 4294967295, %s1616_s23   ;;  %p1472_p0 = scmp.ge.s32.totalorder %s1616_s23, 1  ;;  %s1616_s23 = sphi %s1664_s23, %s19_s23  }
   0x4   : > { %p217_p1 = scmp.lt.s32.totalorder %s1616_s23, 3 }
   0x6   : > { %p218_p2 = pnand %p1472_p0, %p217_p1 }
   0x7   : > { %p251_p3 = scmp.lt.s32.totalorder (!%p218_p2), %s1468_s24, 1  ;;  %s1619_s8 = smov (!%p218_p2), 1  }
   0x8   : > { %221 = sbr.rel (%p218_p2) target bundleno = 1369 (0x559), region = 40 }
   0xd   : > { %s2202_s24 = smov (!%p251_p3, %s1468_s24), 1  ;;  %v1618_v49 = vmov 1   ;;  %vm767_vm0 = vcmask 523264  }
   0xe   : > { %s1504_s2 = sshll.u32 %s2202_s24, 7  ;;  %1531 = vset.pattern.permute.xlu1 %v1618_v49  ;;  %1530 = vset.pattern.permute.xlu0 %v1618_v49  ;;  %s1475_s14 = sshll.u32 %s2202_s24, 1 }
   0xf   : > { %s1678_s27 = scalar_lea.vmem %s2194_s0, %s1504_s2  ;;  %s259_s17 = scalar_lea.vmem %s2199_s5, %s1475_s14 }
  0x10   : > { %v1681_v1 = vld [vmem:[%s1678_s27 + $0x60] sm:$0xff]  ;;  %v1684_v2 = vld [vmem:[%s1678_s27 + $0x68] sm:$0xff]  ;;  %v1687_v3 = vld [vmem:[%s1678_s27 + $0x50] sm:$0xff]  ;;  %s1505_s18 = sshll.u32 %s2202_s24, 6 }
  0x11   : > { %v445_v4 = vadd.f32 %v1684_v2, %v1681_v1  ;;  %v1692_v5 = vld [vmem:[%s1678_s27 + $0x58] sm:$0xff]  ;;  %v1695_v6 = vld [vmem:[%s1678_s27 + $0x70] sm:$0xff]  ;;  %v471_v8 = vmul.f32 %v1681_v1, %v1681_v1  ;;  %v472_v9 = vmul.f32 %v1684_v2, %v1684_v2  ;;  %v1713_v15 = vld [vmem:[%s1678_s27 + $0x40] sm:$0xff]  ;;  %v469_v21 = vmul.f32 %v1687_v3, %v1687_v3  ;;  %s2167_s21 = scalar_lea.vmem %s2200_s6, %s1505_s18 }
  0x12   : > { %v1698_v7 = vld [vmem:[%s1678_s27 + $0x78] sm:$0xff]  ;;  %v442_v10 = vadd.f32 %v1692_v5, %v1687_v3  ;;  %v473_v13 = vmul.f32 %v1695_v6, %v1695_v6  ;;  %v1716_v16 = vld [vmem:[%s1678_s27 + $0x48] sm:$0xff]  ;;  %v467_v18 = vmul.f32 %v1713_v15, %v1713_v15  ;;  %v470_v22 = vmul.f32 %v1692_v5, %v1692_v5  ;;  %v1729_v25 = vld [vmem:[%s1678_s27 + $0x20] sm:$0xff] }
  0x13   : > { %446 = vadd.xlane.f32.xlu0 %v445_v4  ;;  %v448_v11 = vadd.f32 %v1698_v7, %v1695_v6  ;;  %v493_v12 = vadd.f32 %v472_v9, %v471_v8  ;;  %v474_v14 = vmul.f32 %v1698_v7, %v1698_v7  ;;  %v439_v17 = vadd.f32 %v1716_v16, %v1713_v15  ;;  %v1732_v26 = vld [vmem:[%s1678_s27 + $0x28] sm:$0xff]  ;;  %v1735_v27 = vld [vmem:[%s1678_s27 + $0x30] sm:$0xff]  ;;  %v1738_v28 = vld [vmem:[%s1678_s27 + $0x38] sm:$0xff] }
  0x14   : > { %443 = vadd.xlane.f32.xlu1 %v442_v10  ;;  %v468_v19 = vmul.f32 %v1716_v16, %v1716_v16  ;;  %v490_v24 = vadd.f32 %v470_v22, %v469_v21  ;;  %v433_v29 = vadd.f32 %v1732_v26, %v1729_v25  ;;  %v463_v30 = vmul.f32 %v1729_v25, %v1729_v25  ;;  %v1753_v37 = vld [vmem:[%s1678_s27] sm:$0xff]  ;;  %v1756_v38 = vld [vmem:[%s1678_s27 + $0x8] sm:$0xff]  ;;  %v1759_v39 = vld [vmem:[%s1678_s27 + $0x10] sm:$0xff] }
  0x15   : > { %v496_v20 = vadd.f32 %v474_v14, %v473_v13  ;;  %v464_v31 = vmul.f32 %v1732_v26, %v1732_v26  ;;  %v436_v32 = vadd.f32 %v1738_v28, %v1735_v27  ;;  %v465_v33 = vmul.f32 %v1735_v27, %v1735_v27  ;;  %v1762_v40 = vld [vmem:[%s1678_s27 + $0x18] sm:$0xff] }
  0x16   : > { %v487_v23 = vadd.f32 %v468_v19, %v467_v18  ;;  %v466_v34 = vmul.f32 %v1738_v28, %v1738_v28  ;;  %v427_v41 = vadd.f32 %v1756_v38, %v1753_v37  ;;  %v459_v42 = vmul.f32 %v1753_v37, %v1753_v37 }
  0x17   : > { %449 = vadd.xlane.f32.xlu0 %v448_v11  ;;  %v481_v35 = vadd.f32 %v464_v31, %v463_v30  ;;  %v460_v43 = vmul.f32 %v1756_v38, %v1756_v38  ;;  %v430_v44 = vadd.f32 %v1762_v40, %v1759_v39  ;;  %v461_v45 = vmul.f32 %v1759_v39, %v1759_v39 }
  0x18   : > { %494 = vadd.xlane.f32.xlu1 %v493_v12  ;;  %v484_v36 = vadd.f32 %v466_v34, %v465_v33  ;;  %v462_v46 = vmul.f32 %v1762_v40, %v1762_v40 }
  0x19   : > { %v475_v47 = vadd.f32 %v460_v43, %v459_v42 }
  0x1a   : > { %v478_v48 = vadd.f32 %v462_v46, %v461_v45 }
  0x1b   : > { %440 = vadd.xlane.f32.xlu0 %v439_v17 }
  0x1c   : > { %497 = vadd.xlane.f32.xlu1 %v496_v20 }
  0x1f   : > { %488 = vadd.xlane.f32.xlu0 %v487_v23 }
  0x20   : > { %491 = vadd.xlane.f32.xlu1 %v490_v24 }
  0x23   : > { %434 = vadd.xlane.f32.xlu0 %v433_v29 }
  0x24   : > { %437 = vadd.xlane.f32.xlu1 %v436_v32 }
  0x27   : > { %482 = vadd.xlane.f32.xlu0 %v481_v35 }
  0x28   : > { %485 = vadd.xlane.f32.xlu1 %v484_v36 }
  0x2b   : > { %428 = vadd.xlane.f32.xlu0 %v427_v41 }
  0x2c   : > { %431 = vadd.xlane.f32.xlu1 %v430_v44 }
  0x2f   : > { %476 = vadd.xlane.f32.xlu0 %v475_v47 }
  0x30   : > { %479 = vadd.xlane.f32.xlu1 %v478_v48 }
  0x9c   : > { %v447_v50 = vpop.xlane.xlu0 %446 }
  0x9d   : > { %v444_v51 = vpop.xlane.xlu1 %443  ;;  %v1776_v52 = vmul.f32 0.00390625, %v447_v50  ;;  %v1803_v50 = vld [vmem:[%s2195_s1 + $0x30] sm:$0xff] }
  0x9e   : > { %v1784_v62 = vmul.f32 0.00390625, %v444_v51 }
  0x9f   : > { %v513_v55 = vmul.f32 %v1776_v52, %v1776_v52 }
  0xa0   : > { %v450_v53 = vpop.xlane.xlu0 %449  ;;  %v512_v14 = vmul.f32 %v1784_v62, %v1784_v62 }
  0xa1   : > { %v495_v54 = vpop.xlane.xlu1 %494  ;;  %v1780_v56 = vmul.f32 0.00390625, %v450_v53 }
  0xa2   : > { %v505_v57 = vmul.f32 0.00390625, %v495_v54 }
  0xa3   : > { %v514_v63 = vmul.f32 %v1780_v56, %v1780_v56 }
  0xa4   : > { %v521_v58 = vsub.f32 %v505_v57, %v513_v55  ;;  %v441_v59 = vpop.xlane.xlu0 %440 }
  0xa5   : > { %v498_v60 = vpop.xlane.xlu1 %497  ;;  %v1782_v61 = vmul.f32 0.00390625, %v441_v59 }
  0xa6   : > { %v529_v0 = vmax.f32 %v521_v58, 0.0  ;;  %v506_v4 = vmul.f32 0.00390625, %v498_v60 }
  0xa7   : > { %v511_v11 = vmul.f32 %v1782_v61, %v1782_v61 }
  0xa8   : > { %v537_v8 = vadd.f32 0.001, %v529_v0  ;;  %v522_v9 = vsub.f32 %v506_v4, %v514_v63  ;;  %v489_v10 = vpop.xlane.xlu0 %488  ;;  %v1809_v4 = vld [vmem:[%s2195_s1 + $0x38] sm:$0xff] }
  0xa9   : > { %v492_v12 = vpop.xlane.xlu1 %491  ;;  %v503_v13 = vmul.f32 0.00390625, %v489_v10 }
  0xaa   : > { %1554 = vrsqrt.f32 %v537_v8  ;;  %v530_v17 = vmax.f32 %v522_v9, 0.0  ;;  %v504_v18 = vmul.f32 0.00390625, %v492_v12 }
  0xab   : > { %v519_v19 = vsub.f32 %v503_v13, %v511_v11 }
  0xac   : > { %v538_v20 = vadd.f32 0.001, %v530_v17  ;;  %v520_v21 = vsub.f32 %v504_v18, %v512_v14  ;;  %v435_v22 = vpop.xlane.xlu0 %434  ;;  %v1817_v17 = vld [vmem:[%s2195_s1 + $0x20] sm:$0xff] }
  0xad   : > { %v527_v23 = vmax.f32 %v519_v19, 0.0  ;;  %v438_v24 = vpop.xlane.xlu1 %437  ;;  %v1792_v29 = vmul.f32 0.00390625, %v435_v22 }
  0xae   : > { %1556 = vrsqrt.f32 %v538_v20  ;;  %v528_v30 = vmax.f32 %v520_v21, 0.0  ;;  %v1794_v31 = vmul.f32 0.00390625, %v438_v24  ;;  %v1824_v24 = vld [vmem:[%s2195_s1 + $0x28] sm:$0xff] }
  0xaf   : > { %v535_v32 = vadd.f32 0.001, %v527_v23  ;;  %v509_v35 = vmul.f32 %v1792_v29, %v1792_v29 }
  0xb0   : > { %v536_v33 = vadd.f32 0.001, %v528_v30  ;;  %v483_v34 = vpop.xlane.xlu0 %482  ;;  %v510_v42 = vmul.f32 %v1794_v31, %v1794_v31 }
  0xb1   : > { %1558 = vrsqrt.f32 %v535_v32  ;;  %v486_v36 = vpop.xlane.xlu1 %485  ;;  %v501_v41 = vmul.f32 0.00390625, %v483_v34  ;;  %v1838_v34 = vld [vmem:[%s2195_s1 + $0x18] sm:$0xff] }
  0xb2   : > { %1560 = vrsqrt.f32 %v536_v33  ;;  %v502_v43 = vmul.f32 0.00390625, %v486_v36 }
  0xb3   : > { %v517_v44 = vsub.f32 %v501_v41, %v509_v35 }
  0xb4   : > { %v518_v45 = vsub.f32 %v502_v43, %v510_v42  ;;  %v429_v46 = vpop.xlane.xlu0 %428 }
  0xb5   : > { %v525_v47 = vmax.f32 %v517_v44, 0.0  ;;  %v432_v48 = vpop.xlane.xlu1 %431  ;;  %v451_v49 = vmul.f32 0.00390625, %v429_v46 }
  0xb6   : > { %v526_v51 = vmax.f32 %v518_v45, 0.0  ;;  %v452_v53 = vmul.f32 0.00390625, %v432_v48  ;;  %v1851_v45 = vld [vmem:[%s2195_s1] sm:$0xff] }
  0xb7   : > { %v1555_v54 = vpop.eup %1554  ;;  %v533_v55 = vadd.f32 0.001, %v525_v47  ;;  %v507_v60 = vmul.f32 %v451_v49, %v451_v49 }
  0xb8   : > { %v534_v57 = vadd.f32 0.001, %v526_v51  ;;  %v477_v58 = vpop.xlane.xlu0 %476  ;;  %v553_v59 = vmul.f32 %v1555_v54, %v1803_v50  ;;  %v508_v8 = vmul.f32 %v452_v53, %v452_v53  ;;  %v1620_v54 = vmov 2  }
  0xb9   : > { %1562 = vrsqrt.f32 %v533_v55  ;;  %v480_v63 = vpop.xlane.xlu1 %479  ;;  %v499_v0 = vmul.f32 0.00390625, %v477_v58 }
  0xba   : > { %1564 = vrsqrt.f32 %v534_v57  ;;  %v500_v9 = vmul.f32 0.00390625, %v480_v63  ;;  %v561_v10 = vmul.f32 %v553_v59, %v1776_v52 }
  0xbb   : > { %v1557_v11 = vpop.eup %1556  ;;  %v515_v12 = vsub.f32 %v499_v0, %v507_v60 }
  0xbc   : > { %v516_v13 = vsub.f32 %v500_v9, %v508_v8  ;;  %583 = vrot.lane.b32.xlu0 %v561_v10, %s1619_s8  ;;  %v554_v14 = vmul.f32 %v1557_v11, %v1809_v4 }
  0xbd   : > { %v523_v18 = vmax.f32 %v515_v12, 0.0 }
  0xbe   : > { %v1559_v19 = vpop.eup %1558  ;;  %v524_v20 = vmax.f32 %v516_v13, 0.0  ;;  %v562_v21 = vmul.f32 %v554_v14, %v1780_v56  ;;  %v1833_v56 = vld [vmem:[%s2195_s1 + $0x10] sm:$0xff] }
  0xbf   : > { %v1561_v22 = vpop.eup %1560  ;;  %v531_v52 = vadd.f32 0.001, %v523_v18  ;;  %v551_v23 = vmul.f32 %v1559_v19, %v1817_v17  ;;  %v1621_v18 = vmov 0  }
  0xc0   : > { %v532_v30 = vadd.f32 0.001, %v524_v20  ;;  %585 = vrot.lane.b32.xlu1 %v562_v21, %s1619_s8  ;;  %v552_v33 = vmul.f32 %v1561_v22, %v1824_v24  ;;  %812 = vmatprep.mubr.bf16.mxu0 %v1621_v18 }
  0xc1   : > { %1566 = vrsqrt.f32 %v531_v52  ;;  %v559_v32 = vmul.f32 %v551_v23, %v1782_v61  ;;  %1269 = vmatprep.mubr.bf16.mxu1 %v1621_v18 }
  0xc2   : > { %1568 = vrsqrt.f32 %v532_v30  ;;  %v560_v36 = vmul.f32 %v552_v33, %v1784_v62  ;;  %v1856_v62 = vld [vmem:[%s2195_s1 + $0x8] sm:$0xff] }
  0xc4   : > { %579 = vrot.lane.b32.xlu1 %v559_v32, %s1619_s8 }
  0xc6   : > { %v1563_v35 = vpop.eup %1562 }
  0xc7   : > { %v1565_v41 = vpop.eup %1564  ;;  %v549_v61 = vmul.f32 %v1563_v35, %v1833_v56 }
  0xc8   : > { %581 = vrot.lane.b32.xlu1 %v560_v36, %s1619_s8  ;;  %v550_v42 = vmul.f32 %v1565_v41, %v1838_v34 }
  0xc9   : > { %v557_v43 = vmul.f32 %v549_v61, %v1792_v29 }
  0xca   : > { %v558_v44 = vmul.f32 %v550_v42, %v1794_v31 }
  0xcb   : > { %575 = vrot.lane.b32.xlu0 %v557_v43, %s1619_s8 }
  0xcc   : > { %577 = vrot.lane.b32.xlu1 %v558_v44, %s1619_s8 }
  0xce   : > { %v1567_v46 = vpop.eup %1566 }
  0xcf   : > { %v1569_v47 = vpop.eup %1568  ;;  %v547_v29 = vmul.f32 %v1567_v46, %v1851_v45 }
  0xd0   : > { %v548_v31 = vmul.f32 %v1569_v47, %v1856_v62 }
  0xd1   : > { %v555_v48 = vmul.f32 %v547_v29, %v451_v49 }
  0xd2   : > { %v556_v51 = vmul.f32 %v548_v31, %v452_v53 }
  0xd3   : > { %571 = vrot.lane.b32.xlu0 %v555_v48, %s1619_s8 }
  0xd4   : > { %573 = vrot.lane.b32.xlu1 %v556_v51, %s1619_s8 }
  0xd7   : > { %635 = vperm.xlu0 %1530, %v553_v59  }
  0xd8   : > { %640 = vperm.xlu1 %1531, %v554_v14  }
  0xdb   : > { %615 = vperm.xlu0 %1530, %v549_v61  }
  0xdc   : > { %625 = vperm.xlu1 %1531, %v551_v23  }
  0xdf   : > { %1533 = vset.pattern.permute.xlu0 %v1620_v54 }
  0xe0   : > { %630 = vperm.xlu1 %1531, %v552_v33  }
  0xe4   : > { %620 = vperm.xlu1 %1531, %v550_v42  }
  0xe8   : > { %605 = vperm.xlu1 %1531, %v547_v29  }
  0xec   : > { %610 = vperm.xlu1 %1531, %v548_v31  }
  0xf0   : > { %1532 = vset.pattern.permute.xlu1 %v1620_v54 }
 0x12e   : > { %v584_v55 = vpop.permute.xlu0 %583 }
 0x12f   : > { %v601_v57 = vsub.f32 %v1803_v50, %v584_v55 }
 0x131   : > { %691 = vperm.xlu1 %1532, %v601_v57  }
 0x132   : > { %v586_v49 = vpop.permute.xlu1 %585 }
 0x133   : > { %v602_v53 = vsub.f32 %v1809_v4, %v586_v49 }
 0x135   : > { %696 = vperm.xlu0 %1533, %v602_v53  }
 0x136   : > { %v580_v58 = vpop.permute.xlu1 %579 }
 0x137   : > { %v599_v59 = vsub.f32 %v1817_v17, %v580_v58 }
 0x139   : > { %681 = vperm.xlu0 %1533, %v599_v59  }
 0x13a   : > { %v582_v60 = vpop.permute.xlu1 %581 }
 0x13b   : > { %v600_v63 = vsub.f32 %v1824_v24, %v582_v60 }
 0x13d   : > { %686 = vperm.xlu1 %1532, %v600_v63   ;;  %v576_v0 = vpop.permute.xlu0 %575 }
 0x13e   : > { %v578_v8 = vpop.permute.xlu1 %577  ;;  %v597_v9 = vsub.f32 %v1833_v56, %v576_v0 }
 0x13f   : > { %v598_v10 = vsub.f32 %v1838_v34, %v578_v8 }
 0x141   : > { %676 = vperm.xlu0 %1533, %v598_v10   ;;  %671 = vperm.xlu1 %1532, %v597_v9  }
 0x145   : > { %v572_v11 = vpop.permute.xlu0 %571 }
 0x146   : > { %v574_v12 = vpop.permute.xlu1 %573  ;;  %v595_v13 = vsub.f32 %v1851_v45, %v572_v11 }
 0x147   : > { %v596_v14 = vsub.f32 %v1856_v62, %v574_v12 }
 0x148   : > { %661 = vperm.xlu0 %1533, %v595_v13  }
 0x149   : > { %666 = vperm.xlu1 %1532, %v596_v14  }
 0x152   : > { %v636_v23 = vpop.permute.xlu0 %635 }
 0x153   : > { %v641_v19 = vpop.permute.xlu1 %640  ;;  %v655_v35 = vmul.f32 %v636_v23, %v1681_v1  ;;  %v656_v36 = vmul.f32 %v636_v23, %v1684_v2 }
 0x154   : > { %v657_v41 = vmul.f32 %v641_v19, %v1695_v6  ;;  %v658_v61 = vmul.f32 %v641_v19, %v1698_v7 }
 0x156   : > { %v616_v32 = vpop.permute.xlu0 %615 }
 0x157   : > { %v626_v20 = vpop.permute.xlu1 %625  ;;  %v647_v63 = vmul.f32 %v616_v32, %v1729_v25  ;;  %v648_v0 = vmul.f32 %v616_v32, %v1732_v26 }
 0x158   : > { %v651_v1 = vmul.f32 %v626_v20, %v1713_v15  ;;  %v652_v2 = vmul.f32 %v626_v20, %v1716_v16 }
 0x15b   : > { %v631_v21 = vpop.permute.xlu1 %630 }
 0x15c   : > { %v653_v6 = vmul.f32 %v631_v21, %v1687_v3  ;;  %v654_v7 = vmul.f32 %v631_v21, %v1692_v5 }
 0x15f   : > { %v621_v22 = vpop.permute.xlu1 %620 }
 0x160   : > { %v649_v8 = vmul.f32 %v621_v22, %v1735_v27  ;;  %v650_v15 = vmul.f32 %v621_v22, %v1738_v28 }
 0x163   : > { %v606_v52 = vpop.permute.xlu1 %605 }
 0x164   : > { %v643_v22 = vmul.f32 %v606_v52, %v1753_v37  ;;  %v644_v32 = vmul.f32 %v606_v52, %v1756_v38  ;;  %v1546_v38 = vld [vmem:[%s2197_s3] sm:$0xff]   ;;  %v1549_v52 = vld [vmem:[%s2197_s3 + $0x18] sm:$0xff]  }
 0x167   : > { %v611_v30 = vpop.permute.xlu1 %610 }
 0x1ac   : > { %v692_v33 = vpop.permute.xlu1 %691 }
 0x1ad   : > { %v711_v42 = vadd.f32 %v692_v33, %v655_v35  ;;  %v712_v43 = vadd.f32 %v692_v33, %v656_v36  ;;  %v645_v35 = vmul.f32 %v611_v30, %v1759_v39  ;;  %v646_v36 = vmul.f32 %v611_v30, %v1762_v40  ;;  %v1547_v39 = vld [vmem:[%s2197_s3 + $0x8] sm:$0xff]   ;;  %v1548_v40 = vld [vmem:[%s2197_s3 + $0x10] sm:$0xff]  }
 0x1af   : > { %v727_v29 = vmax.f32 %v711_v42, 0.0  ;;  %v728_v48 = vmax.f32 %v712_v43, 0.0 }
 0x1b0   : > { %v697_v44 = vpop.permute.xlu0 %696 }
 0x1b1   : > { %v713_v46 = vadd.f32 %v697_v44, %v657_v41  ;;  %v714_v47 = vadd.f32 %v697_v44, %v658_v61 }
 0x1b3   : > { %v729_v31 = vmax.f32 %v713_v46, 0.0  ;;  %v730_v51 = vmax.f32 %v714_v47, 0.0 }
 0x1b4   : > { %v682_v54 = vpop.permute.xlu0 %681 }
 0x1b5   : > { %v746_v55 = vpack.c.bf16 %v730_v51, %v728_v48  ;;  %v745_v57 = vpack.c.bf16 %v729_v31, %v727_v29  ;;  %v707_v49 = vadd.f32 %v682_v54, %v651_v1  ;;  %v708_v53 = vadd.f32 %v682_v54, %v652_v2 }
 0x1b7   : > { %788 = vmatprep.subr.bf16.mxu0 %v746_v55  ;;  %v723_v3 = vmax.f32 %v707_v49, 0.0  ;;  %v724_v10 = vmax.f32 %v708_v53, 0.0 }
 0x1b8   : > { %v687_v58 = vpop.permute.xlu1 %686  ;;  %789 = vmatpush1.bf16.msra.mxu0 %v745_v57 }
 0x1b9   : > { %v709_v59 = vadd.f32 %v687_v58, %v653_v6  ;;  %v710_v60 = vadd.f32 %v687_v58, %v654_v7 }
 0x1bb   : > { %v725_v16 = vmax.f32 %v709_v59, 0.0  ;;  %v726_v9 = vmax.f32 %v710_v60, 0.0 }
 0x1bc   : > { %v672_v5 = vpop.permute.xlu1 %671  ;;  %v677_v11 = vpop.permute.xlu0 %676 }
 0x1bd   : > { %v703_v12 = vadd.f32 %v672_v5, %v647_v63  ;;  %v704_v13 = vadd.f32 %v672_v5, %v648_v0  ;;  %v705_v14 = vadd.f32 %v677_v11, %v649_v8  ;;  %v706_v19 = vadd.f32 %v677_v11, %v650_v15 }
 0x1be   : > { %v744_v20 = vpack.c.bf16 %v726_v9, %v724_v10  ;;  %v743_v21 = vpack.c.bf16 %v725_v16, %v723_v3 }
 0x1bf   : > { %v719_v23 = vmax.f32 %v703_v12, 0.0  ;;  %v720_v25 = vmax.f32 %v704_v13, 0.0  ;;  %v721_v33 = vmax.f32 %v705_v14, 0.0  ;;  %v722_v26 = vmax.f32 %v706_v19, 0.0 }
 0x1c0   : > { %790 = vmatprep.subr.bf16.mxu0 %v744_v20 }
 0x1c1   : > { %791 = vmatpush1.bf16.msra.mxu0 %v743_v21  ;;  %v742_v27 = vpack.c.bf16 %v722_v26, %v720_v25  ;;  %v741_v28 = vpack.c.bf16 %v721_v33, %v719_v23 }
 0x1c3   : > { %792 = vmatprep.subr.bf16.mxu0 %v742_v27  ;;  %v662_v41 = vpop.permute.xlu0 %661 }
 0x1c4   : > { %v667_v61 = vpop.permute.xlu1 %666  ;;  %v699_v42 = vadd.f32 %v662_v41, %v643_v22  ;;  %v700_v43 = vadd.f32 %v662_v41, %v644_v32 }
 0x1c5   : > { %v701_v44 = vadd.f32 %v667_v61, %v645_v35  ;;  %v702_v46 = vadd.f32 %v667_v61, %v646_v36  ;;  %793 = vmatpush1.bf16.msra.mxu0 %v741_v28 }
 0x1c6   : > { %v715_v47 = vmax.f32 %v699_v42, 0.0  ;;  %v716_v29 = vmax.f32 %v700_v43, 0.0 }
 0x1c7   : > { %v717_v31 = vmax.f32 %v701_v44, 0.0  ;;  %v718_v48 = vmax.f32 %v702_v46, 0.0 }
 0x1c9   : > { %v740_v51 = vpack.c.bf16 %v718_v48, %v716_v29  ;;  %v739_v37 = vpack.c.bf16 %v717_v31, %v715_v47  ;;  %v1622_v48 = vmov 3  }
 0x1ca   : > { %1535 = vset.pattern.permute.xlu1 %v1622_v48  ;;  %1534 = vset.pattern.permute.xlu0 %v1622_v48 }
 0x1cb   : > { %794 = vmatprep.subr.bf16.mxu0 %v740_v51 }
 0x1cc   : > { %795 = vmatpush1.bf16.msra.mxu0 %v739_v37 }
 0x1cf   : > { %1482 = vmatmul.mubr.msk.bf16.vlgmr.msra.gmra.mxu0 %vm767_vm0, %v1546_v38 }
 0x1d0   : > { %822 = vmatprep.mubr.bf16.mxu0 %v1621_v18 }
 0x1d7   : > { %1483 = vmatmul.mubr.msk.bf16.gmra.mxu0 %vm767_vm0, %v1547_v39 }
 0x1d8   : > { %832 = vmatprep.mubr.bf16.mxu0 %v1621_v18 }
 0x1df   : > { %1484 = vmatmul.mubr.msk.bf16.gmra.mxu0 %vm767_vm0, %v1548_v40 }
 0x1e0   : > { %842 = vmatprep.mubr.bf16.mxu0 %v1621_v18 }
 0x1e7   : > { %1485 = vmatmul.mubr.msk.bf16.gmra.mxu0 %vm767_vm0, %v1549_v52 }
 0x28f   : > { %v1907_v30 = vpop.f32.mrf.mxu0 }
 0x290   : > { %v885_v46 = vmul.f32 %v1907_v30, %v1907_v30 }
 0x291   : > { %v1909_v54 = vpop.f32.mrf.mxu0 }
 0x292   : > { %v853_v61 = vadd.f32 %v1909_v54, %v1907_v30  ;;  %v886_v43 = vmul.f32 %v1909_v54, %v1909_v54 }
 0x293   : > { %v1911_v55 = vpop.f32.mrf.mxu0 }
 0x294   : > { %v887_v47 = vmul.f32 %v1911_v55, %v1911_v55  ;;  %v901_v29 = vadd.f32 %v886_v43, %v885_v46 }
 0x295   : > { %v1913_v57 = vpop.f32.mrf.mxu0 }
 0x296   : > { %v856_v42 = vadd.f32 %v1913_v57, %v1911_v55  ;;  %v888_v44 = vmul.f32 %v1913_v57, %v1913_v57 }
 0x297   : > { %v1915_v1 = vpop.f32.mrf.mxu0 }
 0x298   : > { %v889_v32 = vmul.f32 %v1915_v1, %v1915_v1  ;;  %v904_v31 = vadd.f32 %v888_v44, %v887_v47 }
 0x299   : > { %v1917_v2 = vpop.f32.mrf.mxu0 }
 0x29a   : > { %v859_v6 = vadd.f32 %v1917_v2, %v1915_v1  ;;  %v890_v28 = vmul.f32 %v1917_v2, %v1917_v2 }
 0x29b   : > { %v1921_v7 = vpop.f32.mrf.mxu0 }
 0x29c   : > { %860 = vadd.xlane.f32.xlu0 %v859_v6  ;;  %v891_v35 = vmul.f32 %v1921_v7, %v1921_v7  ;;  %v907_v36 = vadd.f32 %v890_v28, %v889_v32 }
 0x29d   : > { %v1923_v49 = vpop.f32.mrf.mxu0 }
 0x29e   : > { %v862_v27 = vadd.f32 %v1923_v49, %v1921_v7  ;;  %v892_v22 = vmul.f32 %v1923_v49, %v1923_v49 }
 0x29f   : > { %v1925_v53 = vpop.f32.mrf.mxu0 }
 0x2a0   : > { %v893_v0 = vmul.f32 %v1925_v53, %v1925_v53  ;;  %v910_v41 = vadd.f32 %v892_v22, %v891_v35 }
 0x2a1   : > { %v1927_v58 = vpop.f32.mrf.mxu0 }
 0x2a2   : > { %v865_v59 = vadd.f32 %v1927_v58, %v1925_v53  ;;  %v894_v60 = vmul.f32 %v1927_v58, %v1927_v58 }
 0x2a3   : > { %v1933_v63 = vpop.f32.mrf.mxu0 }
 0x2a4   : > { %866 = vadd.xlane.f32.xlu0 %v865_v59  ;;  %v913_v15 = vadd.f32 %v894_v60, %v893_v0  ;;  %v895_v10 = vmul.f32 %v1933_v63, %v1933_v63 }
 0x2a5   : > { %v1937_v8 = vpop.f32.mrf.mxu0 }
 0x2a6   : > { %v868_v16 = vadd.f32 %v1937_v8, %v1933_v63  ;;  %v896_v9 = vmul.f32 %v1937_v8, %v1937_v8 }
 0x2a7   : > { %v1943_v3 = vpop.f32.mrf.mxu0 }
 0x2a8   : > { %914 = vadd.xlane.f32.xlu0 %v913_v15  ;;  %869 = vadd.xlane.f32.xlu1 %v868_v16  ;;  %v916_v11 = vadd.f32 %v896_v9, %v895_v10  ;;  %v897_v19 = vmul.f32 %v1943_v3, %v1943_v3 }
 0x2a9   : > { %v1947_v5 = vpop.f32.mrf.mxu0 }
 0x2aa   : > { %v871_v12 = vadd.f32 %v1947_v5, %v1943_v3  ;;  %v898_v13 = vmul.f32 %v1947_v5, %v1947_v5 }
 0x2ab   : > { %v1953_v14 = vpop.f32.mrf.mxu0 }
 0x2ac   : > { %917 = vadd.xlane.f32.xlu1 %v916_v11  ;;  %872 = vadd.xlane.f32.xlu0 %v871_v12  ;;  %v919_v23 = vadd.f32 %v898_v13, %v897_v19  ;;  %v899_v33 = vmul.f32 %v1953_v14, %v1953_v14 }
 0x2ad   : > { %v1957_v20 = vpop.f32.mrf.mxu0 }
 0x2ae   : > { %v900_v21 = vmul.f32 %v1957_v20, %v1957_v20  ;;  %v874_v25 = vadd.f32 %v1957_v20, %v1953_v14 }
 0x2b0   : > { %920 = vadd.xlane.f32.xlu0 %v919_v23  ;;  %875 = vadd.xlane.f32.xlu1 %v874_v25  ;;  %v922_v26 = vadd.f32 %v900_v21, %v899_v33 }
 0x2b4   : > { %923 = vadd.xlane.f32.xlu0 %v922_v26  ;;  %863 = vadd.xlane.f32.xlu1 %v862_v27 }
 0x2b8   : > { %908 = vadd.xlane.f32.xlu0 %v907_v36  ;;  %911 = vadd.xlane.f32.xlu1 %v910_v41 }
 0x2bc   : > { %854 = vadd.xlane.f32.xlu0 %v853_v61  ;;  %857 = vadd.xlane.f32.xlu1 %v856_v42 }
 0x2c0   : > { %902 = vadd.xlane.f32.xlu0 %v901_v29  ;;  %905 = vadd.xlane.f32.xlu1 %v904_v31 }
 0x325   : > { %v861_v51 = vpop.xlane.xlu0 %860 }
 0x326   : > { %v2001_v27 = vmul.f32 0.00390625, %v861_v51 }
 0x328   : > { %v935_v44 = vmul.f32 %v2001_v27, %v2001_v27 }
 0x32d   : > { %v867_v37 = vpop.xlane.xlu0 %866 }
 0x32e   : > { %v1989_v38 = vmul.f32 0.00390625, %v867_v37 }
 0x330   : > { %v937_v52 = vmul.f32 %v1989_v38, %v1989_v38 }
 0x331   : > { %v915_v39 = vpop.xlane.xlu0 %914  ;;  %v870_v40 = vpop.xlane.xlu1 %869 }
 0x332   : > { %v929_v6 = vmul.f32 0.00390625, %v915_v39  ;;  %v1993_v59 = vmul.f32 0.00390625, %v870_v40 }
 0x334   : > { %v945_v60 = vsub.f32 %v929_v6, %v937_v52  ;;  %v938_v11 = vmul.f32 %v1993_v59, %v1993_v59 }
 0x335   : > { %v918_v0 = vpop.xlane.xlu1 %917  ;;  %v873_v15 = vpop.xlane.xlu0 %872 }
 0x336   : > { %v953_v16 = vmax.f32 %v945_v60, 0.0  ;;  %v930_v9 = vmul.f32 0.00390625, %v918_v0  ;;  %v1995_v10 = vmul.f32 0.00390625, %v873_v15 }
 0x338   : > { %v961_v12 = vadd.f32 0.001, %v953_v16  ;;  %v946_v13 = vsub.f32 %v930_v9, %v938_v11  ;;  %v939_v23 = vmul.f32 %v1995_v10, %v1995_v10 }
 0x339   : > { %v921_v19 = vpop.xlane.xlu0 %920  ;;  %v876_v21 = vpop.xlane.xlu1 %875 }
 0x33a   : > { %1570 = vrsqrt.f32 %v961_v12  ;;  %v931_v25 = vmul.f32 0.00390625, %v921_v19  ;;  %v884_v33 = vmul.f32 0.00390625, %v876_v21  ;;  %v954_v28 = vmax.f32 %v946_v13, 0.0 }
 0x33c   : > { %v947_v26 = vsub.f32 %v931_v25, %v939_v23  ;;  %v940_v36 = vmul.f32 %v884_v33, %v884_v33  ;;  %v962_v46 = vadd.f32 0.001, %v954_v28 }
 0x33d   : > { %v924_v22 = vpop.xlane.xlu0 %923  ;;  %v864_v32 = vpop.xlane.xlu1 %863 }
 0x33e   : > { %v955_v35 = vmax.f32 %v947_v26, 0.0  ;;  %v932_v41 = vmul.f32 0.00390625, %v924_v22  ;;  %v2003_v61 = vmul.f32 0.00390625, %v864_v32 }
 0x340   : > { %v963_v42 = vadd.f32 0.001, %v955_v35  ;;  %v948_v43 = vsub.f32 %v932_v41, %v940_v36  ;;  %v936_v47 = vmul.f32 %v2003_v61, %v2003_v61 }
 0x341   : > { %v909_v29 = vpop.xlane.xlu0 %908  ;;  %v912_v31 = vpop.xlane.xlu1 %911 }
 0x342   : > { %1572 = vrsqrt.f32 %v963_v42  ;;  %v956_v51 = vmax.f32 %v948_v43, 0.0  ;;  %v927_v37 = vmul.f32 0.00390625, %v909_v29  ;;  %v928_v39 = vmul.f32 0.00390625, %v912_v31 }
 0x343   : > { %1574 = vrsqrt.f32 %v962_v46 }
 0x344   : > { %v964_v40 = vadd.f32 0.001, %v956_v51  ;;  %v943_v52 = vsub.f32 %v927_v37, %v935_v44  ;;  %v944_v6 = vsub.f32 %v928_v39, %v936_v47 }
 0x345   : > { %v855_v60 = vpop.xlane.xlu0 %854  ;;  %v858_v0 = vpop.xlane.xlu1 %857 }
 0x346   : > { %1576 = vrsqrt.f32 %v964_v40  ;;  %v951_v15 = vmax.f32 %v943_v52, 0.0  ;;  %v952_v16 = vmax.f32 %v944_v6, 0.0  ;;  %v877_v9 = vmul.f32 0.00390625, %v855_v60 }
 0x347   : > { %v1571_v11 = vpop.eup %1570  ;;  %v878_v12 = vmul.f32 0.00390625, %v858_v0 }
 0x348   : > { %v959_v13 = vadd.f32 0.001, %v951_v15  ;;  %v960_v19 = vadd.f32 0.001, %v952_v16  ;;  %v977_v21 = vmul.f32 %v1571_v11, %v1817_v17  ;;  %v933_v23 = vmul.f32 %v877_v9, %v877_v9 }
 0x349   : > { %v934_v25 = vmul.f32 %v878_v12, %v878_v12  ;;  %v903_v26 = vpop.xlane.xlu0 %902  ;;  %v906_v28 = vpop.xlane.xlu1 %905 }
 0x34a   : > { %1578 = vrsqrt.f32 %v959_v13  ;;  %v925_v22 = vmul.f32 0.00390625, %v903_v26  ;;  %v926_v32 = vmul.f32 0.00390625, %v906_v28  ;;  %v985_v35 = vmul.f32 %v977_v21, %v1989_v38 }
 0x34b   : > { %1580 = vrsqrt.f32 %v960_v19 }
 0x34c   : > { %v941_v36 = vsub.f32 %v925_v22, %v933_v23  ;;  %v942_v41 = vsub.f32 %v926_v32, %v934_v25  ;;  %1005 = vrot.lane.b32.xlu1 %v985_v35, %s1619_s8 }
 0x34e   : > { %v949_v42 = vmax.f32 %v941_v36, 0.0  ;;  %v950_v43 = vmax.f32 %v942_v41, 0.0 }
 0x34f   : > { %v1573_v44 = vpop.eup %1572 }
 0x350   : > { %v957_v46 = vadd.f32 0.001, %v949_v42  ;;  %v958_v47 = vadd.f32 0.001, %v950_v43  ;;  %v979_v29 = vmul.f32 %v1573_v44, %v1803_v50  ;;  %v1575_v31 = vpop.eup %1574 }
 0x351   : > { %v978_v40 = vmul.f32 %v1575_v31, %v1824_v24 }
 0x352   : > { %1582 = vrsqrt.f32 %v957_v46  ;;  %v987_v51 = vmul.f32 %v979_v29, %v1995_v10 }
 0x353   : > { %v1577_v37 = vpop.eup %1576  ;;  %1584 = vrsqrt.f32 %v958_v47  ;;  %v986_v15 = vmul.f32 %v978_v40, %v1993_v59  ;;  %v1623_v59 = vmov 4   ;;  %v1624_v47 = vmov 5  }
 0x354   : > { %1009 = vrot.lane.b32.xlu0 %v987_v51, %s1619_s8  ;;  %v980_v38 = vmul.f32 %v1577_v37, %v1809_v4 }
 0x356   : > { %v988_v39 = vmul.f32 %v980_v38, %v884_v33 }
 0x357   : > { %v1579_v52 = vpop.eup %1578 }
 0x358   : > { %v1581_v6 = vpop.eup %1580  ;;  %1011 = vrot.lane.b32.xlu1 %v988_v39, %s1619_s8  ;;  %v975_v60 = vmul.f32 %v1579_v52, %v1833_v56 }
 0x359   : > { %v976_v10 = vmul.f32 %v1581_v6, %v1838_v34 }
 0x35a   : > { %v983_v0 = vmul.f32 %v975_v60, %v2001_v27 }
 0x35b   : > { %v984_v33 = vmul.f32 %v976_v10, %v2003_v61 }
 0x35c   : > { %1001 = vrot.lane.b32.xlu0 %v983_v0, %s1619_s8  ;;  %1007 = vrot.lane.b32.xlu1 %v986_v15, %s1619_s8 }
 0x35f   : > { %v1583_v16 = vpop.eup %1582 }
 0x360   : > { %v1585_v11 = vpop.eup %1584  ;;  %1003 = vrot.lane.b32.xlu1 %v984_v33, %s1619_s8  ;;  %v973_v13 = vmul.f32 %v1583_v16, %v1851_v45 }
 0x361   : > { %v974_v19 = vmul.f32 %v1585_v11, %v1856_v62 }
 0x362   : > { %v981_v23 = vmul.f32 %v973_v13, %v877_v9 }
 0x363   : > { %v982_v27 = vmul.f32 %v974_v19, %v878_v12 }
 0x364   : > { %997 = vrot.lane.b32.xlu0 %v981_v23, %s1619_s8 }
 0x365   : > { %999 = vrot.lane.b32.xlu1 %v982_v27, %s1619_s8 }
 0x368   : > { %1061 = vperm.xlu0 %1534, %v979_v29  }
 0x369   : > { %1066 = vperm.xlu1 %1535, %v980_v38  }
 0x36c   : > { %1041 = vperm.xlu0 %1534, %v975_v60  }
 0x36d   : > { %1051 = vperm.xlu1 %1535, %v977_v21  }
 0x370   : > { %1537 = vset.pattern.permute.xlu0 %v1623_v59 }
 0x371   : > { %1056 = vperm.xlu1 %1535, %v978_v40  }
 0x375   : > { %1536 = vset.pattern.permute.xlu1 %v1623_v59 }
 0x3be   : > { %v1006_v61 = vpop.permute.xlu1 %1005 }
 0x3bf   : > { %v1025_v12 = vsub.f32 %v1817_v17, %v1006_v61 }
 0x3c6   : > { %v1010_v28 = vpop.permute.xlu0 %1009 }
 0x3c7   : > { %v1027_v21 = vsub.f32 %v1803_v50, %v1010_v28 }
 0x3ca   : > { %v1012_v25 = vpop.permute.xlu1 %1011 }
 0x3cb   : > { %v1028_v26 = vsub.f32 %v1809_v4, %v1012_v25 }
 0x3cd   : > { %1122 = vperm.xlu0 %1537, %v1028_v26  }
 0x3ce   : > { %v1008_v9 = vpop.permute.xlu1 %1007  ;;  %v1002_v32 = vpop.permute.xlu0 %1001 }
 0x3cf   : > { %v1026_v22 = vsub.f32 %v1824_v24, %v1008_v9  ;;  %v1023_v43 = vsub.f32 %v1833_v56, %v1002_v32 }
 0x3d1   : > { %1107 = vperm.xlu0 %1537, %v1025_v12   ;;  %1112 = vperm.xlu1 %1536, %v1026_v22  }
 0x3d2   : > { %v1004_v35 = vpop.permute.xlu1 %1003 }
 0x3d3   : > { %v1024_v36 = vsub.f32 %v1838_v34, %v1004_v35 }
 0x3d5   : > { %1117 = vperm.xlu1 %1536, %v1027_v21   ;;  %1102 = vperm.xlu0 %1537, %v1024_v36  }
 0x3d6   : > { %v998_v41 = vpop.permute.xlu0 %997 }
 0x3d7   : > { %v1021_v42 = vsub.f32 %v1851_v45, %v998_v41  ;;  %v1000_v44 = vpop.permute.xlu1 %999 }
 0x3d8   : > { %v1022_v46 = vsub.f32 %v1856_v62, %v1000_v44 }
 0x3d9   : > { %1538 = vset.pattern.permute.xlu1 %v1622_v48  ;;  %1087 = vperm.xlu0 %1537, %v1021_v42  }
 0x3da   : > { %1046 = vperm.xlu1 %1538, %v976_v10  }
 0x3dd   : > { %1542 = vset.pattern.permute.xlu0 %v1621_v18 }
 0x3de   : > { %1539 = vset.pattern.permute.xlu1 %v1623_v59  ;;  %292 = vperm.xlu0 %1542, %v1851_v45  }
 0x3df   : > { %1097 = vperm.xlu1 %1539, %v1023_v43  }
 0x3e2   : > { %307 = vperm.xlu0 %1542, %v1838_v34  }
 0x3e3   : > { %1540 = vset.pattern.permute.xlu1 %v1622_v48  ;;  %v372_v48 = vld [vmem:[#allocation2] sm:$0x1]  ;;  %v1062_v31 = vpop.permute.xlu0 %1061 }
 0x3e4   : > { %1031 = vperm.xlu1 %1540, %v973_v13   ;;  %v1067_v29 = vpop.permute.xlu1 %1066  ;;  %v1082_v52 = vmul.f32 %v1062_v31, %v1947_v5 }
 0x3e6   : > { %317 = vperm.xlu0 %1542, %v1824_v24  }
 0x3e7   : > { %v1042_v37 = vpop.permute.xlu0 %1041 }
 0x3e8   : > { %1036 = vperm.xlu1 %1540, %v974_v19   ;;  %v1052_v51 = vpop.permute.xlu1 %1051  ;;  %v1073_v28 = vmul.f32 %v1042_v37, %v1915_v1  ;;  %v1074_v9 = vmul.f32 %v1042_v37, %v1917_v2 }
 0x3e9   : > { %v1077_v0 = vmul.f32 %v1052_v51, %v1925_v53 }
 0x3ea   : > { %327 = vperm.xlu0 %1542, %v1809_v4  }
 0x3ec   : > { %1541 = vset.pattern.permute.xlu1 %v1623_v59  ;;  %v1057_v38 = vpop.permute.xlu1 %1056 }
 0x3ed   : > { %1092 = vperm.xlu1 %1541, %v1022_v46  }
 0x3ee   : > { %1544 = vset.pattern.permute.xlu0 %v1624_v47 }
 0x3ef   : > { %1174 = vperm.xlu0 %1544, %v1851_v45  }
 0x3f1   : > { %1543 = vset.pattern.permute.xlu1 %v1621_v18 }
 0x3f2   : > { %297 = vperm.xlu1 %1543, %v1856_v62  }
 0x3f3   : > { %1186 = vperm.xlu0 %1544, %v1838_v34  }
 0x3f6   : > { %302 = vperm.xlu1 %1543, %v1833_v56  }
 0x3f7   : > { %1194 = vperm.xlu0 %1544, %v1824_v24   ;;  %v1078_v24 = vmul.f32 %v1052_v51, %v1927_v58 }
 0x3fa   : > { %312 = vperm.xlu1 %1543, %v1817_v17  }
 0x3fb   : > { %1202 = vperm.xlu0 %1544, %v1809_v4  }
 0x3fe   : > { %322 = vperm.xlu1 %1543, %v1803_v50  }
 0x402   : > { %375 = vperm.xlu1 %1543, %v372_v48  }
 0x406   : > { %1545 = vset.pattern.permute.xlu1 %v1624_v47 }
 0x407   : > { %1178 = vperm.xlu1 %1545, %v1856_v62   ;;  %v1083_v62 = vmul.f32 %v1067_v29, %v1953_v14  ;;  %v1079_v14 = vmul.f32 %v1057_v38, %v1933_v63 }
 0x40b   : > { %1182 = vperm.xlu1 %1545, %v1833_v56   ;;  %v1084_v56 = vmul.f32 %v1067_v29, %v1957_v20 }
 0x40f   : > { %1190 = vperm.xlu1 %1545, %v1817_v17   ;;  %v1080_v17 = vmul.f32 %v1057_v38, %v1937_v8 }
 0x413   : > { %1198 = vperm.xlu1 %1545, %v1803_v50   ;;  %v1081_v50 = vmul.f32 %v1062_v31, %v1943_v3 }
 0x448   : > { %v1123_v45 = vpop.permute.xlu0 %1122 }
 0x449   : > { %v1139_v40 = vadd.f32 %v1123_v45, %v1083_v62  ;;  %v1140_v4 = vadd.f32 %v1123_v45, %v1084_v56 }
 0x44b   : > { %v1155_v33 = vmax.f32 %v1139_v40, 0.0  ;;  %v1156_v11 = vmax.f32 %v1140_v4, 0.0  ;;  %v2079_v4 = vld [vmem:[%s1678_s27 + $0x8] sm:$0xff] }
 0x44c   : > { %v1108_v39 = vpop.permute.xlu0 %1107  ;;  %v1113_v34 = vpop.permute.xlu1 %1112 }
 0x44d   : > { %v1134_v6 = vadd.f32 %v1108_v39, %v1078_v24  ;;  %v1136_v60 = vadd.f32 %v1113_v34, %v1080_v17  ;;  %v1133_v16 = vadd.f32 %v1108_v39, %v1077_v0  ;;  %v1135_v58 = vadd.f32 %v1113_v34, %v1079_v14  ;;  %v2087_v0 = vld [vmem:[%s1678_s27 + $0x18] sm:$0xff] }
 0x44f   : > { %v1150_v8 = vmax.f32 %v1134_v6, 0.0  ;;  %v1152_v13 = vmax.f32 %v1136_v60, 0.0  ;;  %v1149_v59 = vmax.f32 %v1133_v16, 0.0  ;;  %v1151_v61 = vmax.f32 %v1135_v58, 0.0  ;;  %v2083_v6 = vld [vmem:[%s1678_s27 + $0x10] sm:$0xff]  ;;  %v2094_v58 = vld [vmem:[%s1678_s27 + $0x20] sm:$0xff] }
 0x450   : > { %v1118_v15 = vpop.permute.xlu1 %1117  ;;  %v1103_v26 = vpop.permute.xlu0 %1102 }
 0x451   : > { %v1137_v20 = vadd.f32 %v1118_v15, %v1081_v50  ;;  %v1138_v10 = vadd.f32 %v1118_v15, %v1082_v52  ;;  %v1170_v25 = vpack.c.bf16 %v1152_v13, %v1150_v8  ;;  %v1169_v35 = vpack.c.bf16 %v1151_v61, %v1149_v59  ;;  %v1550_v15 = vld [vmem:[%s2198_s4] sm:$0xff]   ;;  %v2098_v8 = vld [vmem:[%s1678_s27 + $0x28] sm:$0xff] }
 0x453   : > { %v1153_v19 = vmax.f32 %v1137_v20, 0.0  ;;  %v1154_v23 = vmax.f32 %v1138_v10, 0.0 }
 0x454   : > { %v1088_v48 = vpop.permute.xlu0 %1087 }
 0x455   : > { %v1047_v3 = vpop.permute.xlu1 %1046  ;;  %v1172_v27 = vpack.c.bf16 %v1156_v11, %v1154_v23  ;;  %v1171_v5 = vpack.c.bf16 %v1155_v33, %v1153_v19  ;;  %v2102_v19 = vld [vmem:[%s1678_s27 + $0x30] sm:$0xff] }
 0x456   : > { %v1075_v53 = vmul.f32 %v1047_v3, %v1921_v7  ;;  %v1076_v63 = vmul.f32 %v1047_v3, %v1923_v49  ;;  %v2106_v3 = vld [vmem:[%s1678_s27 + $0x38] sm:$0xff] }
 0x457   : > { %1245 = vmatprep.subr.bf16.mxu1 %v1172_v27 }
 0x458   : > { %1246 = vmatpush1.bf16.msra.mxu1 %v1171_v5  ;;  %v1131_v12 = vadd.f32 %v1103_v26, %v1075_v53  ;;  %v1132_v22 = vadd.f32 %v1103_v26, %v1076_v63  ;;  %v2112_v53 = vld [vmem:[%s1678_s27 + $0x50] sm:$0xff] }
 0x459   : > { %1247 = vmatprep.subr.bf16.mxu1 %v1170_v25  ;;  %v293_v29 = vpop.permute.xlu0 %292  ;;  %v2116_v25 = vld [vmem:[%s1678_s27 + $0x58] sm:$0xff] }
 0x45a   : > { %v1098_v32 = vpop.permute.xlu1 %1097  ;;  %v1147_v41 = vmax.f32 %v1131_v12, 0.0  ;;  %v1148_v7 = vmax.f32 %v1132_v22, 0.0  ;;  %v2120_v12 = vld [vmem:[%s1678_s27 + $0x40] sm:$0xff] }
 0x45b   : > { %v1129_v21 = vadd.f32 %v1098_v32, %v1073_v28  ;;  %v1130_v36 = vadd.f32 %v1098_v32, %v1074_v9  ;;  %v2124_v32 = vld [vmem:[%s1678_s27 + $0x48] sm:$0xff] }
 0x45c   : > { %1248 = vmatpush1.bf16.msra.mxu1 %v1169_v35 }
 0x45d   : > { %v1145_v42 = vmax.f32 %v1129_v21, 0.0  ;;  %v1146_v49 = vmax.f32 %v1130_v36, 0.0  ;;  %v308_v39 = vpop.permute.xlu0 %307  ;;  %v1551_v36 = vld [vmem:[%s2198_s4 + $0x8] sm:$0xff]  }
 0x45e   : > { %v336_v23 = vmul.f32 %v2102_v19, %v308_v39  ;;  %v337_v27 = vmul.f32 %v2106_v3, %v308_v39 }
 0x45f   : > { %v1032_v43 = vpop.permute.xlu1 %1031  ;;  %v1168_v44 = vpack.c.bf16 %v1148_v7, %v1146_v49  ;;  %v1167_v46 = vpack.c.bf16 %v1147_v41, %v1145_v42  ;;  %v2131_v49 = vld [vmem:[%s1678_s27 + $0x70] sm:$0xff] }
 0x460   : > { %v1069_v1 = vmul.f32 %v1032_v43, %v1907_v30  ;;  %v1070_v2 = vmul.f32 %v1032_v43, %v1909_v54  ;;  %v2075_v54 = vld [vmem:[%s1678_s27] sm:$0xff] }
 0x461   : > { %1249 = vmatprep.subr.bf16.mxu1 %v1168_v44  ;;  %v330_v40 = vmul.f32 %v2075_v54, %v293_v29  ;;  %v318_v33 = vpop.permute.xlu0 %317  ;;  %v2135_v44 = vld [vmem:[%s1678_s27 + $0x78] sm:$0xff] }
 0x462   : > { %1250 = vmatpush1.bf16.msra.mxu1 %v1167_v46  ;;  %v1125_v31 = vadd.f32 %v1088_v48, %v1069_v1  ;;  %v1126_v51 = vadd.f32 %v1088_v48, %v1070_v2  ;;  %v340_v63 = vmul.f32 %v2112_v53, %v318_v33  ;;  %v341_v26 = vmul.f32 %v2116_v25, %v318_v33  ;;  %v2139_v2 = vld [vmem:[%s1678_s27 + $0x60] sm:$0xff] }
 0x463   : > { %v1037_v47 = vpop.permute.xlu1 %1036 }
 0x464   : > { %v1071_v37 = vmul.f32 %v1037_v47, %v1911_v55  ;;  %v1072_v38 = vmul.f32 %v1037_v47, %v1913_v57  ;;  %v1141_v34 = vmax.f32 %v1125_v31, 0.0  ;;  %v1142_v30 = vmax.f32 %v1126_v51, 0.0 }
 0x465   : > { %v331_v55 = vmul.f32 %v2079_v4, %v293_v29  ;;  %v328_v21 = vpop.permute.xlu0 %327  ;;  %v2143_v29 = vld [vmem:[%s1678_s27 + $0x68] sm:$0xff] }
 0x466   : > { %v344_v43 = vmul.f32 %v2131_v49, %v328_v21  ;;  %v345_v46 = vmul.f32 %v2135_v44, %v328_v21 }
 0x468   : > { %v1093_v45 = vpop.permute.xlu1 %1092 }
 0x469   : > { %v1127_v62 = vadd.f32 %v1093_v45, %v1071_v37  ;;  %v1128_v56 = vadd.f32 %v1093_v45, %v1072_v38  ;;  %v378_v38 = vlaneseq }
 0x46b   : > { %v1143_v24 = vmax.f32 %v1127_v62, 0.0  ;;  %v1144_v17 = vmax.f32 %v1128_v56, 0.0  ;;  %v1552_v56 = vld [vmem:[%s2198_s4 + $0x10] sm:$0xff]   ;;  %vm424_vm3 = vcmp.lt.s32.totalorder %v378_v38, 256 }
 0x46d   : > { %v1166_v57 = vpack.c.bf16 %v1144_v17, %v1142_v30  ;;  %v1165_v50 = vpack.c.bf16 %v1143_v24, %v1141_v34  ;;  %v298_v52 = vpop.permute.xlu1 %297  ;;  %v379_v30 = vshrl.u32 %v378_v38, 7 }
 0x46e   : > { %v332_v60 = vmul.f32 %v2083_v6, %v298_v52  ;;  %v333_v14 = vmul.f32 %v2087_v0, %v298_v52 }
 0x46f   : > { %1251 = vmatprep.subr.bf16.mxu1 %v1166_v57  ;;  %v380_v57 = vsub.s32 0, %v379_v30 }
 0x470   : > { %1252 = vmatpush1.bf16.msra.mxu1 %v1165_v50  ;;  %v346_v20 = vadd.f32 %v332_v60, %v330_v40  ;;  %v359_v10 = vadd.f32 %v333_v14, %v331_v55  ;;  %v1553_v14 = vld [vmem:[%s2198_s4 + $0x18] sm:$0xff]  }
 0x471   : > { %v303_v16 = vpop.permute.xlu1 %302 }
 0x472   : > { %v334_v11 = vmul.f32 %v2094_v58, %v303_v16  ;;  %v335_v13 = vmul.f32 %v2098_v8, %v303_v16 }
 0x473   : > { %1490 = vmatmul.mubr.msk.bf16.vlgmr.msra.gmra.mxu1 %vm767_vm0, %v1550_v15 }
 0x474   : > { %1279 = vmatprep.mubr.bf16.mxu1 %v1621_v18  ;;  %v347_v5 = vadd.f32 %v346_v20, %v334_v11  ;;  %v360_v59 = vadd.f32 %v359_v10, %v335_v13 }
 0x475   : > { %v313_v61 = vpop.permute.xlu1 %312 }
 0x476   : > { %v348_v28 = vadd.f32 %v347_v5, %v336_v23  ;;  %v361_v9 = vadd.f32 %v360_v59, %v337_v27  ;;  %v338_v22 = vmul.f32 %v2120_v12, %v313_v61  ;;  %v339_v35 = vmul.f32 %v2124_v32, %v313_v61 }
 0x478   : > { %v349_v41 = vadd.f32 %v348_v28, %v338_v22  ;;  %v362_v7 = vadd.f32 %v361_v9, %v339_v35  ;;  %v1625_v22 = vmov 1966171168  }
 0x479   : > { %v323_v42 = vpop.permute.xlu1 %322  ;;  %v408_v35 = vunpack.c.l.s4 %v1625_v22 }
 0x47a   : > { %v350_v48 = vadd.f32 %v349_v41, %v340_v63  ;;  %v363_v1 = vadd.f32 %v362_v7, %v341_v26  ;;  %v342_v47 = vmul.f32 %v2139_v2, %v323_v42  ;;  %v343_v31 = vmul.f32 %v2143_v29, %v323_v42 }
 0x47b   : > { %1491 = vmatmul.mubr.msk.bf16.gmra.mxu1 %vm767_vm0, %v1551_v36  ;;  %v409_v21 = vunpack.c.0.s8 %v408_v35 }
 0x47c   : > { %1289 = vmatprep.mubr.bf16.mxu1 %v1621_v18  ;;  %v351_v51 = vadd.f32 %v350_v48, %v342_v47  ;;  %v364_v37 = vadd.f32 %v363_v1, %v343_v31 }
 0x47d   : > { %v376_v50 = vpop.permute.xlu1 %375 }
 0x47e   : > { %v352_v45 = vadd.f32 %v351_v51, %v344_v43  ;;  %v365_v62 = vadd.f32 %v364_v37, %v345_v46  ;;  %v381_v10 = vrot.slane %v376_v50, %v380_v57  ;;  %v412_v43 = vsub.s32 %v409_v21, %v379_v30  ;;  %v1175_v51 = vpop.permute.xlu0 %1174 }
 0x480   : > { %v353_v39 = vrot.slane %v352_v45, 4  ;;  %v366_v34 = vrot.slane %v365_v62, 4 }
 0x482   : > { %v354_v24 = vadd.f32 %v353_v39, %v352_v45  ;;  %v367_v17 = vadd.f32 %v366_v34, %v365_v62  ;;  %v1179_v45 = vpop.permute.xlu1 %1178 }
 0x483   : > { %1492 = vmatmul.mubr.msk.bf16.gmra.mxu1 %vm767_vm0, %v1552_v56 }
 0x484   : > { %1299 = vmatprep.mubr.bf16.mxu1 %v1621_v18  ;;  %v355_v40 = vrot.slane %v354_v24, 2  ;;  %v368_v55 = vrot.slane %v367_v17, 2 }
 0x486   : > { %v356_v52 = vadd.f32 %v355_v40, %v354_v24  ;;  %v369_v60 = vadd.f32 %v368_v55, %v367_v17  ;;  %v1183_v40 = vpop.permute.xlu1 %1182 }
 0x488   : > { %v357_v15 = vrot.slane %v356_v52, 1  ;;  %v370_v20 = vrot.slane %v369_v60, 1 }
 0x48a   : > { %v358_v33 = vadd.f32 %v357_v15, %v356_v52  ;;  %v371_v16 = vadd.f32 %v370_v20, %v369_v60  ;;  %v1187_v20 = vpop.permute.xlu0 %1186 }
 0x48b   : > { %1493 = vmatmul.mubr.msk.bf16.gmra.mxu1 %vm767_vm0, %v1553_v14 }
 0x48c   : > { %v382_v11 = vadd.f32 %v381_v10, %v358_v33  ;;  %v383_v13 = vadd.f32 %v381_v10, %v371_v16 }
 0x48e   : > { %v384_v18 = vand.u32 2147483647, %v382_v11  ;;  %v385_v23 = vand.u32 2147483647, %v383_v13  ;;  %vm392_vm1 = vcmp.ge.f32.partialorder %v382_v11, 0.0  ;;  %vm393_vm2 = vcmp.ge.f32.partialorder %v383_v13, 0.0 }
 0x490   : > { %v386_v27 = vsub.f32 0.0, %v384_v18  ;;  %v387_v5 = vsub.f32 0.0, %v385_v23 }
 0x492   : > { %v388_v59 = vmul.f32 1.442695, %v386_v27  ;;  %v390_v61 = vmul.f32 1.442695, %v387_v5 }
 0x494   : > { %1586 = vpow2.f32 %v388_v59 }
 0x495   : > { %1588 = vpow2.f32 %v390_v61 }
 0x4a1   : > { %v1587_v63 = vpop.eup %1586 }
 0x4a2   : > { %v1589_v26 = vpop.eup %1588  ;;  %v394_v28 = vadd.f32 1.0, %v1587_v63 }
 0x4a3   : > { %v395_v9 = vadd.f32 1.0, %v1589_v26 }
 0x4a4   : > { %1590 = vrcp.f32 %v394_v28 }
 0x4a5   : > { %1592 = vrcp.f32 %v395_v9 }
 0x4b1   : > { %v1591_v36 = vpop.eup %1590 }
 0x4b2   : > { %v1593_v41 = vpop.eup %1592  ;;  %v400_v7 = vmul.f32 %v1591_v36, %v1587_v63 }
 0x4b3   : > { %v401_v42 = vmul.f32 %v1593_v41, %v1589_v26 }
 0x4b4   : > { %v402_v46 = vsel %vm392_vm1, %v1591_v36, %v400_v7 }
 0x4b5   : > { %v403_v48 = vsel %vm393_vm2, %v1593_v41, %v401_v42 }
 0x4b6   : > { %v406_v1 = vcombine.low %v402_v46, %v403_v48 }
 0x4b8   : > { %v413_v47 = vrot.slane %v406_v1, %v412_v43 }
 0x4ba   : > { %v420_v31 = vrot.slane %v413_v47, %v412_v43 }
 0x4bc   : > { %426 = vst.msk [vmem:[%s259_s17] sm:$0x3] %vm424_vm3, %v420_v31 }
 0x533   : > { %v1271_v37 = vpop.f32.mrf.mxu1 }
 0x534   : > { %v1272_v62 = vadd.f32 %v1271_v37, %v1175_v51 }
 0x535   : > { %v1273_v56 = vpop.f32.mrf.mxu1 }
 0x536   : > { %v1274_v39 = vadd.f32 %v1273_v56, %v1175_v51  ;;  %v1310_v30 = vadd.f32 %v2075_v54, %v1272_v62 }
 0x537   : > { %v1275_v34 = vpop.f32.mrf.mxu1 }
 0x538   : > { %v1311_v24 = vadd.f32 %v2079_v4, %v1274_v39  ;;  %v1276_v17 = vadd.f32 %v1275_v34, %v1179_v45 }
 0x539   : > { %v1277_v38 = vpop.f32.mrf.mxu1 }
 0x53a   : > { %v1506_v55 = vpack.c.bf16 %v1311_v24, %v1310_v30  ;;  %v1278_v57 = vadd.f32 %v1277_v38, %v1179_v45  ;;  %v1312_v52 = vadd.f32 %v2083_v6, %v1276_v17  ;;  %v1191_v6 = vpop.permute.xlu1 %1190 }
 0x53b   : > { %v1281_v50 = vpop.f32.mrf.mxu1 }
 0x53c   : > { %1374 = vst [vmem:[%s2167_s21] sm:$0xff] %v1506_v55  ;;  %v1313_v54 = vadd.f32 %v2087_v0, %v1278_v57  ;;  %v1282_v4 = vadd.f32 %v1281_v50, %v1183_v40 }
 0x53d   : > { %v1283_v60 = vpop.f32.mrf.mxu1 }
 0x53e   : > { %v1507_v14 = vpack.c.bf16 %v1313_v54, %v1312_v52  ;;  %v1284_v15 = vadd.f32 %v1283_v60, %v1183_v40  ;;  %v1314_v33 = vadd.f32 %v2094_v58, %v1282_v4  ;;  %v1195_v58 = vpop.permute.xlu0 %1194 }
 0x53f   : > { %v1285_v10 = vpop.f32.mrf.mxu1 }
 0x540   : > { %1375 = vst [vmem:[%s2167_s21 + $0x8] sm:$0xff] %v1507_v14  ;;  %v1315_v16 = vadd.f32 %v2098_v8, %v1284_v15  ;;  %v1286_v11 = vadd.f32 %v1285_v10, %v1187_v20 }
 0x541   : > { %v1287_v13 = vpop.f32.mrf.mxu1 }
 0x542   : > { %v1508_v18 = vpack.c.bf16 %v1315_v16, %v1314_v33  ;;  %v1288_v23 = vadd.f32 %v1287_v13, %v1187_v20  ;;  %v1316_v0 = vadd.f32 %v2102_v19, %v1286_v11  ;;  %v1199_v19 = vpop.permute.xlu1 %1198  ;;  %v1203_v48 = vpop.permute.xlu0 %1202 }
 0x543   : > { %v1291_v27 = vpop.f32.mrf.mxu1 }
 0x544   : > { %1376 = vst [vmem:[%s2167_s21 + $0x10] sm:$0xff] %v1508_v18  ;;  %v1317_v5 = vadd.f32 %v2106_v3, %v1288_v23  ;;  %v1292_v59 = vadd.f32 %v1291_v27, %v1191_v6 }
 0x545   : > { %v1293_v61 = vpop.f32.mrf.mxu1 }
 0x546   : > { %v1509_v63 = vpack.c.bf16 %v1317_v5, %v1316_v0  ;;  %v1294_v26 = vadd.f32 %v1293_v61, %v1191_v6  ;;  %v1318_v8 = vadd.f32 %v2120_v12, %v1292_v59 }
 0x547   : > { %v1295_v28 = vpop.f32.mrf.mxu1 }
 0x548   : > { %1377 = vst [vmem:[%s2167_s21 + $0x18] sm:$0xff] %v1509_v63  ;;  %v1319_v9 = vadd.f32 %v2124_v32, %v1294_v26  ;;  %v1296_v22 = vadd.f32 %v1295_v28, %v1195_v58 }
 0x549   : > { %v1297_v35 = vpop.f32.mrf.mxu1 }
 0x54a   : > { %v1510_v21 = vpack.c.bf16 %v1319_v9, %v1318_v8  ;;  %v1298_v36 = vadd.f32 %v1297_v35, %v1195_v58  ;;  %v1320_v3 = vadd.f32 %v2112_v53, %v1296_v22 }
 0x54b   : > { %v1301_v41 = vpop.f32.mrf.mxu1 }
 0x54c   : > { %1378 = vst [vmem:[%s2167_s21 + $0x20] sm:$0xff] %v1510_v21  ;;  %v1321_v7 = vadd.f32 %v2116_v25, %v1298_v36  ;;  %v1302_v42 = vadd.f32 %v1301_v41, %v1199_v19 }
 0x54d   : > { %v1303_v43 = vpop.f32.mrf.mxu1 }
 0x54e   : > { %v1511_v46 = vpack.c.bf16 %v1321_v7, %v1320_v3  ;;  %v1304_v12 = vadd.f32 %v1303_v43, %v1199_v19  ;;  %v1322_v1 = vadd.f32 %v2139_v2, %v1302_v42 }
 0x54f   : > { %v1305_v32 = vpop.f32.mrf.mxu1 }
 0x550   : > { %1379 = vst [vmem:[%s2167_s21 + $0x28] sm:$0xff] %v1511_v46  ;;  %v1323_v47 = vadd.f32 %v2143_v29, %v1304_v12  ;;  %v1306_v31 = vadd.f32 %v1305_v32, %v1203_v48 }
 0x551   : > { %v1307_v51 = vpop.f32.mrf.mxu1 }
 0x552   : > { %v1512_v37 = vpack.c.bf16 %v1323_v47, %v1322_v1  ;;  %v1308_v45 = vadd.f32 %v1307_v51, %v1203_v48  ;;  %v1324_v53 = vadd.f32 %v2131_v49, %v1306_v31 }
 0x554   : > { %1380 = vst [vmem:[%s2167_s21 + $0x30] sm:$0xff] %v1512_v37  ;;  %v1325_v25 = vadd.f32 %v2135_v44, %v1308_v45 }
 0x556   : > { %v1513_v62 = vpack.c.bf16 %v1325_v25, %v1324_v53 }
 0x558   : > { %1381 = vst [vmem:[%s2167_s21 + $0x38] sm:$0xff] %v1513_v62 }
 0x559 PF: > { %s19_s23 = sadd.s32 1, %s1616_s23  }
 0x55a   : > { %p16_p4 = scmp.ge.s32.totalorder %s19_s23, 4  }
 0x55c   :  { %18 = sbr.rel (!%p16_p4) target bundleno = 3 (0x3), region = 82 }

// kernel: pool_forward.3
= control target key start
LH: loop header
LB: loop body
LE: loop exit
PB: predicated region body
PF: predicated region fallthrough
CT: control target
= control target key end

     0   :  { %12 = vsyncpa [#allocation3], 0  ;;  %s4861_s0 = inlined_call_operand.vmem [shape: bf16[2,64,128], index: 0, kind: input, shape index: {}]   ;;  %s4862_s1 = inlined_call_operand.vmem [shape: f32[2,64,256], index: 1, kind: input, shape index: {}]   ;;  %s4863_s2 = inlined_call_operand.vmem [shape: bf16[192,64], index: 2, kind: input, shape index: {}]   ;;  %s4864_s3 = inlined_call_operand.vmem [shape: bf16[128,64], index: 3, kind: input, shape index: {}]   ;;  %s4865_s4 = inlined_call_operand.vmem [shape: bf16[128,64], index: 4, kind: input, shape index: {}]   ;;  %s4866_s5 = inlined_call_operand.vmem [shape: bf16[64,128], index: 5, kind: input, shape index: {}]   ;;  %s4867_s6 = inlined_call_operand.vmem [shape: f32[192,3], index: 6, kind: input, shape index: {}]   ;;  %s4868_s7 = inlined_call_operand.hbm [shape: f32[2,64,128], index: 7, kind: output, shape index: {}]  }
   0x1   :  { %14 = vsyncpa [#allocation3 + $0x1], 0  ;;  %s3683_s24 = smov 0   ;;  %s3685_s25 = smov 0  }
   0x2   :  { %s3687_s26 = smov 0   ;;  %s3689_s27 = smov 0  }
   0x3 LB: > { %s3704_s28 = sadd.s32 4294967295, %s3634_s27   ;;  %s2961_s29 = sadd.s32 4294967294, %s3634_s27   ;;  %s3634_s27 = sphi %s3689_s27, %s4947_s27   ;;  %s3630_s26 = sphi %s3687_s26, %s4946_s26   ;;  %s3626_s25 = sphi %s3685_s25, %s4945_s25   ;;  %s3622_s24 = sphi %s3683_s24, %s4944_s24  }
   0x4   : > { %s3708_s30 = sadd.s32 1, %s3634_s27   ;;  %s184_s8 = sadd.s32 1, %s3630_s26 }
   0x5   : > { %s181_s9 = ssub.s32 %s3634_s27, %s3708_s30  ;;  %p194_p0 = scmp.ne.s32.totalorder %s3630_s26, %s3626_s25 }
   0x6   : > { %p182_p1 = scmp.eq.s32.totalorder %s181_s9, 0  ;;  %p195_p2 = scmp.eq.s32.totalorder %s3704_s28, 1 }
   0x7   : > { %p200_p3 = scmp.ne.s32.totalorder %s3626_s25, %s3622_s24  ;;  %p201_p4 = scmp.eq.s32.totalorder %s2961_s29, 1 }
   0x8   : > { %s3719_s10 = scalar_select %p182_p1, %s3630_s26, %s184_s8  }
   0x9   : > { %p3721_p5 = por %p195_p2, %p194_p0  ;;  %p3725_p6 = por %p201_p4, %p200_p3 }
   0xa   : > { %p2964_p7 = scmp.ge.s32.totalorder %s3634_s27, 1  ;;  %p250_p8 = scmp.lt.s32.totalorder %s3634_s27, 3 }
   0xc   : > { %p251_p9 = pnand %p2964_p7, %p250_p8 }
   0xe   : > { %254 = sbr.rel (%p251_p9) target bundleno = 3176 (0xc68), region = 48 }
  0x13   : > { %p287_p10 = scmp.lt.s32.totalorder %s3704_s28, 1  ;;  %v3258_v0 = vld [vmem:[%s4863_s2] sm:$0xff]   ;;  %vm575_vm0 = vcmask 523264   ;;  %v4871_v2 = vmov 0   ;;  %v324_v3 = vld [vmem:[%s4867_s6 + $0x8] sm:$0xff]  ;;  %v4869_v4 = vmov 1  }
  0x14   : > { %3122 = vmatprep.mubr.msk.bf16.mxu0 %vm575_vm0, %v3258_v0  ;;  %v323_v1 = vld [vmem:[%s4867_s6] sm:$0xff]  ;;  %3239 = vset.pattern.permute.xlu0 %v4871_v2  ;;  %v3259_v32 = vld [vmem:[%s4863_s2 + $0x8] sm:$0xff]   ;;  %v3261_v35 = vld [vmem:[%s4863_s2 + $0x10] sm:$0xff]   ;;  %vm1025_vm1 = vcmask 130048   ;;  %s284_s14 = sand.u32 1, %s3626_s25   ;;  %s3073_s17 = sshll.u32 %s3704_s28, 10 }
  0x15   : > { %s288_s15 = scalar_select %p287_p10, %s3704_s28, 1  ;;  %925 = vmatprep.mubr.bf16.mxu1 %v4871_v2  ;;  %373 = vperm.xlu0 %3239, %v323_v1   ;;  %v3260_v34 = vld [vmem:[%s4864_s3] sm:$0xff]   ;;  %v3262_v36 = vld [vmem:[%s4863_s2 + $0x18] sm:$0xff]   ;;  %v3264_v38 = vld [vmem:[%s4863_s2 + $0x28] sm:$0xff]  }
  0x16   : > { %3240 = vset.pattern.permute.xlu1 %v4869_v4  ;;  %v3263_v37 = vld [vmem:[%s4863_s2 + $0x20] sm:$0xff]   ;;  %v3265_v39 = vld [vmem:[%s4863_s2 + $0x30] sm:$0xff]   ;;  %v3266_v40 = vld [vmem:[%s4863_s2 + $0x38] sm:$0xff]   ;;  %s4821_s28 = scalar_lea.sflag [#allocation3], %s284_s14  ;;  %s3640_s22 = smov [#allocation2]  }
  0x17   : > { %s3071_s20 = sshll.u32 %s288_s15, 5  ;;  %s3072_s21 = sshll.u32 %s288_s15, 7  ;;  %766 = vperm.xlu1 %3240, %v323_v1   ;;  %v3267_v41 = vld [vmem:[%s4863_s2 + $0x40] sm:$0xff]   ;;  %v3268_v42 = vld [vmem:[%s4863_s2 + $0x48] sm:$0xff]   ;;  %v3269_v43 = vld [vmem:[%s4863_s2 + $0x50] sm:$0xff]  }
  0x18   : > { %s3749_s29 = scalar_lea.vmem %s4861_s0, %s3071_s20  ;;  %s3754_s13 = scalar_lea.vmem %s4862_s1, %s3072_s21  ;;  %v3270_v44 = vld [vmem:[%s4863_s2 + $0x58] sm:$0xff]  }
  0x19   : > { %v305_v5 = vld [vmem:[%s3749_s29 + $0x18] sm:$0xff]   ;;  %v303_v6 = vld [vmem:[%s3749_s29 + $0x10] sm:$0xff]   ;;  %v301_v7 = vld [vmem:[%s3749_s29 + $0x8] sm:$0xff]   ;;  %378 = vperm.xlu0 %3239, %v324_v3   ;;  %s2965_s15 = sshll.u32 %s284_s14, 6  ;;  %s4813_s20 = scalar_lea.hbm %s4868_s7, %s3073_s17 }
  0x1a   : > { %v320_v8 = vld [vmem:[%s3754_s13 + $0x68] sm:$0xff]  ;;  %v322_v9 = vld [vmem:[%s3754_s13 + $0x78] sm:$0xff]  ;;  %v319_v11 = vld [vmem:[%s3754_s13 + $0x60] sm:$0xff]  ;;  %3114 = vmatprep.subr.bf16.mxu0 %v305_v5  ;;  %s4798_s16 = scalar_lea.vmem [#allocation2], %s2965_s15  ;;  %s3578_s23 = sshll.u32 %s3640_s22, 4  ;;  %s3579_s23 = int_to_ptr.vmem [resolvable:$false] %s3578_s23 }
  0x1b   : > { %v764_v10 = vpack.c.bf16 %v322_v9, %v320_v8  ;;  %v321_v12 = vld [vmem:[%s3754_s13 + $0x70] sm:$0xff]  ;;  %v316_v13 = vld [vmem:[%s3754_s13 + $0x48] sm:$0xff]  ;;  %v318_v15 = vld [vmem:[%s3754_s13 + $0x58] sm:$0xff]  ;;  %770 = vperm.xlu1 %3240, %v324_v3   ;;  %3115 = vmatpush3.bf16.msra.mxu0 %v305_v5  ;;  %s3580_s8 = scalar_lea.vmem %s3579_s23, 2048 }
  0x1c   : > { %v763_v14 = vpack.c.bf16 %v321_v12, %v319_v11  ;;  %v315_v16 = vld [vmem:[%s3754_s13 + $0x40] sm:$0xff]  ;;  %v317_v17 = vld [vmem:[%s3754_s13 + $0x50] sm:$0xff]  ;;  %v762_v18 = vpack.c.bf16 %v318_v15, %v316_v13  ;;  %v312_v19 = vld [vmem:[%s3754_s13 + $0x28] sm:$0xff]  ;;  %3116 = vmatprep.subr.bf16.mxu0 %v303_v6 }
  0x1d   : > { %901 = vmatprep.subr.bf16.mxu1 %v764_v10  ;;  %v314_v20 = vld [vmem:[%s3754_s13 + $0x38] sm:$0xff]  ;;  %v299_v21 = vld [vmem:[%s3749_s29] sm:$0xff]   ;;  %v761_v22 = vpack.c.bf16 %v317_v17, %v315_v16  ;;  %v313_v24 = vld [vmem:[%s3754_s13 + $0x30] sm:$0xff] }
  0x1e   : > { %902 = vmatpush1.bf16.msra.mxu1 %v763_v14  ;;  %v311_v23 = vld [vmem:[%s3754_s13 + $0x20] sm:$0xff]  ;;  %v760_v25 = vpack.c.bf16 %v314_v20, %v312_v19  ;;  %v308_v26 = vld [vmem:[%s3754_s13 + $0x8] sm:$0xff]  ;;  %v310_v27 = vld [vmem:[%s3754_s13 + $0x18] sm:$0xff] }
  0x1f   : > { %903 = vmatprep.subr.bf16.mxu1 %v762_v18  ;;  %3241 = vset.pattern.permute.xlu1 %v4871_v2  ;;  %v307_v28 = vld [vmem:[%s3754_s13] sm:$0xff]  ;;  %v309_v29 = vld [vmem:[%s3754_s13 + $0x10] sm:$0xff]  ;;  %v759_v30 = vpack.c.bf16 %v313_v24, %v311_v23  ;;  %v758_v31 = vpack.c.bf16 %v310_v27, %v308_v26  ;;  %v3271_v18 = vld [vmem:[%s4864_s3 + $0x8] sm:$0xff]  }
  0x20   : > { %3117 = vmatpush3.bf16.msra.mxu0 %v303_v6  ;;  %v757_v33 = vpack.c.bf16 %v309_v29, %v307_v28  ;;  %v3273_v24 = vld [vmem:[%s4864_s3 + $0x18] sm:$0xff]   ;;  %v3274_v27 = vld [vmem:[%s4864_s3 + $0x20] sm:$0xff]  }
  0x21   : > { %3118 = vmatprep.subr.bf16.mxu0 %v301_v7 }
  0x22   : > { %904 = vmatpush1.bf16.msra.mxu1 %v761_v22 }
  0x23   : > { %905 = vmatprep.subr.bf16.mxu1 %v760_v25 }
  0x24   : > { %3119 = vmatpush3.bf16.msra.mxu0 %v301_v7 }
  0x25   : > { %3120 = vmatprep.subr.bf16.mxu0 %v299_v21 }
  0x26   : > { %906 = vmatpush1.bf16.msra.mxu1 %v759_v30 }
  0x27   : > { %907 = vmatprep.subr.bf16.mxu1 %v758_v31 }
  0x28   : > { %3121 = vmatpush3.bf16.msra.mxu0 %v299_v21  ;;  %v3272_v21 = vld [vmem:[%s4864_s3 + $0x10] sm:$0xff]  }
  0x2a   : > { %908 = vmatpush1.bf16.msra.mxu1 %v757_v33 }
  0x2b   : > { %3123 = vmatmul.mubr.msk.bf16.vlgmr.msra.gmra.mxu0 %vm575_vm0, %v3259_v32 }
  0x2c   : > { %3126 = vmatprep.mubr.msk.bf16.mxu0 %vm575_vm0, %v3261_v35 }
  0x2d   : > { %3006 = vmatmul.mubr.msk.bf16.vlgmr.msra.gmra.mxu1 %vm575_vm0, %v3260_v34 }
  0x2e   : > { %935 = vmatprep.mubr.bf16.mxu1 %v4871_v2 }
  0x33   : > { %3127 = vmatmul.mubr.msk.bf16.gmra.mxu0 %vm575_vm0, %v3262_v36 }
  0x34   : > { %3130 = vmatprep.mubr.msk.bf16.mxu0 %vm575_vm0, %v3263_v37 }
  0x35   : > { %3007 = vmatmul.mubr.msk.bf16.gmra.mxu1 %vm575_vm0, %v3271_v18 }
  0x36   : > { %945 = vmatprep.mubr.bf16.mxu1 %v4871_v2 }
  0x3b   : > { %3131 = vmatmul.mubr.msk.bf16.gmra.mxu0 %vm575_vm0, %v3264_v38 }
  0x3c   : > { %3134 = vmatprep.mubr.msk.bf16.mxu0 %vm575_vm0, %v3265_v39 }
  0x3d   : > { %3008 = vmatmul.mubr.msk.bf16.gmra.mxu1 %vm575_vm0, %v3272_v21 }
  0x3e   : > { %955 = vmatprep.mubr.bf16.mxu1 %v4871_v2 }
  0x43   : > { %3135 = vmatmul.mubr.msk.bf16.gmra.mxu0 %vm575_vm0, %v3266_v40 }
  0x44   : > { %3138 = vmatprep.mubr.msk.bf16.mxu0 %vm575_vm0, %v3267_v41 }
  0x45   : > { %3009 = vmatmul.mubr.msk.bf16.gmra.mxu1 %vm575_vm0, %v3273_v24 }
  0x46   : > { %965 = vmatprep.mubr.bf16.mxu1 %v4871_v2 }
  0x4b   : > { %3139 = vmatmul.mubr.msk.bf16.gmra.mxu0 %vm575_vm0, %v3268_v42 }
  0x4c   : > { %3142 = vmatprep.mubr.msk.bf16.mxu0 %vm575_vm0, %v3269_v43 }
  0x4d   : > { %3010 = vmatmul.mubr.msk.bf16.gmra.mxu1 %vm575_vm0, %v3274_v27 }
  0x4e   : > { %975 = vmatprep.mubr.bf16.mxu1 %v4871_v2 }
  0x53   : > { %3143 = vmatmul.mubr.msk.bf16.gmra.mxu0 %vm575_vm0, %v3270_v44 }
  0x54   : > { %1082 = vmatprep.mubr.bf16.mxu0 %v4871_v2 }
  0x90   : > { %v374_v46 = vpop.permute.xlu0 %373 }
  0x92   : > { %v767_v45 = vpop.permute.xlu1 %766 }
  0x94   : > { %v379_v55 = vpop.permute.xlu0 %378 }
  0x96   : > { %v771_v51 = vpop.permute.xlu1 %770 }
  0xeb   : > { %v3827_v47 = vpop.f32.mrf.mxu0 }
  0xed   : > { %v927_v48 = vpop.f32.mrf.mxu1  ;;  %v646_v49 = vpop.f32.mrf.mxu0 }
  0xee   : > { %v928_v53 = vadd.f32 %v927_v48, %v767_v45  ;;  %v647_v59 = vadd.f32 %v646_v49, %v374_v46 }
  0xef   : > { %v929_v50 = vpop.f32.mrf.mxu1  ;;  %v3829_v52 = vpop.f32.mrf.mxu0 }
  0xf0   : > { %v930_v57 = vadd.f32 %v929_v50, %v767_v45 }
  0xf1   : > { %v931_v54 = vpop.f32.mrf.mxu1  ;;  %v649_v56 = vpop.f32.mrf.mxu0 }
  0xf2   : > { %v932_v58 = vadd.f32 %v931_v54, %v771_v51  ;;  %v650_v60 = vadd.f32 %v649_v56, %v379_v55 }
  0xf3   : > { %v933_v61 = vpop.f32.mrf.mxu1  ;;  %v3846_v12 = vpop.f32.mrf.mxu0 }
  0xf4   : > { %v934_v62 = vadd.f32 %v933_v61, %v771_v51  ;;  %v1006_v63 = vpack.c.bf16 %v650_v60, %v647_v59  ;;  %v1007_v0 = vpack.c.bf16 %v932_v58, %v928_v53  ;;  %4878 = vst [vmem:[#allocation5_spill] sm:$0xff] %v3846_v12 }
  0xf5   : > { %v3848_v13 = vpop.f32.mrf.mxu0 }
  0xf6   : > { %v1008_v1 = vpack.c.bf16 %v934_v62, %v930_v57  ;;  %1009 = vxpose.xlu0.c.b16.start.end [1/1] (short) %v1006_v63, 128 }
  0xf7   : > { %v3850_v14 = vpop.f32.mrf.mxu0 }
  0xf8   : > { %1064 = vmatprep.subr.bf16.mxu0 %v1008_v1  ;;  %4879 = vst [vmem:[#allocation6_spill] sm:$0xff] %v3850_v14 }
  0xf9   : > { %1065 = vmatpush1.bf16.msra.mxu0 %v1007_v0  ;;  %v3852_v15 = vpop.f32.mrf.mxu0 }
  0xfb   : > { %v3854_v16 = vpop.f32.mrf.mxu0 }
  0xfc   : > { %4880 = vst [vmem:[#allocation7_spill] sm:$0xff] %v3854_v16 }
  0xfd   : > { %v3856_v17 = vpop.f32.mrf.mxu0 }
  0xfe   : > { %4881 = vst [vmem:[#allocation8_spill] sm:$0xff] %v3856_v17 }
  0xff   : > { %v3861_v19 = vpop.f32.mrf.mxu0 }
 0x100   : > { %4882 = vst [vmem:[#allocation9_spill] sm:$0xff] %v3861_v19 }
 0x101   : > { %v3865_v20 = vpop.f32.mrf.mxu0 }
 0x102   : > { %4883 = vst [vmem:[#allocation10_spill] sm:$0xff] %v3865_v20 }
 0x103   : > { %v3870_v22 = vpop.f32.mrf.mxu0 }
 0x104   : > { %4884 = vst [vmem:[#allocation11_spill] sm:$0xff] %v3870_v22 }
 0x105   : > { %v3874_v23 = vpop.f32.mrf.mxu0 }
 0x106   : > { %4885 = vst [vmem:[#allocation12_spill] sm:$0xff] %v3874_v23 }
 0x107   : > { %v3879_v25 = vpop.f32.mrf.mxu0 }
 0x108   : > { %4886 = vst [vmem:[#allocation13_spill] sm:$0xff] %v3879_v25 }
 0x109   : > { %v3883_v26 = vpop.f32.mrf.mxu0 }
 0x10a   : > { %4887 = vst [vmem:[#allocation14_spill] sm:$0xff] %v3883_v26 }
 0x10b   : > { %v3888_v28 = vpop.f32.mrf.mxu0 }
 0x10c   : > { %4888 = vst [vmem:[#allocation15_spill] sm:$0xff] %v3888_v28 }
 0x10d   : > { %v3892_v29 = vpop.f32.mrf.mxu0 }
 0x10e   : > { %4889 = vst [vmem:[#allocation16_spill] sm:$0xff] %v3892_v29 }
 0x10f   : > { %v3894_v30 = vpop.f32.mrf.mxu0 }
 0x110   : > { %4890 = vst [vmem:[#allocation17_spill] sm:$0xff] %v3894_v30 }
 0x111   : > { %v3896_v31 = vpop.f32.mrf.mxu0 }
 0x112   : > { %4891 = vst [vmem:[#allocation18_spill] sm:$0xff] %v3896_v31 }
 0x113   : > { %v3898_v32 = vpop.f32.mrf.mxu0 }
 0x114   : > { %4892 = vst [vmem:[#allocation19_spill] sm:$0xff] %v3898_v32 }
 0x115   : > { %v3900_v33 = vpop.f32.mrf.mxu0 }
 0x116   : > { %4893 = vst [vmem:[#allocation20_spill] sm:$0xff] %v3900_v33 }
 0x117   : > { %v3902_v34 = vpop.f32.mrf.mxu0 }
 0x118   : > { %4894 = vst [vmem:[#allocation21_spill] sm:$0xff] %v3902_v34 }
 0x119   : > { %v3904_v35 = vpop.f32.mrf.mxu0 }
 0x11a   : > { %4895 = vst [vmem:[#allocation22_spill] sm:$0xff] %v3904_v35 }
 0x158   : > { %v1017_v3 = vpop.trf.xlu0 }
 0x159   : > { %3014 = vmatmul.mubr.msk.bf16.vlgmr.msra.gmra.mxu0 %vm1025_vm1, %v1017_v3 }
 0x15a   : > { %1092 = vmatprep.mubr.bf16.mxu0 %v4871_v2 }
 0x15c   : > { %v1018_v5 = vpop.trf.xlu0 }
 0x160   : > { %v1019_v6 = vpop.trf.xlu0 }
 0x161   : > { %3015 = vmatmul.mubr.msk.bf16.gmra.mxu0 %vm1025_vm1, %v1018_v5 }
 0x162   : > { %1102 = vmatprep.mubr.bf16.mxu0 %v4871_v2 }
 0x164   : > { %v1020_v7 = vpop.trf.xlu0 }
 0x168   : > { %v1021_v8 = vpop.trf.xlu0 }
 0x169   : > { %3016 = vmatmul.mubr.msk.bf16.gmra.mxu0 %vm1025_vm1, %v1019_v6 }
 0x16a   : > { %1112 = vmatprep.mubr.bf16.mxu0 %v4871_v2 }
 0x16c   : > { %v1022_v9 = vpop.trf.xlu0 }
 0x170   : > { %v1023_v10 = vpop.trf.xlu0 }
 0x171   : > { %3017 = vmatmul.mubr.msk.bf16.gmra.mxu0 %vm1025_vm1, %v1020_v7 }
 0x172   : > { %1122 = vmatprep.mubr.bf16.mxu0 %v4871_v2 }
 0x174   : > { %v1024_v11 = vpop.trf.xlu0 }
 0x179   : > { %3018 = vmatmul.mubr.msk.bf16.gmra.mxu0 %vm1025_vm1, %v1021_v8 }
 0x17a   : > { %1132 = vmatprep.mubr.bf16.mxu0 %v4871_v2 }
 0x181   : > { %3019 = vmatmul.mubr.msk.bf16.gmra.mxu0 %vm1025_vm1, %v1022_v9 }
 0x182   : > { %1142 = vmatprep.mubr.bf16.mxu0 %v4871_v2 }
 0x189   : > { %3020 = vmatmul.mubr.msk.bf16.gmra.mxu0 %vm1025_vm1, %v1023_v10 }
 0x18a   : > { %1152 = vmatprep.mubr.bf16.mxu0 %v4871_v2 }
 0x191   : > { %3021 = vmatmul.mubr.msk.bf16.gmra.mxu0 %vm1025_vm1, %v1024_v11 }
 0x219   : > { %v3906_v36 = vpop.f32.mrf.mxu0 }
 0x21b   : > { %v3908_v37 = vpop.f32.mrf.mxu0 }
 0x21d   : > { %v3910_v38 = vpop.f32.mrf.mxu0 }
 0x21f   : > { %v3912_v39 = vpop.f32.mrf.mxu0 }
 0x221   : > { %v3914_v40 = vpop.f32.mrf.mxu0 }
 0x223   : > { %v3916_v41 = vpop.f32.mrf.mxu0 }
 0x225   : > { %v3918_v42 = vpop.f32.mrf.mxu0 }
 0x227   : > { %v3920_v43 = vpop.f32.mrf.mxu0 }
 0x228   : > { %v1172_v24 = vmax.f32 %v3918_v42, %v3920_v43 }
 0x229   : > { %v3922_v44 = vpop.f32.mrf.mxu0 }
 0x22b   : > { %v3924_v45 = vpop.f32.mrf.mxu0 }
 0x22d   : > { %v3926_v46 = vpop.f32.mrf.mxu0 }
 0x22f   : > { %v3928_v48 = vpop.f32.mrf.mxu0 }
 0x230   : > { %v1178_v18 = vmax.f32 %v3926_v46, %v3928_v48 }
 0x231   : > { %v3930_v49 = vpop.f32.mrf.mxu0 }
 0x233   : > { %v3932_v50 = vpop.f32.mrf.mxu0 }
 0x235   : > { %v3934_v51 = vpop.f32.mrf.mxu0 }
 0x237   : > { %v3936_v53 = vpop.f32.mrf.mxu0 }
 0x239   : > { %v3938_v54 = vpop.f32.mrf.mxu0 }
 0x23b   : > { %v3940_v55 = vpop.f32.mrf.mxu0 }
 0x23d   : > { %v3942_v56 = vpop.f32.mrf.mxu0 }
 0x23f   : > { %v3944_v57 = vpop.f32.mrf.mxu0 }
 0x241   : > { %v3946_v58 = vpop.f32.mrf.mxu0 }
 0x243   : > { %v3948_v59 = vpop.f32.mrf.mxu0 }
 0x244   : > { %v1193_v21 = vmax.f32 %v3946_v58, %v3948_v59 }
 0x245   : > { %v3950_v60 = vpop.f32.mrf.mxu0 }
 0x247   : > { %v3952_v61 = vpop.f32.mrf.mxu0 }
 0x248   : > { %v1196_v27 = vmax.f32 %v3950_v60, %v3952_v61 }
 0x249   : > { %v3954_v62 = vpop.f32.mrf.mxu0 }
 0x24b   : > { %v3956_v63 = vpop.f32.mrf.mxu0 }
 0x24c   : > { %v1199_v9 = vmax.f32 %v3954_v62, %v3956_v63 }
 0x24d   : > { %v3958_v0 = vpop.f32.mrf.mxu0 }
 0x24f   : > { %v3960_v1 = vpop.f32.mrf.mxu0 }
 0x250   : > { %v1202_v11 = vmax.f32 %v3958_v0, %v3960_v1 }
 0x251   : > { %v3962_v3 = vpop.f32.mrf.mxu0 }
 0x253   : > { %v3964_v5 = vpop.f32.mrf.mxu0 }
 0x254   : > { %v1205_v6 = vmax.f32 %v3962_v3, %v3964_v5 }
 0x255   : > { %v3968_v7 = vpop.f32.mrf.mxu0 }
 0x256   : > { %1206 = vmax.xlane.f32.xlu1 %v1205_v6  ;;  %v1166_v6 = vmax.f32 %v3910_v38, %v3912_v39 }
 0x257   : > { %v3970_v8 = vpop.f32.mrf.mxu0 }
 0x258   : > { %v1208_v10 = vmax.f32 %v3968_v7, %v3970_v8 }
 0x25a   : > { %1200 = vmax.xlane.f32.xlu1 %v1199_v9  ;;  %1209 = vmax.xlane.f32.xlu0 %v1208_v10  ;;  %v1187_v9 = vmax.f32 %v3938_v54, %v3940_v55  ;;  %v1190_v10 = vmax.f32 %v3942_v56, %v3944_v57 }
 0x25e   : > { %1203 = vmax.xlane.f32.xlu1 %v1202_v11  ;;  %1179 = vmax.xlane.f32.xlu0 %v1178_v18  ;;  %v1181_v11 = vmax.f32 %v3930_v49, %v3932_v50  ;;  %v1184_v18 = vmax.f32 %v3934_v51, %v3936_v53 }
 0x262   : > { %1194 = vmax.xlane.f32.xlu1 %v1193_v21  ;;  %1173 = vmax.xlane.f32.xlu0 %v1172_v24  ;;  %v1175_v21 = vmax.f32 %v3922_v44, %v3924_v45  ;;  %v326_v24 = vld [vmem:[%s4867_s6 + $0x18] sm:$0xff] }
 0x266   : > { %1197 = vmax.xlane.f32.xlu1 %v1196_v27  ;;  %1167 = vmax.xlane.f32.xlu0 %v1166_v6  ;;  %v1169_v27 = vmax.f32 %v3914_v40, %v3916_v41  ;;  %v1163_v6 = vmax.f32 %v3906_v36, %v3908_v37 }
 0x26a   : > { %1188 = vmax.xlane.f32.xlu1 %v1187_v9  ;;  %v325_v9 = vld [vmem:[%s4867_s6 + $0x10] sm:$0xff] }
 0x26e   : > { %1191 = vmax.xlane.f32.xlu1 %v1190_v10  ;;  %v331_v10 = vld [vmem:[%s4867_s6 + $0x40] sm:$0xff] }
 0x272   : > { %1182 = vmax.xlane.f32.xlu1 %v1181_v11  ;;  %v332_v11 = vld [vmem:[%s4867_s6 + $0x48] sm:$0xff] }
 0x276   : > { %1185 = vmax.xlane.f32.xlu1 %v1184_v18  ;;  %v3275_v18 = vld [vmem:[%s4864_s3 + $0x28] sm:$0xff]  }
 0x277   : > { %3011 = vmatmul.mubr.msk.bf16.gmra.mxu1 %vm575_vm0, %v3275_v18 }
 0x278   : > { %985 = vmatprep.mubr.bf16.mxu1 %v4871_v2 }
 0x27a   : > { %1176 = vmax.xlane.f32.xlu1 %v1175_v21  ;;  %v3276_v21 = vld [vmem:[%s4864_s3 + $0x30] sm:$0xff]  }
 0x27c   : > { %388 = vperm.xlu0 %3239, %v326_v24  }
 0x27e   : > { %1170 = vmax.xlane.f32.xlu1 %v1169_v27  ;;  %v4031_v27 = vpop.f32.mrf.mxu1 }
 0x27f   : > { %3012 = vmatmul.mubr.msk.bf16.gmra.mxu1 %vm575_vm0, %v3276_v21 }
 0x280   : > { %3243 = vset.pattern.permute.xlu0 %v4869_v4  ;;  %995 = vmatprep.mubr.bf16.mxu1 %v4871_v2 }
 0x281   : > { %774 = vperm.xlu0 %3243, %v325_v9  }
 0x282   : > { %1164 = vmax.xlane.f32.xlu1 %v1163_v6  ;;  %v4033_v6 = vpop.f32.mrf.mxu1 }
 0x284   : > { %v4037_v18 = vpop.f32.mrf.mxu1 }
 0x285   : > { %3244 = vset.pattern.permute.xlu0 %v4871_v2 }
 0x286   : > { %v4042_v19 = vpop.f32.mrf.mxu1 }
 0x293   : > { %383 = vperm.xlu1 %3241, %v325_v9  }
 0x297   : > { %3242 = vset.pattern.permute.xlu1 %v4869_v4 }
 0x298   : > { %798 = vperm.xlu1 %3242, %v331_v10  }
 0x29c   : > { %802 = vperm.xlu1 %3242, %v332_v11  }
 0x2a0   : > { %778 = vperm.xlu1 %3242, %v326_v24   ;;  %v3277_v24 = vld [vmem:[%s4864_s3 + $0x38] sm:$0xff]  }
 0x2a1   : > { %3013 = vmatmul.mubr.msk.bf16.gmra.mxu1 %vm575_vm0, %v3277_v24 }
 0x2df   : > { %v1207_v9 = vpop.xlane.xlu1 %1206 }
 0x2e0   : > { %v1239_v10 = vsub.f32 %v3962_v3, %v1207_v9  ;;  %v1240_v11 = vsub.f32 %v3964_v5, %v1207_v9  ;;  %v4045_v9 = vpop.f32.mrf.mxu1 }
 0x2e2   : > { %v1299_v2 = vmul.f32 1.442695, %v1239_v10  ;;  %v1301_v16 = vmul.f32 1.442695, %v1240_v11 }
 0x2e3   : > { %v1201_v21 = vpop.xlane.xlu1 %1200  ;;  %v1210_v4 = vpop.xlane.xlu0 %1209 }
 0x2e4   : > { %v1236_v17 = vsub.f32 %v3956_v63, %v1201_v21  ;;  %v1241_v20 = vsub.f32 %v3968_v7, %v1210_v4  ;;  %v1242_v24 = vsub.f32 %v3970_v8, %v1210_v4  ;;  %3294 = vpow2.f32 %v1299_v2  ;;  %v4050_v8 = vpop.f32.mrf.mxu1 }
 0x2e5   : > { %3296 = vpow2.f32 %v1301_v16  ;;  %v1235_v7 = vsub.f32 %v3954_v62, %v1201_v21 }
 0x2e6   : > { %v1303_v23 = vmul.f32 1.442695, %v1241_v20  ;;  %v1305_v26 = vmul.f32 1.442695, %v1242_v24  ;;  %v1293_v3 = vmul.f32 1.442695, %v1236_v17 }
 0x2e7   : > { %v1204_v22 = vpop.xlane.xlu1 %1203  ;;  %v1291_v17 = vmul.f32 1.442695, %v1235_v7 }
 0x2e8   : > { %v1238_v5 = vsub.f32 %v3960_v1, %v1204_v22  ;;  %3298 = vpow2.f32 %v1303_v23  ;;  %v1237_v63 = vsub.f32 %v3958_v0, %v1204_v22  ;;  %v4053_v23 = vpop.f32.mrf.mxu1 }
 0x2e9   : > { %3300 = vpow2.f32 %v1305_v26 }
 0x2ea   : > { %v1297_v10 = vmul.f32 1.442695, %v1238_v5  ;;  %3302 = vpow2.f32 %v1293_v3  ;;  %v1295_v2 = vmul.f32 1.442695, %v1237_v63  ;;  %v4058_v24 = vpop.f32.mrf.mxu1 }
 0x2eb   : > { %v1195_v4 = vpop.xlane.xlu1 %1194 }
 0x2ec   : > { %v1232_v20 = vsub.f32 %v3948_v59, %v1195_v4  ;;  %3304 = vpow2.f32 %v1297_v10  ;;  %v1231_v26 = vsub.f32 %v3946_v58, %v1195_v4  ;;  %v4061_v4 = vpop.f32.mrf.mxu1 }
 0x2ed   : > { %3306 = vpow2.f32 %v1295_v2  ;;  %4896 = vst [vmem:[#allocation23_spill] sm:$0xff] %v4061_v4 }
 0x2ee   : > { %v1285_v16 = vmul.f32 1.442695, %v1232_v20  ;;  %3308 = vpow2.f32 %v1291_v17  ;;  %v1283_v63 = vmul.f32 1.442695, %v1231_v26  ;;  %v1180_v26 = vpop.xlane.xlu0 %1179 }
 0x2ef   : > { %v1198_v1 = vpop.xlane.xlu1 %1197 }
 0x2f0   : > { %v1234_v11 = vsub.f32 %v3952_v61, %v1198_v1  ;;  %v1233_v22 = vsub.f32 %v3950_v60, %v1198_v1  ;;  %3310 = vpow2.f32 %v1285_v16 }
 0x2f1   : > { %v3295_v21 = vpop.eup %3294 }
 0x2f2   : > { %v1289_v62 = vmul.f32 1.442695, %v1234_v11  ;;  %v3297_v3 = vpop.eup %3296  ;;  %v1287_v5 = vmul.f32 1.442695, %v1233_v22 }
 0x2f3   : > { %v1189_v0 = vpop.xlane.xlu1 %1188 }
 0x2f4   : > { %v1228_v59 = vsub.f32 %v3940_v55, %v1189_v0  ;;  %3312 = vpow2.f32 %v1289_v62  ;;  %v1227_v11 = vsub.f32 %v3938_v54, %v1189_v0 }
 0x2f5   : > { %v3299_v61 = vpop.eup %3298  ;;  %3314 = vpow2.f32 %v1287_v5 }
 0x2f6   : > { %v3301_v7 = vpop.eup %3300  ;;  %v1277_v20 = vmul.f32 1.442695, %v1228_v59  ;;  %v1321_v58 = vpack.c.bf16 %v3299_v61, %v3295_v21  ;;  %3316 = vpow2.f32 %v1283_v63  ;;  %v4066_v59 = vpop.f32.mrf.mxu1  ;;  %v1275_v5 = vmul.f32 1.442695, %v1227_v11 }
 0x2f7   : > { %v1192_v10 = vpop.xlane.xlu1 %1191  ;;  %v3303_v2 = vpop.eup %3302  ;;  %v1322_v17 = vpack.c.bf16 %v3301_v7, %v3297_v3  ;;  %4897 = vst [vmem:[#allocation24_spill] sm:$0xff] %v4066_v59 }
 0x2f8   : > { %v1230_v60 = vsub.f32 %v3944_v57, %v1192_v10  ;;  %v1229_v55 = vsub.f32 %v3942_v56, %v1192_v10  ;;  %3318 = vpow2.f32 %v1277_v20  ;;  %v4069_v10 = vpop.f32.mrf.mxu1 }
 0x2f9   : > { %v3305_v1 = vpop.eup %3304  ;;  %1325 = vmatprep.subr.bf16.mxu1 %v1322_v17  ;;  %4898 = vst [vmem:[#allocation25_spill] sm:$0xff] %v4069_v10 }
 0x2fa   : > { %v1281_v16 = vmul.f32 1.442695, %v1230_v60  ;;  %v1320_v62 = vpack.c.bf16 %v3305_v1, %v3303_v2  ;;  %1326 = vmatpush1.bf16.xpose.msra.mxu1 %v1321_v58  ;;  %v1279_v21 = vmul.f32 1.442695, %v1229_v55  ;;  %v3307_v3 = vpop.eup %3306  ;;  %v4072_v2 = vpop.xlane.xlu0 %1173  ;;  %v1222_v55 = vsub.f32 %v3928_v48, %v1180_v26 }
 0x2fb   : > { %v1183_v22 = vpop.xlane.xlu1 %1182  ;;  %v3309_v61 = vpop.eup %3308 }
 0x2fc   : > { %v1224_v57 = vsub.f32 %v3932_v50, %v1183_v22  ;;  %3320 = vpow2.f32 %v1281_v16  ;;  %1327 = vmatprep.subr.bf16.mxu1 %v1320_v62  ;;  %v1319_v60 = vpack.c.bf16 %v3307_v3, %v3309_v61  ;;  %v1223_v1 = vsub.f32 %v3930_v49, %v1183_v22  ;;  %v4077_v16 = vpop.f32.mrf.mxu1 }
 0x2fd   : > { %v3311_v0 = vpop.eup %3310  ;;  %3322 = vpow2.f32 %v1279_v21  ;;  %4899 = vst [vmem:[#allocation26_spill] sm:$0xff] %v4077_v16 }
 0x2fe   : > { %v1269_v63 = vmul.f32 1.442695, %v1224_v57  ;;  %3324 = vpow2.f32 %v1275_v5  ;;  %v1267_v3 = vmul.f32 1.442695, %v1223_v1  ;;  %v4079_v61 = vpop.xlane.xlu0 %1167  ;;  %v4081_v49 = vpop.f32.mrf.mxu1 }
 0x2ff   : > { %v1186_v56 = vpop.xlane.xlu1 %1185 }
 0x300   : > { %v1226_v54 = vsub.f32 %v3936_v53, %v1186_v56  ;;  %v1225_v50 = vsub.f32 %v3934_v51, %v1186_v56  ;;  %3326 = vpow2.f32 %v1269_v63  ;;  %v1265_v56 = vmul.f32 1.442695, %v1222_v55 }
 0x301   : > { %v3313_v7 = vpop.eup %3312 }
 0x302   : > { %v1273_v20 = vmul.f32 1.442695, %v1226_v54  ;;  %v1318_v58 = vpack.c.bf16 %v3313_v7, %v3311_v0  ;;  %1328 = vmatpush1.bf16.xpose.msra.mxu1 %v1319_v60  ;;  %v1271_v51 = vmul.f32 1.442695, %v1225_v50  ;;  %v3315_v11 = vpop.eup %3314  ;;  %v1221_v7 = vsub.f32 %v3926_v46, %v1180_v26  ;;  %v969_v60 = vpop.f32.mrf.mxu1 }
 0x303   : > { %v1177_v17 = vpop.xlane.xlu1 %1176  ;;  %v3317_v21 = vpop.eup %3316  ;;  %v1218_v50 = vsub.f32 %v3920_v43, %v4072_v2 }
 0x304   : > { %v1220_v53 = vsub.f32 %v3924_v45, %v1177_v17  ;;  %3328 = vpow2.f32 %v1273_v20  ;;  %1329 = vmatprep.subr.bf16.mxu1 %v1318_v58  ;;  %v1219_v45 = vsub.f32 %v3922_v44, %v1177_v17  ;;  %v1317_v48 = vpack.c.bf16 %v3315_v11, %v3317_v21  ;;  %v389_v20 = vpop.permute.xlu0 %388  ;;  %v4090_v11 = vpop.f32.mrf.mxu1 }
 0x305   : > { %v3319_v5 = vpop.eup %3318  ;;  %3330 = vpow2.f32 %v1271_v51  ;;  %v1263_v55 = vmul.f32 1.442695, %v1221_v7  ;;  %v1257_v26 = vmul.f32 1.442695, %v1218_v50 }
 0x306   : > { %v1261_v62 = vmul.f32 1.442695, %v1220_v53  ;;  %v1259_v58 = vmul.f32 1.442695, %v1219_v45  ;;  %v973_v45 = vpop.f32.mrf.mxu1 }
 0x307   : > { %v1171_v57 = vpop.xlane.xlu1 %1170 }
 0x308   : > { %3332 = vpow2.f32 %v1261_v62  ;;  %v1216_v63 = vsub.f32 %v3916_v41, %v1171_v57  ;;  %v658_v41 = vadd.f32 %v3829_v52, %v389_v20  ;;  %v1215_v43 = vsub.f32 %v3914_v40, %v1171_v57 }
 0x309   : > { %v3321_v22 = vpop.eup %3320  ;;  %3334 = vpow2.f32 %v1267_v3  ;;  %v1217_v52 = vsub.f32 %v3918_v42, %v4072_v2  ;;  %v4900_v20 = vmov 0  }
 0x30a   : > { %v1316_v0 = vpack.c.bf16 %v3321_v22, %v3319_v5  ;;  %1330 = vmatpush1.bf16.xpose.msra.mxu1 %v1317_v48  ;;  %3336 = vpow2.f32 %v1265_v56  ;;  %v3323_v1 = vpop.eup %3322  ;;  %v1253_v44 = vmul.f32 1.442695, %v1216_v63  ;;  %v1251_v40 = vmul.f32 1.442695, %v1215_v43 }
 0x30b   : > { %v1165_v54 = vpop.xlane.xlu1 %1164  ;;  %v3325_v53 = vpop.eup %3324  ;;  %3338 = vpow2.f32 %v1259_v58  ;;  %v1255_v7 = vmul.f32 1.442695, %v1217_v52 }
 0x30c   : > { %1331 = vmatprep.subr.bf16.mxu1 %v1316_v0  ;;  %v1315_v3 = vpack.c.bf16 %v3323_v1, %v3325_v53  ;;  %3340 = vpow2.f32 %v1253_v44  ;;  %v1212_v5 = vsub.f32 %v3908_v37, %v1165_v54  ;;  %v1211_v1 = vsub.f32 %v3906_v36, %v1165_v54 }
 0x30d   : > { %v3327_v46 = vpop.eup %3326  ;;  %3342 = vpow2.f32 %v1263_v55 }
 0x30e   : > { %3344 = vpow2.f32 %v1257_v26  ;;  %v1245_v63 = vmul.f32 1.442695, %v1212_v5  ;;  %v1243_v53 = vmul.f32 1.442695, %v1211_v1  ;;  %v775_v5 = vpop.permute.xlu0 %774 }
 0x30f   : > { %v384_v17 = vpop.permute.xlu1 %383  ;;  %3346 = vpow2.f32 %v1251_v40 }
 0x310   : > { %v655_v51 = vadd.f32 %v3827_v47, %v384_v17  ;;  %v1214_v47 = vsub.f32 %v3912_v39, %v4079_v61  ;;  %3348 = vpow2.f32 %v1245_v63 }
 0x311   : > { %v3329_v62 = vpop.eup %3328  ;;  %3350 = vpow2.f32 %v1255_v7 }
 0x312   : > { %v1380_v21 = vpack.c.bf16 %v658_v41, %v655_v51  ;;  %v1314_v56 = vpack.c.bf16 %v3329_v62, %v3327_v46  ;;  %1332 = vmatpush1.bf16.xpose.msra.mxu1 %v1315_v3  ;;  %v3331_v48 = vpop.eup %3330  ;;  %v1249_v42 = vmul.f32 1.442695, %v1214_v47  ;;  %v940_v47 = vadd.f32 %v4033_v6, %v775_v5 }
 0x313   : > { %v799_v22 = vpop.permute.xlu1 %798 }
 0x314   : > { %1383 = vxpose.xlu1.c.b16.start.end [1/1] (short) %v1380_v21, 128  ;;  %1333 = vmatprep.subr.bf16.mxu1 %v1314_v56  ;;  %v970_v57 = vadd.f32 %v969_v60, %v799_v22  ;;  %v1213_v60 = vsub.f32 %v3910_v38, %v4079_v61  ;;  %3352 = vpow2.f32 %v1249_v42  ;;  %v968_v63 = vadd.f32 %v4081_v49, %v799_v22 }
 0x315   : > { %v3333_v37 = vpop.eup %3332  ;;  %3354 = vpow2.f32 %v1243_v53 }
 0x316   : > { %v3335_v58 = vpop.eup %3334  ;;  %v1247_v51 = vmul.f32 1.442695, %v1213_v60 }
 0x317   : > { %v803_v0 = vpop.permute.xlu1 %802  ;;  %v3337_v2 = vpop.eup %3336  ;;  %v1313_v44 = vpack.c.bf16 %v3331_v48, %v3335_v58 }
 0x318   : > { %v974_v50 = vadd.f32 %v973_v45, %v803_v0  ;;  %3245 = vset.pattern.permute.xlu1 %v4900_v20  ;;  %v1312_v17 = vpack.c.bf16 %v3337_v2, %v3333_v37  ;;  %v3339_v55 = vpop.eup %3338  ;;  %3356 = vpow2.f32 %v1247_v51  ;;  %v972_v37 = vadd.f32 %v4090_v11, %v803_v0 }
 0x319   : > { %v3341_v41 = vpop.eup %3340 }
 0x31a   : > { %v1324_v39 = vpack.c.bf16 %v974_v50, %v970_v57  ;;  %1334 = vmatpush1.bf16.xpose.msra.mxu1 %v1313_v44  ;;  %v3343_v46 = vpop.eup %3342  ;;  %v938_v50 = vadd.f32 %v4031_v27, %v775_v5  ;;  %v1323_v58 = vpack.c.bf16 %v972_v37, %v968_v63 }
 0x31b   : > { %1335 = vmatprep.subr.bf16.mxu1 %v1312_v17  ;;  %v3345_v26 = vpop.eup %3344  ;;  %v1311_v36 = vpack.c.bf16 %v3343_v46, %v3339_v55  ;;  %v779_v3 = vpop.permute.xlu1 %778 }
 0x31c   : > { %1357 = vmatprep.mubr.bf16.mxu1 %v1324_v39  ;;  %v1310_v54 = vpack.c.bf16 %v3345_v26, %v3341_v41  ;;  %v3347_v62 = vpop.eup %3346  ;;  %v944_v52 = vadd.f32 %v4042_v19, %v779_v3  ;;  %v942_v7 = vadd.f32 %v4037_v18, %v779_v3  ;;  %v4873_v19 = vmov 1065369472  }
 0x31d   : > { %v3349_v43 = vpop.eup %3348  ;;  %v1374_v3 = vlaneseq }
 0x31e   : > { %v3351_v21 = vpop.eup %3350  ;;  %v1382_v57 = vpack.c.bf16 %v944_v52, %v940_v47  ;;  %v1381_v42 = vpack.c.bf16 %v942_v7, %v938_v50 }
 0x31f   : > { %v1309_v61 = vpack.c.bf16 %v3351_v21, %v3347_v62  ;;  %v1375_v52 = vshrl.u32 %v1374_v3, 7 }
 0x321   : > { %v3353_v38 = vpop.eup %3352  ;;  %v4150_v47 = vsub.s32 0, %v1375_v52 }
 0x322   : > { %1336 = vmatpush1.bf16.xpose.msra.mxu1 %v1311_v36  ;;  %v1308_v56 = vpack.c.bf16 %v3353_v38, %v3349_v43  ;;  %v3355_v45 = vpop.eup %3354 }
 0x323   : > { %1337 = vmatprep.subr.bf16.mxu1 %v1310_v54 }
 0x325   : > { %v3357_v40 = vpop.eup %3356 }
 0x326   : > { %v1307_v48 = vpack.c.bf16 %v3357_v40, %v3355_v45 }
 0x32a   : > { %1338 = vmatpush1.bf16.xpose.msra.mxu1 %v1309_v61 }
 0x32b   : > { %1339 = vmatprep.subr.bf16.mxu1 %v1308_v56 }
 0x332   : > { %1340 = vmatpush1.bf16.xpose.msra.mxu1 %v1307_v48 }
 0x333   : > { %1437 = vmatprep.subr.bf16.mxu1 %v1382_v57 }
 0x337   : > { %v4126_v1 = vpop.f32.mrf.mxu1 }
 0x339   : > { %1358 = vmatmul.mubr.bf16.vlgmr.msra.gmra.mxu1 %v1323_v58  ;;  %v4128_v44 = vpop.f32.mrf.mxu1 }
 0x33a   : > { %1438 = vmatpush1.bf16.msra.mxu1 %v1381_v42  ;;  %1365 = vmatprep.mubr.bf16.mxu1 %v4873_v19 }
 0x33b   : > { %v4130_v39 = vpop.f32.mrf.mxu1 }
 0x33d   : > { %v4132_v17 = vpop.f32.mrf.mxu1 }
 0x33f   : > { %v4134_v60 = vpop.f32.mrf.mxu1 }
 0x340   : > { %4901 = vst [vmem:[#allocation27_spill] sm:$0xff] %v4134_v60 }
 0x341   : > { %1366 = vmatmul.mubr.bf16.gmra.mxu1 %v4873_v19  ;;  %v4136_v53 = vpop.f32.mrf.mxu1 }
 0x342   : > { %1455 = vmatprep.mubr.bf16.mxu1 %v4900_v20  ;;  %4902 = vst [vmem:[#allocation28_spill] sm:$0xff] %v4136_v53 }
 0x343   : > { %v4138_v55 = vpop.f32.mrf.mxu1 }
 0x344   : > { %4903 = vst [vmem:[#allocation29_spill] sm:$0xff] %v4138_v55 }
 0x345   : > { %v4140_v41 = vpop.f32.mrf.mxu1 }
 0x346   : > { %4904 = vst [vmem:[#allocation30_spill] sm:$0xff] %v4140_v41 }
 0x361   : > { %v4142_v51 = vpop.f32.mrf.mxu1 }
 0x362   : > { %4905 = vst [vmem:[#allocation31_spill] sm:$0xff] %v4142_v51  ;;  %v327_v51 = vld [vmem:[%s4867_s6 + $0x20] sm:$0xff] }
 0x363   : > { %v4144_v46 = vpop.f32.mrf.mxu1 }
 0x364   : > { %4906 = vst [vmem:[#allocation32_spill] sm:$0xff] %v4144_v46 }
 0x365   : > { %v4146_v26 = vpop.f32.mrf.mxu1 }
 0x366   : > { %4907 = vst [vmem:[#allocation33_spill] sm:$0xff] %v4146_v26 }
 0x367   : > { %v4148_v36 = vpop.f32.mrf.mxu1 }
 0x368   : > { %4908 = vst [vmem:[#allocation34_spill] sm:$0xff] %v4148_v36 }
 0x376   : > { %v1391_v6 = vpop.trf.xlu1 }
 0x377   : > { %3022 = vmatmul.mubr.msk.bf16.vlgmr.msra.gmra.mxu1 %vm1025_vm1, %v1391_v6 }
 0x378   : > { %1465 = vmatprep.mubr.bf16.mxu1 %v4900_v20 }
 0x37a   : > { %v1392_v18 = vpop.trf.xlu1 }
 0x37e   : > { %v1393_v27 = vpop.trf.xlu1 }
 0x37f   : > { %3023 = vmatmul.mubr.msk.bf16.gmra.mxu1 %vm1025_vm1, %v1392_v18 }
 0x380   : > { %1475 = vmatprep.mubr.bf16.mxu1 %v4900_v20 }
 0x382   : > { %v1394_v49 = vpop.trf.xlu1 }
 0x386   : > { %v1395_v11 = vpop.trf.xlu1 }
 0x387   : > { %3024 = vmatmul.mubr.msk.bf16.gmra.mxu1 %vm1025_vm1, %v1393_v27 }
 0x388   : > { %1485 = vmatprep.mubr.bf16.mxu1 %v4900_v20 }
 0x38a   : > { %v1396_v22 = vpop.trf.xlu1 }
 0x38e   : > { %v1397_v0 = vpop.trf.xlu1 }
 0x38f   : > { %3025 = vmatmul.mubr.msk.bf16.gmra.mxu1 %vm1025_vm1, %v1394_v49 }
 0x390   : > { %1495 = vmatprep.mubr.bf16.mxu1 %v4900_v20 }
 0x392   : > { %v1398_v2 = vpop.trf.xlu1 }
 0x397   : > { %3026 = vmatmul.mubr.msk.bf16.gmra.mxu1 %vm1025_vm1, %v1395_v11 }
 0x398   : > { %1505 = vmatprep.mubr.bf16.mxu1 %v4900_v20 }
 0x39f   : > { %3027 = vmatmul.mubr.msk.bf16.gmra.mxu1 %vm1025_vm1, %v1396_v22 }
 0x3a0   : > { %1515 = vmatprep.mubr.bf16.mxu1 %v4900_v20 }
 0x3a7   : > { %3028 = vmatmul.mubr.msk.bf16.gmra.mxu1 %vm1025_vm1, %v1397_v0 }
 0x3a8   : > { %1525 = vmatprep.mubr.bf16.mxu1 %v4900_v20 }
 0x3af   : > { %3029 = vmatmul.mubr.msk.bf16.gmra.mxu1 %vm1025_vm1, %v1398_v2 }
 0x3f9   : > { %v1359_v54 = vpop.f32.mrf.mxu1 }
 0x3fb   : > { %v1361_v62 = vpop.f32.mrf.mxu1 }
 0x3fd   : > { %v1362_v43 = vpop.f32.mrf.mxu1 }
 0x3ff   : > { %v1364_v21 = vpop.f32.mrf.mxu1 }
 0x401   : > { %v1367_v38 = vpop.f32.mrf.mxu1 }
 0x402   : > { %3358 = vrcp.f32 %v1367_v38 }
 0x403   : > { %v1369_v61 = vpop.f32.mrf.mxu1 }
 0x405   : > { %v1370_v5 = vpop.f32.mrf.mxu1 }
 0x407   : > { %v1371_v56 = vpop.f32.mrf.mxu1 }
 0x40f   : > { %v3359_v45 = vpop.eup %3358 }
 0x410   : > { %v1377_v40 = vrot.slane %v3359_v45, %v4150_v47 }
 0x412   : > { %v1378_v57 = vmul.f32 %v1377_v40, %v1359_v54  ;;  %v1379_v48 = vmul.f32 %v1377_v40, %v1362_v43 }
 0x414   : > { %v4153_v63 = vpack.c.bf16 %v1379_v48, %v1378_v57 }
 0x416   : > { %4909 = vst [vmem:[#allocation35_spill] sm:$0xff] %v4153_v63 }
 0x437   : > { %v4155_v37 = vpop.f32.mrf.mxu1 }
 0x439   : > { %v4157_v7 = vpop.f32.mrf.mxu1 }
 0x43b   : > { %v4159_v50 = vpop.f32.mrf.mxu1 }
 0x43d   : > { %v4161_v58 = vpop.f32.mrf.mxu1 }
 0x43e   : > { %v1539_v30 = vmax.f32 %v4159_v50, %v4161_v58 }
 0x43f   : > { %v4163_v42 = vpop.f32.mrf.mxu1 }
 0x441   : > { %v4165_v6 = vpop.f32.mrf.mxu1 }
 0x443   : > { %v4167_v18 = vpop.f32.mrf.mxu1 }
 0x445   : > { %v4169_v27 = vpop.f32.mrf.mxu1 }
 0x446   : > { %v1545_v31 = vmax.f32 %v4167_v18, %v4169_v27 }
 0x447   : > { %v4171_v49 = vpop.f32.mrf.mxu1 }
 0x449   : > { %v4173_v11 = vpop.f32.mrf.mxu1 }
 0x44b   : > { %v4175_v22 = vpop.f32.mrf.mxu1 }
 0x44d   : > { %v4177_v0 = vpop.f32.mrf.mxu1 }
 0x44f   : > { %v4179_v2 = vpop.f32.mrf.mxu1 }
 0x451   : > { %v4181_v54 = vpop.f32.mrf.mxu1 }
 0x453   : > { %v4183_v62 = vpop.f32.mrf.mxu1 }
 0x455   : > { %v4185_v43 = vpop.f32.mrf.mxu1 }
 0x457   : > { %v4187_v21 = vpop.f32.mrf.mxu1 }
 0x459   : > { %v4189_v38 = vpop.f32.mrf.mxu1 }
 0x45a   : > { %v1560_v26 = vmax.f32 %v4187_v21, %v4189_v38 }
 0x45b   : > { %v4191_v61 = vpop.f32.mrf.mxu1 }
 0x45d   : > { %v4193_v3 = vpop.f32.mrf.mxu1 }
 0x45f   : > { %v4195_v5 = vpop.f32.mrf.mxu1 }
 0x461   : > { %v4197_v56 = vpop.f32.mrf.mxu1 }
 0x462   : > { %v1566_v52 = vmax.f32 %v4195_v5, %v4197_v56 }
 0x463   : > { %v4201_v45 = vpop.f32.mrf.mxu1 }
 0x464   : > { %1567 = vmax.xlane.f32.xlu0 %v1566_v52 }
 0x465   : > { %v4203_v40 = vpop.f32.mrf.mxu1 }
 0x467   : > { %v4205_v57 = vpop.f32.mrf.mxu1 }
 0x469   : > { %v4207_v48 = vpop.f32.mrf.mxu1 }
 0x46a   : > { %v1572_v19 = vmax.f32 %v4205_v57, %v4207_v48 }
 0x46b   : > { %v4211_v25 = vpop.f32.mrf.mxu1 }
 0x46c   : > { %1573 = vmax.xlane.f32.xlu1 %v1572_v19  ;;  %v1569_v19 = vmax.f32 %v4201_v45, %v4203_v40 }
 0x46d   : > { %v1523_v29 = vpop.f32.mrf.mxu1 }
 0x46e   : > { %v1575_v28 = vmax.f32 %v4211_v25, %v1523_v29 }
 0x46f   : > { %v1527_v35 = vpop.f32.mrf.mxu1 }
 0x470   : > { %1546 = vmax.xlane.f32.xlu1 %v1545_v31  ;;  %1576 = vmax.xlane.f32.xlu0 %v1575_v28  ;;  %v1563_v28 = vmax.f32 %v4191_v61, %v4193_v3  ;;  %v328_v31 = vld [vmem:[%s4867_s6 + $0x28] sm:$0xff] }
 0x471   : > { %v1529_v52 = vpop.f32.mrf.mxu1 }
 0x472   : > { %v1578_v34 = vmax.f32 %v1527_v35, %v1529_v52 }
 0x473   : > { %v1531_v33 = vpop.f32.mrf.mxu1 }
 0x474   : > { %1540 = vmax.xlane.f32.xlu1 %v1539_v30  ;;  %1579 = vmax.xlane.f32.xlu0 %v1578_v34  ;;  %v1554_v30 = vmax.f32 %v4179_v2, %v4181_v54  ;;  %v333_v34 = vld [vmem:[%s4867_s6 + $0x50] sm:$0xff] }
 0x475   : > { %v1533_v32 = vpop.f32.mrf.mxu1 }
 0x476   : > { %v1581_v63 = vmax.f32 %v1531_v33, %v1533_v32 }
 0x478   : > { %1582 = vmax.xlane.f32.xlu0 %v1581_v63  ;;  %v4910_v63 = vmov 1  }
 0x47c   : > { %1570 = vmax.xlane.f32.xlu0 %v1569_v19  ;;  %v334_v19 = vld [vmem:[%s4867_s6 + $0x58] sm:$0xff] }
 0x480   : > { %1561 = vmax.xlane.f32.xlu0 %v1560_v26  ;;  %v1557_v26 = vmax.f32 %v4183_v62, %v4185_v43 }
 0x484   : > { %1564 = vmax.xlane.f32.xlu0 %v1563_v28  ;;  %v1548_v28 = vmax.f32 %v4171_v49, %v4173_v11 }
 0x485   : > { %398 = vperm.xlu1 %3245, %v328_v31  }
 0x488   : > { %1555 = vmax.xlane.f32.xlu0 %v1554_v30  ;;  %v1551_v30 = vmax.f32 %v4175_v22, %v4177_v0 }
 0x489   : > { %3246 = vset.pattern.permute.xlu1 %v4910_v63 }
 0x48a   : > { %806 = vperm.xlu1 %3246, %v333_v34   ;;  %v1542_v34 = vmax.f32 %v4163_v42, %v4165_v6 }
 0x48c   : > { %1558 = vmax.xlane.f32.xlu0 %v1557_v26  ;;  %v1536_v26 = vmax.f32 %v4155_v37, %v4157_v7 }
 0x48e   : > { %810 = vperm.xlu1 %3246, %v334_v19  }
 0x490   : > { %1549 = vmax.xlane.f32.xlu0 %v1548_v28 }
 0x492   : > { %782 = vperm.xlu1 %3246, %v327_v51  }
 0x494   : > { %1552 = vmax.xlane.f32.xlu0 %v1551_v30 }
 0x496   : > { %786 = vperm.xlu1 %3246, %v328_v31  }
 0x498   : > { %1543 = vmax.xlane.f32.xlu0 %v1542_v34 }
 0x49c   : > { %1537 = vmax.xlane.f32.xlu0 %v1536_v26 }
 0x4b2   : > { %393 = vperm.xlu0 %3244, %v327_v51  }
 0x4ed   : > { %v1568_v19 = vpop.xlane.xlu0 %1567 }
 0x4f5   : > { %v1574_v46 = vpop.xlane.xlu1 %1573 }
 0x4f6   : > { %v1609_v34 = vsub.f32 %v4207_v48, %v1574_v46  ;;  %v1605_v48 = vsub.f32 %v4197_v56, %v1568_v19 }
 0x4f9   : > { %v4249_v36 = vpop.xlane.xlu1 %1546  ;;  %v1577_v28 = vpop.xlane.xlu0 %1576 }
 0x4fa   : > { %v1611_v4 = vsub.f32 %v1523_v29, %v1577_v28  ;;  %v1666_v29 = vmul.f32 1.442695, %v1609_v34  ;;  %v1610_v63 = vsub.f32 %v4211_v25, %v1577_v28 }
 0x4fc   : > { %v1670_v31 = vmul.f32 1.442695, %v1611_v4 }
 0x4fd   : > { %v4251_v60 = vpop.xlane.xlu1 %1540  ;;  %v1580_v10 = vpop.xlane.xlu0 %1579 }
 0x4fe   : > { %v1612_v30 = vsub.f32 %v1527_v35, %v1580_v10  ;;  %v1613_v55 = vsub.f32 %v1529_v52, %v1580_v10  ;;  %3360 = vpow2.f32 %v1670_v31 }
 0x500   : > { %v1672_v59 = vmul.f32 1.442695, %v1612_v30  ;;  %v1674_v16 = vmul.f32 1.442695, %v1613_v55  ;;  %v1608_v55 = vsub.f32 %v4205_v57, %v1574_v46  ;;  %v1658_v57 = vmul.f32 1.442695, %v1605_v48 }
 0x501   : > { %v4254_v41 = vpop.permute.xlu1 %398  ;;  %v1583_v26 = vpop.xlane.xlu0 %1582 }
 0x502   : > { %v1614_v51 = vsub.f32 %v1531_v33, %v1583_v26  ;;  %v1615_v53 = vsub.f32 %v1533_v32, %v1583_v26  ;;  %3362 = vpow2.f32 %v1672_v59  ;;  %v1668_v32 = vmul.f32 1.442695, %v1610_v63 }
 0x503   : > { %3364 = vpow2.f32 %v1674_v16 }
 0x504   : > { %v1676_v12 = vmul.f32 1.442695, %v1614_v51  ;;  %v1678_v14 = vmul.f32 1.442695, %v1615_v53 }
 0x505   : > { %v807_v35 = vpop.permute.xlu1 %806  ;;  %v1571_v4 = vpop.xlane.xlu0 %1570 }
 0x506   : > { %3366 = vpow2.f32 %v1676_v12  ;;  %v1607_v10 = vsub.f32 %v4203_v40, %v1571_v4  ;;  %v4261_v53 = vadd.f32 %v4126_v1, %v807_v35  ;;  %v980_v25 = vadd.f32 %v4128_v44, %v807_v35 }
 0x507   : > { %3368 = vpow2.f32 %v1678_v14  ;;  %v1664_v40 = vmul.f32 1.442695, %v1608_v55  ;;  %v1606_v63 = vsub.f32 %v4201_v45, %v1571_v4 }
 0x508   : > { %3370 = vpow2.f32 %v1666_v29  ;;  %v1662_v14 = vmul.f32 1.442695, %v1607_v10 }
 0x509   : > { %v811_v33 = vpop.permute.xlu1 %810  ;;  %v1562_v59 = vpop.xlane.xlu0 %1561  ;;  %3372 = vpow2.f32 %v1668_v32  ;;  %v1660_v34 = vmul.f32 1.442695, %v1606_v63 }
 0x50a   : > { %v4265_v16 = vadd.f32 %v4130_v39, %v811_v33  ;;  %v984_v12 = vadd.f32 %v4132_v17, %v811_v33  ;;  %3374 = vpow2.f32 %v1662_v14  ;;  %v1604_v39 = vsub.f32 %v4195_v5, %v1568_v19 }
 0x50b   : > { %v3361_v44 = vpop.eup %3360  ;;  %3376 = vpow2.f32 %v1664_v40  ;;  %v1601_v28 = vsub.f32 %v4189_v38, %v1562_v59  ;;  %v1600_v48 = vsub.f32 %v4187_v21, %v1562_v59 }
 0x50c   : > { %v1696_v46 = vpack.c.bf16 %v4265_v16, %v4261_v53  ;;  %v1697_v56 = vpack.c.bf16 %v984_v12, %v980_v25  ;;  %3378 = vpow2.f32 %v1658_v57  ;;  %v1656_v35 = vmul.f32 1.442695, %v1604_v39 }
 0x50d   : > { %v1565_v52 = vpop.xlane.xlu0 %1564  ;;  %v1650_v4 = vmul.f32 1.442695, %v1601_v28  ;;  %3380 = vpow2.f32 %v1660_v34 }
 0x50e   : > { %1730 = vmatprep.mubr.bf16.mxu0 %v1697_v56  ;;  %v1603_v1 = vsub.f32 %v4193_v3, %v1565_v52  ;;  %v1602_v5 = vsub.f32 %v4191_v61, %v1565_v52  ;;  %v1648_v56 = vmul.f32 1.442695, %v1600_v48 }
 0x50f   : > { %v3363_v17 = vpop.eup %3362 }
 0x510   : > { %v3365_v31 = vpop.eup %3364  ;;  %v1654_v51 = vmul.f32 1.442695, %v1603_v1  ;;  %v1652_v25 = vmul.f32 1.442695, %v1602_v5 }
 0x511   : > { %v1556_v30 = vpop.xlane.xlu0 %1555 }
 0x512   : > { %3382 = vpow2.f32 %v1654_v51  ;;  %v1597_v32 = vsub.f32 %v4181_v54, %v1556_v30  ;;  %v1596_v54 = vsub.f32 %v4179_v2, %v1556_v30 }
 0x513   : > { %v3367_v26 = vpop.eup %3366  ;;  %3384 = vpow2.f32 %v1656_v35 }
 0x514   : > { %v3369_v29 = vpop.eup %3368  ;;  %v1694_v45 = vpack.c.bf16 %v3367_v26, %v3363_v17  ;;  %3386 = vpow2.f32 %v1650_v4  ;;  %v1642_v57 = vmul.f32 1.442695, %v1597_v32  ;;  %v1640_v26 = vmul.f32 1.442695, %v1596_v54 }
 0x515   : > { %v1559_v10 = vpop.xlane.xlu0 %1558  ;;  %v1695_v55 = vpack.c.bf16 %v3369_v29, %v3365_v31  ;;  %v3371_v3 = vpop.eup %3370  ;;  %3388 = vpow2.f32 %v1652_v25 }
 0x516   : > { %v1599_v19 = vsub.f32 %v4185_v43, %v1559_v10  ;;  %v1693_v38 = vpack.c.bf16 %v3361_v44, %v3371_v3  ;;  %v3373_v12 = vpop.eup %3372  ;;  %v1598_v63 = vsub.f32 %v4183_v62, %v1559_v10 }
 0x517   : > { %1698 = vmatprep.subr.bf16.mxu0 %v1695_v55  ;;  %v3375_v40 = vpop.eup %3374 }
 0x518   : > { %1699 = vmatpush1.bf16.xpose.msra.mxu0 %v1694_v45  ;;  %v1646_v14 = vmul.f32 1.442695, %v1599_v19  ;;  %v3377_v61 = vpop.eup %3376  ;;  %v1644_v39 = vmul.f32 1.442695, %v1598_v63  ;;  %v1591_v45 = vsub.f32 %v4169_v27, %v4249_v36 }
 0x519   : > { %1700 = vmatprep.subr.bf16.mxu0 %v1693_v38  ;;  %v1550_v33 = vpop.xlane.xlu0 %1549  ;;  %v3379_v43 = vpop.eup %3378  ;;  %v1692_v1 = vpack.c.bf16 %v3373_v12, %v3377_v61 }
 0x51a   : > { %3390 = vpow2.f32 %v1646_v14  ;;  %v1691_v59 = vpack.c.bf16 %v3375_v40, %v3379_v43  ;;  %v1593_v44 = vsub.f32 %v4173_v11, %v1550_v33  ;;  %v3381_v17 = vpop.eup %3380  ;;  %v1592_v11 = vsub.f32 %v4171_v49, %v1550_v33 }
 0x51b   : > { %3392 = vpow2.f32 %v1648_v56  ;;  %v1630_v38 = vmul.f32 1.442695, %v1591_v45  ;;  %v1590_v14 = vsub.f32 %v4167_v18, %v4249_v36 }
 0x51c   : > { %3394 = vpow2.f32 %v1642_v57  ;;  %v1634_v51 = vmul.f32 1.442695, %v1593_v44 }
 0x51d   : > { %v1553_v52 = vpop.xlane.xlu0 %1552  ;;  %3396 = vpow2.f32 %v1644_v39  ;;  %v1628_v61 = vmul.f32 1.442695, %v1590_v14 }
 0x51e   : > { %v1595_v21 = vsub.f32 %v4177_v0, %v1553_v52  ;;  %v1594_v0 = vsub.f32 %v4175_v22, %v1553_v52  ;;  %v1632_v22 = vmul.f32 1.442695, %v1592_v11 }
 0x51f   : > { %v3383_v34 = vpop.eup %3382 }
 0x520   : > { %1701 = vmatpush1.bf16.xpose.msra.mxu0 %v1692_v1  ;;  %v1638_v28 = vmul.f32 1.442695, %v1595_v21  ;;  %v3385_v62 = vpop.eup %3384  ;;  %v1636_v10 = vmul.f32 1.442695, %v1594_v0 }
 0x521   : > { %1702 = vmatprep.subr.bf16.mxu0 %v1691_v59  ;;  %v1544_v31 = vpop.xlane.xlu0 %1543  ;;  %v3387_v29 = vpop.eup %3386  ;;  %v1690_v35 = vpack.c.bf16 %v3381_v17, %v3385_v62 }
 0x522   : > { %3398 = vpow2.f32 %v1638_v28  ;;  %v1589_v2 = vsub.f32 %v4165_v6, %v1544_v31  ;;  %v1689_v30 = vpack.c.bf16 %v3383_v34, %v3387_v29  ;;  %v3389_v55 = vpop.eup %3388  ;;  %v666_v6 = vadd.f32 %v3852_v15, %v4254_v41  ;;  %v783_v17 = vpop.permute.xlu1 %782 }
 0x523   : > { %3400 = vpow2.f32 %v1640_v26  ;;  %v1588_v49 = vsub.f32 %v4163_v42, %v1544_v31  ;;  %v1587_v15 = vsub.f32 %v4161_v58, %v4251_v60  ;;  %v1586_v58 = vsub.f32 %v4159_v50, %v4251_v60 }
 0x524   : > { %3402 = vpow2.f32 %v1634_v51  ;;  %v1626_v3 = vmul.f32 1.442695, %v1589_v2  ;;  %v948_v45 = vadd.f32 %v4045_v9, %v783_v17 }
 0x525   : > { %v1538_v4 = vpop.xlane.xlu0 %1537  ;;  %3404 = vpow2.f32 %v1636_v10  ;;  %v1624_v41 = vmul.f32 1.442695, %v1588_v49  ;;  %v1620_v59 = vmul.f32 1.442695, %v1586_v58  ;;  %v4911_v10 = vmov 1065369472  }
 0x526   : > { %3406 = vpow2.f32 %v1626_v3  ;;  %v1585_v25 = vsub.f32 %v4157_v7, %v1538_v4  ;;  %v1622_v7 = vmul.f32 1.442695, %v1587_v15  ;;  %v1584_v36 = vsub.f32 %v4155_v37, %v1538_v4  ;;  %v787_v62 = vpop.permute.xlu1 %786 }
 0x527   : > { %v3391_v5 = vpop.eup %3390  ;;  %3408 = vpow2.f32 %v1632_v22  ;;  %v954_v29 = vadd.f32 %v4058_v24, %v787_v62  ;;  %v952_v11 = vadd.f32 %v4053_v23, %v787_v62 }
 0x528   : > { %1703 = vmatpush1.bf16.xpose.msra.mxu0 %v1690_v35  ;;  %v3393_v19 = vpop.eup %3392  ;;  %3410 = vpow2.f32 %v1630_v38  ;;  %v1616_v63 = vmul.f32 1.442695, %v1584_v36  ;;  %v950_v35 = vadd.f32 %v4050_v8, %v783_v17 }
 0x529   : > { %1704 = vmatprep.subr.bf16.mxu0 %v1689_v30  ;;  %v3395_v32 = vpop.eup %3394  ;;  %v1688_v33 = vpack.c.bf16 %v3389_v55, %v3393_v19  ;;  %3412 = vpow2.f32 %v1624_v41  ;;  %v1754_v4 = vpack.c.bf16 %v952_v11, %v948_v45 }
 0x52a   : > { %v1687_v12 = vpack.c.bf16 %v3391_v5, %v3395_v32  ;;  %v3397_v42 = vpop.eup %3396  ;;  %v1755_v30 = vpack.c.bf16 %v954_v29, %v950_v35 }
 0x52d   : > { %v394_v48 = vpop.permute.xlu0 %393 }
 0x52e   : > { %v663_v27 = vadd.f32 %v3848_v13, %v394_v48  ;;  %v1618_v13 = vmul.f32 1.442695, %v1585_v25 }
 0x52f   : > { %v3399_v56 = vpop.eup %3398 }
 0x530   : > { %v1753_v40 = vpack.c.bf16 %v666_v6, %v663_v27  ;;  %1705 = vmatpush1.bf16.xpose.msra.mxu0 %v1688_v33  ;;  %v3401_v57 = vpop.eup %3400  ;;  %3414 = vpow2.f32 %v1618_v13 }
 0x531   : > { %1706 = vmatprep.subr.bf16.mxu0 %v1687_v12  ;;  %v3403_v52 = vpop.eup %3402  ;;  %v1686_v18 = vpack.c.bf16 %v3397_v42, %v3401_v57  ;;  %3416 = vpow2.f32 %v1628_v61 }
 0x532   : > { %1756 = vxpose.xlu1.c.b16.start.end [1/1] (short) %v1753_v40, 128  ;;  %v1685_v43 = vpack.c.bf16 %v3399_v56, %v3403_v52  ;;  %3418 = vpow2.f32 %v1622_v7  ;;  %v3405_v1 = vpop.eup %3404 }
 0x533   : > { %v3407_v21 = vpop.eup %3406  ;;  %3420 = vpow2.f32 %v1616_v63 }
 0x534   : > { %v3409_v54 = vpop.eup %3408  ;;  %3422 = vpow2.f32 %v1620_v59 }
 0x535   : > { %v3411_v44 = vpop.eup %3410  ;;  %v1684_v37 = vpack.c.bf16 %v3405_v1, %v3409_v54 }
 0x536   : > { %3247 = vset.pattern.permute.xlu1 %v4900_v20  ;;  %v1683_v39 = vpack.c.bf16 %v3411_v44, %v3407_v21  ;;  %v3413_v28 = vpop.eup %3412 }
 0x538   : > { %1707 = vmatpush1.bf16.xpose.msra.mxu0 %v1686_v18 }
 0x539   : > { %1708 = vmatprep.subr.bf16.mxu0 %v1685_v43 }
 0x53d   : > { %v3415_v31 = vpop.eup %3414 }
 0x53e   : > { %v3417_v34 = vpop.eup %3416 }
 0x53f   : > { %v3419_v60 = vpop.eup %3418  ;;  %v1682_v50 = vpack.c.bf16 %v3417_v34, %v3413_v28 }
 0x540   : > { %1709 = vmatpush1.bf16.xpose.msra.mxu0 %v1684_v37  ;;  %v1681_v26 = vpack.c.bf16 %v3419_v60, %v3415_v31  ;;  %v3421_v51 = vpop.eup %3420 }
 0x541   : > { %1710 = vmatprep.subr.bf16.mxu0 %v1683_v39  ;;  %v3423_v0 = vpop.eup %3422 }
 0x542   : > { %v1680_v2 = vpack.c.bf16 %v3423_v0, %v3421_v51 }
 0x548   : > { %1711 = vmatpush1.bf16.xpose.msra.mxu0 %v1682_v50 }
 0x549   : > { %1712 = vmatprep.subr.bf16.mxu0 %v1681_v26 }
 0x550   : > { %1713 = vmatpush1.bf16.xpose.msra.mxu0 %v1680_v2 }
 0x551   : > { %1810 = vmatprep.subr.bf16.mxu0 %v1755_v30 }
 0x557   : > { %1731 = vmatmul.mubr.bf16.vlgmr.msra.gmra.mxu0 %v1696_v46 }
 0x558   : > { %1811 = vmatpush1.bf16.msra.mxu0 %v1754_v4  ;;  %1738 = vmatprep.mubr.bf16.mxu0 %v4911_v10 }
 0x55f   : > { %1739 = vmatmul.mubr.bf16.gmra.mxu0 %v4911_v10 }
 0x560   : > { %1828 = vmatprep.mubr.bf16.mxu0 %v4900_v20 }
 0x594   : > { %v1764_v8 = vpop.trf.xlu1 }
 0x595   : > { %3030 = vmatmul.mubr.msk.bf16.vlgmr.msra.gmra.mxu0 %vm1025_vm1, %v1764_v8 }
 0x596   : > { %1838 = vmatprep.mubr.bf16.mxu0 %v4900_v20 }
 0x598   : > { %v1765_v23 = vpop.trf.xlu1 }
 0x59c   : > { %v1766_v9 = vpop.trf.xlu1 }
 0x59d   : > { %3031 = vmatmul.mubr.msk.bf16.gmra.mxu0 %vm1025_vm1, %v1765_v23 }
 0x59e   : > { %1848 = vmatprep.mubr.bf16.mxu0 %v4900_v20 }
 0x5a0   : > { %v1767_v24 = vpop.trf.xlu1 }
 0x5a4   : > { %v1768_v53 = vpop.trf.xlu1 }
 0x5a5   : > { %3032 = vmatmul.mubr.msk.bf16.gmra.mxu0 %vm1025_vm1, %v1766_v9 }
 0x5a6   : > { %1858 = vmatprep.mubr.bf16.mxu0 %v4900_v20 }
 0x5a8   : > { %v1769_v16 = vpop.trf.xlu1 }
 0x5ac   : > { %v1770_v46 = vpop.trf.xlu1 }
 0x5ad   : > { %3033 = vmatmul.mubr.msk.bf16.gmra.mxu0 %vm1025_vm1, %v1767_v24 }
 0x5ae   : > { %1868 = vmatprep.mubr.bf16.mxu0 %v4900_v20 }
 0x5b0   : > { %v1771_v55 = vpop.trf.xlu1 }
 0x5b5   : > { %3034 = vmatmul.mubr.msk.bf16.gmra.mxu0 %vm1025_vm1, %v1768_v53 }
 0x5b6   : > { %1878 = vmatprep.mubr.bf16.mxu0 %v4900_v20 }
 0x5bd   : > { %3035 = vmatmul.mubr.msk.bf16.gmra.mxu0 %vm1025_vm1, %v1769_v16  ;;  %v330_v16 = vld [vmem:[%s4867_s6 + $0x38] sm:$0xff] }
 0x5be   : > { %1888 = vmatprep.mubr.bf16.mxu0 %v4900_v20 }
 0x5c5   : > { %3036 = vmatmul.mubr.msk.bf16.gmra.mxu0 %vm1025_vm1, %v1770_v46 }
 0x5c6   : > { %1898 = vmatprep.mubr.bf16.mxu0 %v4900_v20 }
 0x5cd   : > { %3037 = vmatmul.mubr.msk.bf16.gmra.mxu0 %vm1025_vm1, %v1771_v55  ;;  %v4414_v55 = vld [vmem:[%s4867_s6 + $0x60] sm:$0xff] }
 0x617   : > { %v1732_v3 = vpop.f32.mrf.mxu0 }
 0x619   : > { %v1734_v5 = vpop.f32.mrf.mxu0 }
 0x61b   : > { %v1735_v22 = vpop.f32.mrf.mxu0 }
 0x61d   : > { %v1737_v19 = vpop.f32.mrf.mxu0 }
 0x61f   : > { %v1740_v38 = vpop.f32.mrf.mxu0 }
 0x620   : > { %3424 = vrcp.f32 %v1740_v38  ;;  %v4428_v38 = vld [vmem:[%s4867_s6 + $0x68] sm:$0xff] }
 0x621   : > { %v1742_v6 = vpop.f32.mrf.mxu0 }
 0x623   : > { %v1743_v48 = vpop.f32.mrf.mxu0 }
 0x625   : > { %v1744_v32 = vpop.f32.mrf.mxu0 }
 0x62d   : > { %v3425_v49 = vpop.eup %3424 }
 0x62e   : > { %v1750_v27 = vrot.slane %v3425_v49, %v4150_v47 }
 0x630   : > { %v1751_v33 = vmul.f32 %v1750_v27, %v1732_v3  ;;  %v1752_v25 = vmul.f32 %v1750_v27, %v1735_v22  ;;  %v4912_v3 = vmov 1   ;;  %v329_v22 = vld [vmem:[%s4867_s6 + $0x30] sm:$0xff] }
 0x632   : > { %v4326_v12 = vpack.c.bf16 %v1752_v25, %v1751_v33 }
 0x655   : > { %v4328_v14 = vpop.f32.mrf.mxu0 }
 0x657   : > { %v4330_v40 = vpop.f32.mrf.mxu0 }
 0x658   : > { %v1909_v19 = vmax.f32 %v4328_v14, %v4330_v40 }
 0x659   : > { %v4332_v15 = vpop.f32.mrf.mxu0 }
 0x65b   : > { %v4334_v41 = vpop.f32.mrf.mxu0 }
 0x65c   : > { %v1912_v8 = vmax.f32 %v4332_v15, %v4334_v41 }
 0x65d   : > { %v4336_v42 = vpop.f32.mrf.mxu0 }
 0x65f   : > { %v4338_v13 = vpop.f32.mrf.mxu0 }
 0x660   : > { %v1915_v5 = vmax.f32 %v4336_v42, %v4338_v13 }
 0x661   : > { %v4340_v56 = vpop.f32.mrf.mxu0 }
 0x663   : > { %v4342_v61 = vpop.f32.mrf.mxu0 }
 0x664   : > { %v1918_v45 = vmax.f32 %v4340_v56, %v4342_v61 }
 0x665   : > { %v4344_v57 = vpop.f32.mrf.mxu0 }
 0x667   : > { %v4346_v7 = vpop.f32.mrf.mxu0 }
 0x668   : > { %v1921_v46 = vmax.f32 %v4344_v57, %v4346_v7 }
 0x669   : > { %v4348_v52 = vpop.f32.mrf.mxu0 }
 0x66b   : > { %v4350_v36 = vpop.f32.mrf.mxu0 }
 0x66c   : > { %v1924_v30 = vmax.f32 %v4348_v52, %v4350_v36 }
 0x66d   : > { %v4352_v18 = vpop.f32.mrf.mxu0 }
 0x66f   : > { %v4354_v43 = vpop.f32.mrf.mxu0 }
 0x670   : > { %v1927_v24 = vmax.f32 %v4352_v18, %v4354_v43 }
 0x671   : > { %v4356_v58 = vpop.f32.mrf.mxu0 }
 0x673   : > { %v4358_v63 = vpop.f32.mrf.mxu0 }
 0x674   : > { %v1930_v53 = vmax.f32 %v4356_v58, %v4358_v63 }
 0x675   : > { %v4360_v1 = vpop.f32.mrf.mxu0 }
 0x677   : > { %v4362_v21 = vpop.f32.mrf.mxu0 }
 0x678   : > { %v1933_v23 = vmax.f32 %v4360_v1, %v4362_v21 }
 0x679   : > { %v4364_v59 = vpop.f32.mrf.mxu0 }
 0x67b   : > { %v4366_v54 = vpop.f32.mrf.mxu0 }
 0x67c   : > { %v1936_v9 = vmax.f32 %v4364_v59, %v4366_v54 }
 0x67d   : > { %v4368_v44 = vpop.f32.mrf.mxu0 }
 0x67f   : > { %v4370_v37 = vpop.f32.mrf.mxu0 }
 0x680   : > { %v1939_v11 = vmax.f32 %v4368_v44, %v4370_v37 }
 0x681   : > { %v4372_v39 = vpop.f32.mrf.mxu0 }
 0x683   : > { %v4374_v17 = vpop.f32.mrf.mxu0 }
 0x684   : > { %v1942_v4 = vmax.f32 %v4372_v39, %v4374_v17 }
 0x685   : > { %v4376_v28 = vpop.f32.mrf.mxu0 }
 0x687   : > { %v4378_v31 = vpop.f32.mrf.mxu0 }
 0x688   : > { %v1945_v0 = vmax.f32 %v4376_v28, %v4378_v31 }
 0x689   : > { %v4380_v34 = vpop.f32.mrf.mxu0 }
 0x68b   : > { %v4382_v60 = vpop.f32.mrf.mxu0 }
 0x68c   : > { %v1948_v2 = vmax.f32 %v4380_v34, %v4382_v60 }
 0x68d   : > { %v1900_v50 = vpop.f32.mrf.mxu0 }
 0x68f   : > { %v1902_v26 = vpop.f32.mrf.mxu0 }
 0x690   : > { %v1951_v62 = vmax.f32 %v1900_v50, %v1902_v26 }
 0x691   : > { %v1904_v51 = vpop.f32.mrf.mxu0 }
 0x692   : > { %1952 = vmax.xlane.f32.xlu0 %v1951_v62 }
 0x693   : > { %v1906_v29 = vpop.f32.mrf.mxu0 }
 0x694   : > { %v1954_v35 = vmax.f32 %v1904_v51, %v1906_v29 }
 0x696   : > { %1946 = vmax.xlane.f32.xlu0 %v1945_v0  ;;  %1955 = vmax.xlane.f32.xlu1 %v1954_v35 }
 0x69a   : > { %1949 = vmax.xlane.f32.xlu0 %v1948_v2  ;;  %1925 = vmax.xlane.f32.xlu1 %v1924_v30 }
 0x69e   : > { %1940 = vmax.xlane.f32.xlu0 %v1939_v11  ;;  %1919 = vmax.xlane.f32.xlu1 %v1918_v45 }
 0x6a2   : > { %1943 = vmax.xlane.f32.xlu0 %v1942_v4  ;;  %1913 = vmax.xlane.f32.xlu1 %v1912_v8 }
 0x6a6   : > { %1934 = vmax.xlane.f32.xlu0 %v1933_v23 }
 0x6aa   : > { %1937 = vmax.xlane.f32.xlu0 %v1936_v9 }
 0x6ae   : > { %1928 = vmax.xlane.f32.xlu0 %v1927_v24 }
 0x6b2   : > { %1931 = vmax.xlane.f32.xlu0 %v1930_v53 }
 0x6b3   : > { %408 = vperm.xlu1 %3247, %v330_v16  }
 0x6b6   : > { %1922 = vmax.xlane.f32.xlu0 %v1921_v46 }
 0x6b7   : > { %3248 = vset.pattern.permute.xlu1 %v4912_v3 }
 0x6b8   : > { %814 = vperm.xlu1 %3248, %v4414_v55  }
 0x6ba   : > { %1916 = vmax.xlane.f32.xlu0 %v1915_v5 }
 0x6bc   : > { %790 = vperm.xlu1 %3248, %v329_v22  }
 0x6be   : > { %1910 = vmax.xlane.f32.xlu0 %v1909_v19 }
 0x6c0   : > { %794 = vperm.xlu1 %3248, %v330_v16  }
 0x6d4   : > { %403 = vperm.xlu0 %3244, %v329_v22  }
 0x6d8   : > { %3249 = vset.pattern.permute.xlu0 %v4912_v3 }
 0x6d9   : > { %818 = vperm.xlu0 %3249, %v4428_v38  }
 0x71b   : > { %v1953_v6 = vpop.xlane.xlu0 %1952 }
 0x71c   : > { %v1985_v48 = vsub.f32 %v1900_v50, %v1953_v6  ;;  %v1986_v32 = vsub.f32 %v1902_v26, %v1953_v6 }
 0x71e   : > { %v2045_v33 = vmul.f32 1.442695, %v1985_v48  ;;  %v2047_v0 = vmul.f32 1.442695, %v1986_v32 }
 0x71f   : > { %v1947_v49 = vpop.xlane.xlu0 %1946  ;;  %v1956_v27 = vpop.xlane.xlu1 %1955 }
 0x720   : > { %v1982_v25 = vsub.f32 %v4378_v31, %v1947_v49  ;;  %v1987_v62 = vsub.f32 %v1904_v51, %v1956_v27  ;;  %v1988_v35 = vsub.f32 %v1906_v29, %v1956_v27  ;;  %3426 = vpow2.f32 %v2045_v33 }
 0x721   : > { %3428 = vpow2.f32 %v2047_v0  ;;  %v1981_v8 = vsub.f32 %v4376_v28, %v1947_v49 }
 0x722   : > { %v2049_v2 = vmul.f32 1.442695, %v1987_v62  ;;  %v2051_v30 = vmul.f32 1.442695, %v1988_v35  ;;  %v2039_v45 = vmul.f32 1.442695, %v1982_v25 }
 0x723   : > { %v1950_v11 = vpop.xlane.xlu0 %1949  ;;  %v2037_v29 = vmul.f32 1.442695, %v1981_v8 }
 0x724   : > { %v1984_v4 = vsub.f32 %v4382_v60, %v1950_v11  ;;  %3430 = vpow2.f32 %v2049_v2  ;;  %v1983_v50 = vsub.f32 %v4380_v34, %v1950_v11 }
 0x725   : > { %3432 = vpow2.f32 %v2051_v30 }
 0x726   : > { %v2043_v26 = vmul.f32 1.442695, %v1984_v4  ;;  %3434 = vpow2.f32 %v2039_v45  ;;  %v2041_v51 = vmul.f32 1.442695, %v1983_v50 }
 0x727   : > { %v1941_v23 = vpop.xlane.xlu0 %1940 }
 0x728   : > { %v1978_v31 = vsub.f32 %v4370_v37, %v1941_v23  ;;  %3436 = vpow2.f32 %v2043_v26  ;;  %v1977_v34 = vsub.f32 %v4368_v44, %v1941_v23 }
 0x729   : > { %3438 = vpow2.f32 %v2041_v51 }
 0x72a   : > { %v2031_v24 = vmul.f32 1.442695, %v1978_v31  ;;  %3440 = vpow2.f32 %v2037_v29  ;;  %v2029_v19 = vmul.f32 1.442695, %v1977_v34 }
 0x72b   : > { %v1944_v9 = vpop.xlane.xlu0 %1943 }
 0x72c   : > { %v1980_v53 = vsub.f32 %v4374_v17, %v1944_v9  ;;  %v1979_v60 = vsub.f32 %v4372_v39, %v1944_v9  ;;  %3442 = vpow2.f32 %v2031_v24 }
 0x72d   : > { %v3427_v3 = vpop.eup %3426 }
 0x72e   : > { %v2035_v16 = vmul.f32 1.442695, %v1980_v53  ;;  %v3429_v37 = vpop.eup %3428  ;;  %v2033_v5 = vmul.f32 1.442695, %v1979_v60 }
 0x72f   : > { %v1935_v28 = vpop.xlane.xlu0 %1934 }
 0x730   : > { %v1974_v46 = vsub.f32 %v4362_v21, %v1935_v28  ;;  %3444 = vpow2.f32 %v2035_v16  ;;  %v1973_v21 = vsub.f32 %v4360_v1, %v1935_v28 }
 0x731   : > { %v3431_v22 = vpop.eup %3430  ;;  %3446 = vpow2.f32 %v2033_v5 }
 0x732   : > { %v3433_v48 = vpop.eup %3432  ;;  %v2023_v17 = vmul.f32 1.442695, %v1974_v46  ;;  %v2067_v27 = vpack.c.bf16 %v3431_v22, %v3427_v3  ;;  %3448 = vpow2.f32 %v2029_v19  ;;  %v2021_v11 = vmul.f32 1.442695, %v1973_v21 }
 0x733   : > { %v1938_v6 = vpop.xlane.xlu0 %1937  ;;  %v3435_v39 = vpop.eup %3434  ;;  %v2068_v49 = vpack.c.bf16 %v3433_v48, %v3429_v37 }
 0x734   : > { %v1976_v32 = vsub.f32 %v4366_v54, %v1938_v6  ;;  %v1975_v44 = vsub.f32 %v4364_v59, %v1938_v6  ;;  %3450 = vpow2.f32 %v2023_v17  ;;  %v1926_v54 = vpop.xlane.xlu1 %1925 }
 0x735   : > { %v3437_v33 = vpop.eup %3436  ;;  %2071 = vmatprep.subr.bf16.mxu1 %v2068_v49  ;;  %v1968_v53 = vsub.f32 %v4350_v36, %v1926_v54  ;;  %v1967_v19 = vsub.f32 %v4348_v52, %v1926_v54 }
 0x736   : > { %v2027_v25 = vmul.f32 1.442695, %v1976_v32  ;;  %v2066_v0 = vpack.c.bf16 %v3437_v33, %v3435_v39  ;;  %2072 = vmatpush1.bf16.xpose.msra.mxu1 %v2067_v27  ;;  %v2025_v2 = vmul.f32 1.442695, %v1975_v44  ;;  %v3439_v30 = vpop.eup %3438 }
 0x737   : > { %v1929_v62 = vpop.xlane.xlu0 %1928  ;;  %v3441_v4 = vpop.eup %3440  ;;  %v2011_v3 = vmul.f32 1.442695, %v1968_v53  ;;  %v2009_v27 = vmul.f32 1.442695, %v1967_v19 }
 0x738   : > { %v1970_v35 = vsub.f32 %v4354_v43, %v1929_v62  ;;  %3452 = vpow2.f32 %v2027_v25  ;;  %2073 = vmatprep.subr.bf16.mxu1 %v2066_v0  ;;  %v2065_v31 = vpack.c.bf16 %v3439_v30, %v3441_v4  ;;  %v1920_v29 = vpop.xlane.xlu1 %1919  ;;  %v1969_v9 = vsub.f32 %v4352_v18, %v1929_v62 }
 0x739   : > { %v3443_v26 = vpop.eup %3442  ;;  %3454 = vpow2.f32 %v2025_v2  ;;  %v1964_v6 = vsub.f32 %v4342_v61, %v1920_v29  ;;  %v1963_v0 = vsub.f32 %v4340_v56, %v1920_v29  ;;  %v4914_v2 = vld [vmem:[#allocation5_spill] sm:$0xff] }
 0x73a   : > { %v2015_v59 = vmul.f32 1.442695, %v1970_v35  ;;  %3456 = vpow2.f32 %v2021_v11  ;;  %v2013_v34 = vmul.f32 1.442695, %v1969_v9  ;;  %v4913_v35 = vld [vmem:[#allocation6_spill] sm:$0xff] }
 0x73b   : > { %v1932_v45 = vpop.xlane.xlu0 %1931  ;;  %v2003_v44 = vmul.f32 1.442695, %v1964_v6 }
 0x73c   : > { %v1972_v50 = vsub.f32 %v4358_v63, %v1932_v45  ;;  %v1971_v8 = vsub.f32 %v4356_v58, %v1932_v45  ;;  %3458 = vpow2.f32 %v2015_v59  ;;  %v4450_v5 = vpop.xlane.xlu1 %1913 }
 0x73d   : > { %v3445_v1 = vpop.eup %3444  ;;  %v1960_v11 = vsub.f32 %v4334_v41, %v4450_v5 }
 0x73e   : > { %v2019_v23 = vmul.f32 1.442695, %v1972_v50  ;;  %v2064_v51 = vpack.c.bf16 %v3445_v1, %v3443_v26  ;;  %2074 = vmatpush1.bf16.xpose.msra.mxu1 %v2065_v31  ;;  %v2017_v63 = vmul.f32 1.442695, %v1971_v8  ;;  %v3447_v60 = vpop.eup %3446  ;;  %v2001_v26 = vmul.f32 1.442695, %v1963_v0 }
 0x73f   : > { %v1923_v43 = vpop.xlane.xlu0 %1922  ;;  %v3449_v58 = vpop.eup %3448  ;;  %v1995_v8 = vmul.f32 1.442695, %v1960_v11 }
 0x740   : > { %v1966_v24 = vsub.f32 %v4346_v7, %v1923_v43  ;;  %3460 = vpow2.f32 %v2019_v23  ;;  %2075 = vmatprep.subr.bf16.mxu1 %v2064_v51  ;;  %v1965_v18 = vsub.f32 %v4344_v57, %v1923_v43  ;;  %v2063_v22 = vpack.c.bf16 %v3447_v60, %v3449_v58  ;;  %v409_v57 = vpop.permute.xlu1 %408  ;;  %v4915_v23 = vld [vmem:[#allocation28_spill] sm:$0xff]  ;;  %v4916_v43 = vld [vmem:[#allocation30_spill] sm:$0xff] }
 0x741   : > { %v3451_v46 = vpop.eup %3450  ;;  %3462 = vpow2.f32 %v2017_v63  ;;  %v674_v54 = vadd.f32 %v4913_v35, %v409_v57  ;;  %v1959_v63 = vsub.f32 %v4332_v15, %v4450_v5 }
 0x742   : > { %v2007_v16 = vmul.f32 1.442695, %v1966_v24  ;;  %v2005_v48 = vmul.f32 1.442695, %v1965_v18 }
 0x743   : > { %v1917_v28 = vpop.xlane.xlu0 %1916 }
 0x744   : > { %3464 = vpow2.f32 %v2007_v16  ;;  %v1962_v7 = vsub.f32 %v4338_v13, %v1917_v28  ;;  %v1961_v13 = vsub.f32 %v4336_v42, %v1917_v28  ;;  %v815_v42 = vpop.permute.xlu1 %814 }
 0x745   : > { %v3453_v37 = vpop.eup %3452  ;;  %3466 = vpow2.f32 %v2013_v34  ;;  %v990_v31 = vadd.f32 %v4915_v23, %v815_v42  ;;  %v1993_v34 = vmul.f32 1.442695, %v1959_v63 }
 0x746   : > { %v2062_v36 = vpack.c.bf16 %v3453_v37, %v3451_v46  ;;  %2076 = vmatpush1.bf16.xpose.msra.mxu1 %v2063_v22  ;;  %3468 = vpow2.f32 %v2011_v3  ;;  %v3455_v17 = vpop.eup %3454  ;;  %v1999_v32 = vmul.f32 1.442695, %v1962_v7  ;;  %v1997_v45 = vmul.f32 1.442695, %v1961_v13 }
 0x747   : > { %v1911_v39 = vpop.xlane.xlu0 %1910  ;;  %v3457_v49 = vpop.eup %3456  ;;  %3470 = vpow2.f32 %v2005_v48  ;;  %v4917_v48 = vld [vmem:[#allocation26_spill] sm:$0xff] }
 0x748   : > { %2077 = vmatprep.subr.bf16.mxu1 %v2062_v36  ;;  %v2061_v52 = vpack.c.bf16 %v3455_v17, %v3457_v49  ;;  %3472 = vpow2.f32 %v1999_v32  ;;  %v1958_v21 = vsub.f32 %v4330_v40, %v1911_v39  ;;  %v1957_v41 = vsub.f32 %v4328_v14, %v1911_v39  ;;  %v791_v37 = vpop.permute.xlu1 %790  ;;  %v4918_v39 = vld [vmem:[#allocation24_spill] sm:$0xff] }
 0x749   : > { %v3459_v33 = vpop.eup %3458  ;;  %3474 = vpow2.f32 %v2009_v27  ;;  %v960_v49 = vadd.f32 %v4918_v39, %v791_v37 }
 0x74a   : > { %3476 = vpow2.f32 %v2003_v44  ;;  %v1991_v40 = vmul.f32 1.442695, %v1958_v21  ;;  %v1989_v60 = vmul.f32 1.442695, %v1957_v41 }
 0x74b   : > { %3478 = vpow2.f32 %v1997_v45 }
 0x74c   : > { %3480 = vpow2.f32 %v1991_v40  ;;  %v795_v19 = vpop.permute.xlu1 %794 }
 0x74d   : > { %v3461_v25 = vpop.eup %3460  ;;  %3482 = vpow2.f32 %v2001_v26  ;;  %v964_v17 = vadd.f32 %v4917_v48, %v795_v19 }
 0x74e   : > { %v2060_v61 = vpack.c.bf16 %v3461_v25, %v3459_v33  ;;  %2078 = vmatpush1.bf16.xpose.msra.mxu1 %v2061_v52  ;;  %v3463_v59 = vpop.eup %3462  ;;  %3484 = vpow2.f32 %v1995_v8  ;;  %v4919_v33 = vld [vmem:[#allocation29_spill] sm:$0xff]  ;;  %v4921_v52 = vld [vmem:[#allocation27_spill] sm:$0xff] }
 0x74f   : > { %v404_v62 = vpop.permute.xlu0 %403  ;;  %3486 = vpow2.f32 %v1989_v60  ;;  %v2128_v57 = vpack.c.bf16 %v964_v17, %v960_v49  ;;  %v4920_v25 = vld [vmem:[#allocation25_spill] sm:$0xff]  ;;  %v988_v21 = vadd.f32 %v4921_v52, %v815_v42 }
 0x750   : > { %v671_v30 = vadd.f32 %v4914_v2, %v404_v62  ;;  %2079 = vmatprep.subr.bf16.mxu1 %v2060_v61  ;;  %3488 = vpow2.f32 %v1993_v34  ;;  %v962_v13 = vadd.f32 %v4920_v25, %v795_v19  ;;  %v4922_v62 = vld [vmem:[#allocation23_spill] sm:$0xff] }
 0x751   : > { %v3465_v50 = vpop.eup %3464  ;;  %v958_v61 = vadd.f32 %v4922_v62, %v791_v37 }
 0x752   : > { %v2126_v4 = vpack.c.bf16 %v674_v54, %v671_v30  ;;  %v3467_v56 = vpop.eup %3466 }
 0x753   : > { %v3469_v29 = vpop.eup %3468  ;;  %v2059_v9 = vpack.c.bf16 %v3463_v59, %v3467_v56  ;;  %v2127_v35 = vpack.c.bf16 %v962_v13, %v958_v61 }
 0x754   : > { %v819_v1 = vpop.permute.xlu0 %818  ;;  %2129 = vxpose.xlu0.c.b16.start.end [1/1] (short) %v2126_v4, 128  ;;  %v2058_v53 = vpack.c.bf16 %v3469_v29, %v3465_v50  ;;  %v3471_v16 = vpop.eup %3470 }
 0x755   : > { %v994_v51 = vadd.f32 %v4916_v43, %v819_v1  ;;  %v3473_v58 = vpop.eup %3472  ;;  %v992_v44 = vadd.f32 %v4919_v33, %v819_v1 }
 0x756   : > { %2080 = vmatpush1.bf16.xpose.msra.mxu1 %v2059_v9  ;;  %v3475_v28 = vpop.eup %3474 }
 0x757   : > { %v2070_v24 = vpack.c.bf16 %v994_v51, %v990_v31  ;;  %2081 = vmatprep.subr.bf16.mxu1 %v2058_v53  ;;  %v3477_v46 = vpop.eup %3476  ;;  %v2057_v14 = vpack.c.bf16 %v3475_v28, %v3471_v16  ;;  %v2069_v0 = vpack.c.bf16 %v992_v44, %v988_v21 }
 0x758   : > { %v2056_v3 = vpack.c.bf16 %v3477_v46, %v3473_v58  ;;  %v3479_v18 = vpop.eup %3478 }
 0x759   : > { %2103 = vmatprep.mubr.bf16.mxu1 %v2070_v24  ;;  %v3481_v22 = vpop.eup %3480 }
 0x75a   : > { %v3483_v15 = vpop.eup %3482 }
 0x75b   : > { %v3485_v5 = vpop.eup %3484  ;;  %v2055_v7 = vpack.c.bf16 %v3483_v15, %v3479_v18 }
 0x75c   : > { %v2054_v36 = vpack.c.bf16 %v3485_v5, %v3481_v22  ;;  %v3487_v6 = vpop.eup %3486 }
 0x75d   : > { %v3489_v32 = vpop.eup %3488 }
 0x75e   : > { %2082 = vmatpush1.bf16.xpose.msra.mxu1 %v2057_v14  ;;  %v2053_v27 = vpack.c.bf16 %v3489_v32, %v3487_v6 }
 0x75f   : > { %2083 = vmatprep.subr.bf16.mxu1 %v2056_v3 }
 0x766   : > { %2084 = vmatpush1.bf16.xpose.msra.mxu1 %v2055_v7 }
 0x767   : > { %2085 = vmatprep.subr.bf16.mxu1 %v2054_v36 }
 0x76e   : > { %2086 = vmatpush1.bf16.xpose.msra.mxu1 %v2053_v27 }
 0x76f   : > { %2183 = vmatprep.subr.bf16.mxu1 %v2128_v57 }
 0x775   : > { %2104 = vmatmul.mubr.bf16.vlgmr.msra.gmra.mxu1 %v2069_v0 }
 0x776   : > { %2184 = vmatpush1.bf16.msra.mxu1 %v2127_v35  ;;  %2111 = vmatprep.mubr.bf16.mxu1 %v4911_v10 }
 0x77d   : > { %2112 = vmatmul.mubr.bf16.gmra.mxu1 %v4911_v10 }
 0x77e   : > { %2201 = vmatprep.mubr.bf16.mxu1 %v4900_v20 }
 0x7b6   : > { %v2137_v54 = vpop.trf.xlu0 }
 0x7b7   : > { %3038 = vmatmul.mubr.msk.bf16.vlgmr.msra.gmra.mxu1 %vm1025_vm1, %v2137_v54 }
 0x7b8   : > { %2211 = vmatprep.mubr.bf16.mxu1 %v4900_v20 }
 0x7ba   : > { %v2138_v2 = vpop.trf.xlu0 }
 0x7be   : > { %v2139_v30 = vpop.trf.xlu0 }
 0x7bf   : > { %3039 = vmatmul.mubr.msk.bf16.gmra.mxu1 %vm1025_vm1, %v2138_v2 }
 0x7c0   : > { %2221 = vmatprep.mubr.bf16.mxu1 %v4900_v20 }
 0x7c2   : > { %v2140_v11 = vpop.trf.xlu0 }
 0x7c6   : > { %v2141_v42 = vpop.trf.xlu0 }
 0x7c7   : > { %3040 = vmatmul.mubr.msk.bf16.gmra.mxu1 %vm1025_vm1, %v2139_v30 }
 0x7c8   : > { %2231 = vmatprep.mubr.bf16.mxu1 %v4900_v20 }
 0x7ca   : > { %v2142_v45 = vpop.trf.xlu0 }
 0x7ce   : > { %v2143_v4 = vpop.trf.xlu0 }
 0x7cf   : > { %3041 = vmatmul.mubr.msk.bf16.gmra.mxu1 %vm1025_vm1, %v2140_v11 }
 0x7d0   : > { %2241 = vmatprep.mubr.bf16.mxu1 %v4900_v20 }
 0x7d2   : > { %v2144_v59 = vpop.trf.xlu0 }
 0x7d7   : > { %3042 = vmatmul.mubr.msk.bf16.gmra.mxu1 %vm1025_vm1, %v2141_v42 }
 0x7d8   : > { %2251 = vmatprep.mubr.bf16.mxu1 %v4900_v20 }
 0x7df   : > { %3043 = vmatmul.mubr.msk.bf16.gmra.mxu1 %vm1025_vm1, %v2142_v45 }
 0x7e0   : > { %2261 = vmatprep.mubr.bf16.mxu1 %v4900_v20 }
 0x7e7   : > { %3044 = vmatmul.mubr.msk.bf16.gmra.mxu1 %vm1025_vm1, %v2143_v4 }
 0x7e8   : > { %2271 = vmatprep.mubr.bf16.mxu1 %v4900_v20 }
 0x7ef   : > { %3045 = vmatmul.mubr.msk.bf16.gmra.mxu1 %vm1025_vm1, %v2144_v59 }
 0x835   : > { %v2105_v40 = vpop.f32.mrf.mxu1 }
 0x837   : > { %v2107_v50 = vpop.f32.mrf.mxu1 }
 0x838   : > { %v338_v50 = vld [vmem:[%s4867_s6 + $0x78] sm:$0xff] }
 0x839   : > { %v2108_v26 = vpop.f32.mrf.mxu1 }
 0x83b   : > { %v2110_v1 = vpop.f32.mrf.mxu1 }
 0x83c   : > { %v343_v1 = vld [vmem:[%s4867_s6 + $0xa0] sm:$0xff] }
 0x83d   : > { %v2113_v56 = vpop.f32.mrf.mxu1 }
 0x83e   : > { %3490 = vrcp.f32 %v2113_v56 }
 0x83f   : > { %v2115_v8 = vpop.f32.mrf.mxu1 }
 0x840   : > { %v342_v8 = vld [vmem:[%s4867_s6 + $0x98] sm:$0xff] }
 0x841   : > { %v2116_v23 = vpop.f32.mrf.mxu1 }
 0x842   : > { %v340_v23 = vld [vmem:[%s4867_s6 + $0x88] sm:$0xff] }
 0x843   : > { %v2117_v31 = vpop.f32.mrf.mxu1 }
 0x844   : > { %v337_v31 = vld [vmem:[%s4867_s6 + $0x70] sm:$0xff] }
 0x84b   : > { %v3491_v43 = vpop.eup %3490 }
 0x84c   : > { %v2123_v51 = vrot.slane %v3491_v43, %v4150_v47  ;;  %v3558_v43 = vld [vmem:[%s4867_s6 + $0x58] sm:$0xff] }
 0x84e   : > { %v2124_v29 = vmul.f32 %v2123_v51, %v2105_v40  ;;  %v2125_v41 = vmul.f32 %v2123_v51, %v2108_v26  ;;  %v345_v51 = vld [vmem:[%s4867_s6 + $0xb0] sm:$0xff] }
 0x850   : > { %v4493_v9 = vpack.c.bf16 %v2125_v41, %v2124_v29  ;;  %v3559_v29 = vld [vmem:[%s4867_s6 + $0x48] sm:$0xff] }
 0x851   : > { %v344_v41 = vld [vmem:[%s4867_s6 + $0xa8] sm:$0xff] }
 0x877   : > { %v4495_v24 = vpop.f32.mrf.mxu1 }
 0x879   : > { %v4497_v53 = vpop.f32.mrf.mxu1 }
 0x87a   : > { %v2282_v56 = vmax.f32 %v4495_v24, %v4497_v53 }
 0x87b   : > { %v4499_v63 = vpop.f32.mrf.mxu1 }
 0x87d   : > { %v4501_v60 = vpop.f32.mrf.mxu1 }
 0x87e   : > { %v2285_v30 = vmax.f32 %v4499_v63, %v4501_v60 }
 0x87f   : > { %v4503_v16 = vpop.f32.mrf.mxu1 }
 0x881   : > { %v4505_v58 = vpop.f32.mrf.mxu1 }
 0x882   : > { %v2288_v26 = vmax.f32 %v4503_v16, %v4505_v58 }
 0x883   : > { %v4507_v34 = vpop.f32.mrf.mxu1 }
 0x885   : > { %v4509_v28 = vpop.f32.mrf.mxu1 }
 0x886   : > { %v2291_v54 = vmax.f32 %v4507_v34, %v4509_v28 }
 0x887   : > { %v4511_v46 = vpop.f32.mrf.mxu1 }
 0x889   : > { %v4513_v14 = vpop.f32.mrf.mxu1 }
 0x88a   : > { %v2294_v40 = vmax.f32 %v4511_v46, %v4513_v14 }
 0x88b   : > { %v4515_v3 = vpop.f32.mrf.mxu1 }
 0x88d   : > { %v4517_v37 = vpop.f32.mrf.mxu1 }
 0x88e   : > { %v2297_v0 = vmax.f32 %v4515_v3, %v4517_v37 }
 0x88f   : > { %v4519_v18 = vpop.f32.mrf.mxu1 }
 0x891   : > { %v4521_v22 = vpop.f32.mrf.mxu1 }
 0x892   : > { %v2300_v4 = vmax.f32 %v4519_v18, %v4521_v22 }
 0x893   : > { %v4523_v15 = vpop.f32.mrf.mxu1 }
 0x895   : > { %v4525_v5 = vpop.f32.mrf.mxu1 }
 0x896   : > { %v2303_v59 = vmax.f32 %v4523_v15, %v4525_v5 }
 0x897   : > { %v4527_v7 = vpop.f32.mrf.mxu1 }
 0x899   : > { %v4529_v36 = vpop.f32.mrf.mxu1 }
 0x89a   : > { %v2306_v42 = vmax.f32 %v4527_v7, %v4529_v36 }
 0x89b   : > { %v4531_v19 = vpop.f32.mrf.mxu1 }
 0x89d   : > { %v4533_v6 = vpop.f32.mrf.mxu1 }
 0x89e   : > { %v2309_v45 = vmax.f32 %v4531_v19, %v4533_v6 }
 0x89f   : > { %v4535_v48 = vpop.f32.mrf.mxu1 }
 0x8a1   : > { %v4537_v17 = vpop.f32.mrf.mxu1 }
 0x8a2   : > { %v2312_v2 = vmax.f32 %v4535_v48, %v4537_v17 }
 0x8a3   : > { %v4539_v32 = vpop.f32.mrf.mxu1 }
 0x8a5   : > { %v4541_v39 = vpop.f32.mrf.mxu1 }
 0x8a6   : > { %v2315_v11 = vmax.f32 %v4539_v32, %v4541_v39 }
 0x8a7   : > { %v4543_v49 = vpop.f32.mrf.mxu1 }
 0x8a9   : > { %v4545_v27 = vpop.f32.mrf.mxu1 }
 0x8aa   : > { %v2318_v62 = vmax.f32 %v4543_v49, %v4545_v27 }
 0x8ab   : > { %v4547_v57 = vpop.f32.mrf.mxu1 }
 0x8ad   : > { %v4549_v33 = vpop.f32.mrf.mxu1 }
 0x8ae   : > { %v2321_v35 = vmax.f32 %v4547_v57, %v4549_v33 }
 0x8af   : > { %v4551_v44 = vpop.f32.mrf.mxu1 }
 0x8b1   : > { %v4553_v25 = vpop.f32.mrf.mxu1 }
 0x8b2   : > { %v2324_v13 = vmax.f32 %v4551_v44, %v4553_v25 }
 0x8b3   : > { %v4557_v52 = vpop.f32.mrf.mxu1 }
 0x8b4   : > { %2325 = vmax.xlane.f32.xlu1 %v2324_v13  ;;  %v339_v13 = vld [vmem:[%s4867_s6 + $0x80] sm:$0xff] }
 0x8b5   : > { %v4559_v21 = vpop.f32.mrf.mxu1 }
 0x8b6   : > { %v2327_v61 = vmax.f32 %v4557_v52, %v4559_v21 }
 0x8b8   : > { %2319 = vmax.xlane.f32.xlu1 %v2318_v62  ;;  %2328 = vmax.xlane.f32.xlu0 %v2327_v61  ;;  %v3560_v62 = vld [vmem:[%s4867_s6 + $0x50] sm:$0xff]  ;;  %v3561_v61 = vld [vmem:[%s4867_s6 + $0x40] sm:$0xff] }
 0x8bc   : > { %2322 = vmax.xlane.f32.xlu1 %v2321_v35  ;;  %2298 = vmax.xlane.f32.xlu0 %v2297_v0 }
 0x8c0   : > { %2313 = vmax.xlane.f32.xlu1 %v2312_v2  ;;  %2292 = vmax.xlane.f32.xlu0 %v2291_v54 }
 0x8c4   : > { %2316 = vmax.xlane.f32.xlu1 %v2315_v11  ;;  %2286 = vmax.xlane.f32.xlu0 %v2285_v30 }
 0x8c8   : > { %2307 = vmax.xlane.f32.xlu1 %v2306_v42 }
 0x8cc   : > { %2310 = vmax.xlane.f32.xlu1 %v2309_v45 }
 0x8d0   : > { %2301 = vmax.xlane.f32.xlu1 %v2300_v4 }
 0x8d4   : > { %2304 = vmax.xlane.f32.xlu1 %v2303_v59 }
 0x8d8   : > { %2295 = vmax.xlane.f32.xlu1 %v2294_v40 }
 0x8da   : > { %826 = vperm.xlu0 %3249, %v338_v50  }
 0x8dc   : > { %2289 = vmax.xlane.f32.xlu1 %v2288_v26 }
 0x8de   : > { %3251 = vset.pattern.permute.xlu0 %v4900_v20 }
 0x8df   : > { %473 = vperm.xlu0 %3251, %v343_v1  }
 0x8e0   : > { %2283 = vmax.xlane.f32.xlu1 %v2282_v56 }
 0x8e3   : > { %468 = vperm.xlu0 %3251, %v342_v8  }
 0x8e7   : > { %458 = vperm.xlu0 %3251, %v340_v23  }
 0x8eb   : > { %448 = vperm.xlu0 %3251, %v338_v50  }
 0x8ef   : > { %438 = vperm.xlu0 %3251, %v4428_v38   ;;  %v346_v38 = vld [vmem:[%s4867_s6 + $0xb8] sm:$0xff] }
 0x8f1   : > { %822 = vperm.xlu1 %3248, %v337_v31  }
 0x8f3   : > { %428 = vperm.xlu0 %3251, %v3558_v43  }
 0x8f5   : > { %3250 = vset.pattern.permute.xlu1 %v4900_v20  ;;  %v341_v20 = vld [vmem:[%s4867_s6 + $0x90] sm:$0xff] }
 0x8f6   : > { %483 = vperm.xlu1 %3250, %v345_v51  }
 0x8f7   : > { %418 = vperm.xlu0 %3251, %v3559_v29  }
 0x8fa   : > { %488 = vperm.xlu1 %3250, %v346_v38  }
 0x8fe   : > { %478 = vperm.xlu1 %3250, %v344_v41  }
 0x902   : > { %463 = vperm.xlu1 %3250, %v341_v20  }
 0x906   : > { %453 = vperm.xlu1 %3250, %v339_v13  }
 0x90a   : > { %443 = vperm.xlu1 %3250, %v337_v31  }
 0x90e   : > { %433 = vperm.xlu1 %3250, %v4414_v55  }
 0x912   : > { %423 = vperm.xlu1 %3250, %v3560_v62  }
 0x916   : > { %413 = vperm.xlu1 %3250, %v3561_v61  }
 0x93d   : > { %v2326_v0 = vpop.xlane.xlu1 %2325 }
 0x93e   : > { %v2358_v35 = vsub.f32 %v4551_v44, %v2326_v0  ;;  %v2359_v54 = vsub.f32 %v4553_v25, %v2326_v0 }
 0x940   : > { %v2418_v11 = vmul.f32 1.442695, %v2358_v35  ;;  %v2420_v45 = vmul.f32 1.442695, %v2359_v54 }
 0x941   : > { %v2320_v2 = vpop.xlane.xlu1 %2319  ;;  %v2329_v30 = vpop.xlane.xlu0 %2328 }
 0x942   : > { %v2355_v55 = vsub.f32 %v4545_v27, %v2320_v2  ;;  %v2360_v42 = vsub.f32 %v4557_v52, %v2329_v30  ;;  %v2361_v4 = vsub.f32 %v4559_v21, %v2329_v30  ;;  %3492 = vpow2.f32 %v2418_v11 }
 0x943   : > { %3494 = vpow2.f32 %v2420_v45  ;;  %v2354_v56 = vsub.f32 %v4543_v49, %v2320_v2 }
 0x944   : > { %v2422_v59 = vmul.f32 1.442695, %v2360_v42  ;;  %v2424_v40 = vmul.f32 1.442695, %v2361_v4  ;;  %v2412_v26 = vmul.f32 1.442695, %v2355_v55 }
 0x945   : > { %v2323_v50 = vpop.xlane.xlu1 %2322  ;;  %v2410_v8 = vmul.f32 1.442695, %v2354_v56  ;;  %v2299_v45 = vpop.xlane.xlu0 %2298 }
 0x946   : > { %v2357_v1 = vsub.f32 %v4549_v33, %v2323_v50  ;;  %3496 = vpow2.f32 %v2422_v59  ;;  %v2356_v44 = vsub.f32 %v4547_v57, %v2323_v50 }
 0x947   : > { %3498 = vpow2.f32 %v2424_v40 }
 0x948   : > { %v2416_v25 = vmul.f32 1.442695, %v2357_v1  ;;  %3500 = vpow2.f32 %v2412_v26  ;;  %v2414_v21 = vmul.f32 1.442695, %v2356_v44 }
 0x949   : > { %v2314_v27 = vpop.xlane.xlu1 %2313 }
 0x94a   : > { %v2351_v52 = vsub.f32 %v4537_v17, %v2314_v27  ;;  %3502 = vpow2.f32 %v2416_v25  ;;  %v2350_v57 = vsub.f32 %v4535_v48, %v2314_v27  ;;  %v4656_v27 = vpop.xlane.xlu0 %2292 }
 0x94b   : > { %3504 = vpow2.f32 %v2414_v21 }
 0x94c   : > { %v2404_v31 = vmul.f32 1.442695, %v2351_v52  ;;  %3506 = vpow2.f32 %v2410_v8  ;;  %v2402_v13 = vmul.f32 1.442695, %v2350_v57 }
 0x94d   : > { %v2317_v23 = vpop.xlane.xlu1 %2316 }
 0x94e   : > { %v2353_v43 = vsub.f32 %v4541_v39, %v2317_v23  ;;  %v2352_v33 = vsub.f32 %v4539_v32, %v2317_v23  ;;  %3508 = vpow2.f32 %v2404_v31 }
 0x94f   : > { %v3493_v38 = vpop.eup %3492 }
 0x950   : > { %v2408_v51 = vmul.f32 1.442695, %v2353_v43  ;;  %v3495_v17 = vpop.eup %3494  ;;  %v2406_v41 = vmul.f32 1.442695, %v2352_v33 }
 0x951   : > { %v2308_v49 = vpop.xlane.xlu1 %2307 }
 0x952   : > { %v2347_v29 = vsub.f32 %v4529_v36, %v2308_v49  ;;  %3510 = vpow2.f32 %v2408_v51  ;;  %v2346_v36 = vsub.f32 %v4527_v7, %v2308_v49 }
 0x953   : > { %v3497_v20 = vpop.eup %3496  ;;  %3512 = vpow2.f32 %v2406_v41 }
 0x954   : > { %v3499_v61 = vpop.eup %3498  ;;  %v2396_v39 = vmul.f32 1.442695, %v2347_v29  ;;  %v2440_v54 = vpack.c.bf16 %v3497_v20, %v3493_v38  ;;  %3514 = vpow2.f32 %v2402_v13  ;;  %v2394_v59 = vmul.f32 1.442695, %v2346_v36  ;;  %v2287_v29 = vpop.xlane.xlu0 %2286 }
 0x955   : > { %v2311_v62 = vpop.xlane.xlu1 %2310  ;;  %v3501_v32 = vpop.eup %3500  ;;  %v2441_v35 = vpack.c.bf16 %v3499_v61, %v3495_v17  ;;  %v2340_v20 = vsub.f32 %v4515_v3, %v2299_v45  ;;  %v2337_v13 = vsub.f32 %v4509_v28, %v4656_v27  ;;  %v4924_v3 = vld [vmem:[#allocation32_spill] sm:$0xff] }
 0x956   : > { %v2349_v0 = vsub.f32 %v4533_v6, %v2311_v62  ;;  %v2348_v48 = vsub.f32 %v4531_v19, %v2311_v62  ;;  %3516 = vpow2.f32 %v2396_v39 }
 0x957   : > { %v3503_v2 = vpop.eup %3502  ;;  %2444 = vmatprep.subr.bf16.mxu0 %v2441_v35  ;;  %v4923_v35 = vld [vmem:[#allocation34_spill] sm:$0xff] }
 0x958   : > { %v2400_v30 = vmul.f32 1.442695, %v2349_v0  ;;  %v2439_v55 = vpack.c.bf16 %v3503_v2, %v3501_v32  ;;  %2445 = vmatpush1.bf16.xpose.msra.mxu0 %v2440_v54  ;;  %v2398_v6 = vmul.f32 1.442695, %v2348_v48  ;;  %v3505_v4 = vpop.eup %3504  ;;  %v4666_v62 = vpop.permute.xlu0 %826 }
 0x959   : > { %v2302_v11 = vpop.xlane.xlu1 %2301  ;;  %v3507_v50 = vpop.eup %3506  ;;  %v1004_v54 = vadd.f32 %v4923_v35, %v4666_v62 }
 0x95a   : > { %v2343_v42 = vsub.f32 %v4521_v22, %v2302_v11  ;;  %3518 = vpow2.f32 %v2400_v30  ;;  %2446 = vmatprep.subr.bf16.mxu0 %v2439_v55  ;;  %v2438_v56 = vpack.c.bf16 %v3505_v4, %v3507_v50  ;;  %v2342_v21 = vsub.f32 %v4519_v18, %v2302_v11 }
 0x95b   : > { %v3509_v1 = vpop.eup %3508  ;;  %3520 = vpow2.f32 %v2398_v6  ;;  %v2376_v30 = vmul.f32 1.442695, %v2337_v13  ;;  %v2336_v6 = vsub.f32 %v4507_v34, %v4656_v27  ;;  %v2333_v4 = vsub.f32 %v4501_v60, %v2287_v29 }
 0x95c   : > { %v2388_v19 = vmul.f32 1.442695, %v2343_v42  ;;  %3522 = vpow2.f32 %v2394_v59  ;;  %v2386_v51 = vmul.f32 1.442695, %v2342_v21 }
 0x95d   : > { %v2305_v40 = vpop.xlane.xlu1 %2304 }
 0x95e   : > { %v2345_v26 = vsub.f32 %v4525_v5, %v2305_v40  ;;  %v2344_v44 = vsub.f32 %v4523_v15, %v2305_v40  ;;  %3524 = vpow2.f32 %v2388_v19  ;;  %v2341_v5 = vsub.f32 %v4517_v37, %v2299_v45 }
 0x95f   : > { %v3511_v7 = vpop.eup %3510  ;;  %v2374_v19 = vmul.f32 1.442695, %v2336_v6  ;;  %v3566_v6 = vld [vmem:[%s4867_s6 + $0x18] sm:$0xff] }
 0x960   : > { %v2392_v25 = vmul.f32 1.442695, %v2345_v26  ;;  %v2437_v52 = vpack.c.bf16 %v3511_v7, %v3509_v1  ;;  %2447 = vmatpush1.bf16.xpose.msra.mxu0 %v2438_v56  ;;  %v2390_v23 = vmul.f32 1.442695, %v2344_v44  ;;  %v3513_v31 = vpop.eup %3512  ;;  %v2384_v49 = vmul.f32 1.442695, %v2341_v5 }
 0x961   : > { %v2296_v22 = vpop.xlane.xlu1 %2295  ;;  %v3515_v33 = vpop.eup %3514  ;;  %v2368_v1 = vmul.f32 1.442695, %v2333_v4  ;;  %v3567_v4 = vld [vmem:[%s4867_s6 + $0x30] sm:$0xff] }
 0x962   : > { %v2339_v8 = vsub.f32 %v4513_v14, %v2296_v22  ;;  %3526 = vpow2.f32 %v2392_v25  ;;  %2448 = vmatprep.subr.bf16.mxu0 %v2437_v52  ;;  %v2338_v18 = vsub.f32 %v4511_v46, %v2296_v22  ;;  %v2436_v17 = vpack.c.bf16 %v3513_v31, %v3515_v33 }
 0x963   : > { %v3517_v57 = vpop.eup %3516  ;;  %3528 = vpow2.f32 %v2390_v23  ;;  %v2332_v25 = vsub.f32 %v4499_v63, %v2287_v29 }
 0x964   : > { %v2380_v15 = vmul.f32 1.442695, %v2339_v8  ;;  %v2378_v61 = vmul.f32 1.442695, %v2338_v18 }
 0x965   : > { %v2290_v43 = vpop.xlane.xlu1 %2289  ;;  %v2366_v22 = vmul.f32 1.442695, %v2332_v25 }
 0x966   : > { %3530 = vpow2.f32 %v2380_v15  ;;  %v2335_v14 = vsub.f32 %v4505_v58, %v2290_v43  ;;  %v2382_v58 = vmul.f32 1.442695, %v2340_v20  ;;  %v2334_v28 = vsub.f32 %v4503_v16, %v2290_v43 }
 0x967   : > { %v3519_v38 = vpop.eup %3518  ;;  %3532 = vpow2.f32 %v2386_v51 }
 0x968   : > { %v2435_v41 = vpack.c.bf16 %v3519_v38, %v3517_v57  ;;  %2449 = vmatpush1.bf16.xpose.msra.mxu0 %v2436_v17  ;;  %3534 = vpow2.f32 %v2384_v49  ;;  %v3521_v39 = vpop.eup %3520  ;;  %v2372_v46 = vmul.f32 1.442695, %v2335_v14  ;;  %v2370_v59 = vmul.f32 1.442695, %v2334_v28  ;;  %v4925_v49 = vld [vmem:[#allocation31_spill] sm:$0xff]  ;;  %v4926_v38 = vld [vmem:[#allocation33_spill] sm:$0xff] }
 0x969   : > { %v2284_v37 = vpop.xlane.xlu1 %2283  ;;  %v3523_v32 = vpop.eup %3522  ;;  %3536 = vpow2.f32 %v2378_v61  ;;  %v1002_v18 = vadd.f32 %v4926_v38, %v4666_v62  ;;  %v3278_v14 = vld [vmem:[%s4865_s4] sm:$0xff]   ;;  %v3639_v28 = vmov 2  }
 0x96a   : > { %2450 = vmatprep.subr.bf16.mxu0 %v2435_v41  ;;  %v2434_v55 = vpack.c.bf16 %v3521_v39, %v3523_v32  ;;  %3538 = vpow2.f32 %v2372_v46  ;;  %v2331_v42 = vsub.f32 %v4497_v53, %v2284_v37  ;;  %v2330_v53 = vsub.f32 %v4495_v24, %v2284_v37  ;;  %3252 = vset.pattern.permute.xlu1 %v3639_v28 }
 0x96b   : > { %v3525_v48 = vpop.eup %3524  ;;  %3540 = vpow2.f32 %v2382_v58  ;;  %3253 = vset.pattern.permute.xlu0 %v3639_v28 }
 0x96c   : > { %3542 = vpow2.f32 %v2376_v30  ;;  %v2364_v50 = vmul.f32 1.442695, %v2331_v42  ;;  %v2362_v60 = vmul.f32 1.442695, %v2330_v53  ;;  %v3285_v30 = vld [vmem:[%s4865_s4 + $0x38] sm:$0xff]   ;;  %v3564_v42 = vld [vmem:[%s4867_s6 + $0x10] sm:$0xff] }
 0x96d   : > { %v4668_v0 = vpop.permute.xlu1 %822  ;;  %3544 = vpow2.f32 %v2370_v59  ;;  %v3568_v59 = vld [vmem:[%s4867_s6 + $0x28] sm:$0xff] }
 0x96e   : > { %v1000_v2 = vadd.f32 %v4924_v3, %v4668_v0  ;;  %3546 = vpow2.f32 %v2364_v50  ;;  %v998_v29 = vadd.f32 %v4925_v49, %v4668_v0  ;;  %v3279_v3 = vld [vmem:[%s4865_s4 + $0x8] sm:$0xff]  }
 0x96f   : > { %v3527_v36 = vpop.eup %3526  ;;  %3548 = vpow2.f32 %v2374_v19 }
 0x970   : > { %v2443_v11 = vpack.c.bf16 %v1004_v54, %v1000_v2  ;;  %v2433_v45 = vpack.c.bf16 %v3527_v36, %v3525_v48  ;;  %2451 = vmatpush1.bf16.xpose.msra.mxu0 %v2434_v55  ;;  %v3529_v40 = vpop.eup %3528  ;;  %3550 = vpow2.f32 %v2368_v1  ;;  %v2442_v17 = vpack.c.bf16 %v1002_v18, %v998_v29  ;;  %v4927_v54 = vld [vmem:[#allocation35_spill] sm:$0xff]  ;;  %v3283_v2 = vld [vmem:[%s4865_s4 + $0x28] sm:$0xff]   ;;  %v3286_v36 = vld [vmem:[%s4866_s5] sm:$0xff]  }
 0x971   : > { %3552 = vpow2.f32 %v2362_v60  ;;  %v3284_v48 = vld [vmem:[%s4865_s4 + $0x30] sm:$0xff]   ;;  %3186 = vmatprep.mubr.bf16.mxu1 %v3286_v36  ;;  %v3563_v55 = vld [vmem:[%s4867_s6 + $0x8] sm:$0xff]  ;;  %v484_v50 = vpop.permute.xlu1 %483 }
 0x972   : > { %2476 = vmatprep.mubr.bf16.mxu0 %v2443_v11  ;;  %2452 = vmatprep.subr.bf16.mxu0 %v2433_v45  ;;  %3554 = vpow2.f32 %v2366_v22  ;;  %v3562_v11 = vld [vmem:[%s4867_s6] sm:$0xff] }
 0x973   : > { %v3531_v16 = vpop.eup %3530  ;;  %2729 = vperm.xlu1 %3252, %v3562_v11   ;;  %2733 = vperm.xlu0 %3253, %v3563_v55   ;;  %v3565_v45 = vld [vmem:[%s4867_s6 + $0x20] sm:$0xff] }
 0x974   : > { %v3533_v26 = vpop.eup %3532 }
 0x975   : > { %v3535_v7 = vpop.eup %3534  ;;  %v2432_v44 = vpack.c.bf16 %v3529_v40, %v3533_v26  ;;  %v3569_v40 = vld [vmem:[%s4867_s6 + $0x38] sm:$0xff]  ;;  %v489_v1 = vpop.permute.xlu1 %488 }
 0x976   : > { %v2431_v34 = vpack.c.bf16 %v3535_v7, %v3531_v16  ;;  %v3537_v56 = vpop.eup %3536 }
 0x977   : > { %v3539_v27 = vpop.eup %3538  ;;  %2737 = vperm.xlu1 %3252, %v3564_v42   ;;  %2745 = vperm.xlu0 %3253, %v3565_v45   ;;  %v4936_v42 = vld [vmem:[#allocation13_spill] sm:$0xff] }
 0x978   : > { %2453 = vmatpush1.bf16.xpose.msra.mxu0 %v2432_v44  ;;  %v3541_v52 = vpop.eup %3540  ;;  %v474_v44 = vpop.permute.xlu0 %473 }
 0x979   : > { %2454 = vmatprep.subr.bf16.mxu0 %v2431_v34  ;;  %v3543_v21 = vpop.eup %3542  ;;  %v2430_v8 = vpack.c.bf16 %v3541_v52, %v3537_v56  ;;  %v479_v25 = vpop.permute.xlu1 %478 }
 0x97a   : > { %v2429_v5 = vpack.c.bf16 %v3543_v21, %v3539_v27  ;;  %v3545_v24 = vpop.eup %3544 }
 0x97b   : > { %v3547_v23 = vpop.eup %3546  ;;  %2741 = vperm.xlu1 %3252, %v3566_v6   ;;  %2753 = vperm.xlu0 %3253, %v3567_v4  }
 0x97c   : > { %v3549_v31 = vpop.eup %3548  ;;  %v469_v27 = vpop.permute.xlu0 %468 }
 0x97d   : > { %v3551_v15 = vpop.eup %3550  ;;  %v2428_v63 = vpack.c.bf16 %v3549_v31, %v3545_v24  ;;  %v464_v52 = vpop.permute.xlu1 %463 }
 0x97e   : > { %v2427_v43 = vpack.c.bf16 %v3551_v15, %v3547_v23  ;;  %v3553_v33 = vpop.eup %3552  ;;  %v4928_v15 = vld [vmem:[#allocation19_spill] sm:$0xff] }
 0x97f   : > { %v3555_v51 = vpop.eup %3554  ;;  %2749 = vperm.xlu1 %3252, %v3568_v59   ;;  %v4937_v59 = vld [vmem:[#allocation11_spill] sm:$0xff] }
 0x980   : > { %2455 = vmatpush1.bf16.xpose.msra.mxu0 %v2430_v8  ;;  %v2426_v57 = vpack.c.bf16 %v3555_v51, %v3553_v33  ;;  %v4929_v33 = vld [vmem:[#allocation20_spill] sm:$0xff] }
 0x981   : > { %2456 = vmatprep.subr.bf16.mxu0 %v2429_v5  ;;  %v459_v5 = vpop.permute.xlu0 %458  ;;  %v454_v23 = vpop.permute.xlu1 %453  ;;  %v727_v51 = vadd.f32 %v4929_v33, %v474_v44 }
 0x983   : > { %2757 = vperm.xlu1 %3252, %v3569_v40  }
 0x985   : > { %v449_v38 = vpop.permute.xlu0 %448 }
 0x986   : > { %v706_v45 = vadd.f32 %v4936_v42, %v449_v38 }
 0x988   : > { %2457 = vmatpush1.bf16.xpose.msra.mxu0 %v2428_v63  ;;  %v735_v63 = vadd.f32 %v4928_v15, %v484_v50 }
 0x989   : > { %2458 = vmatprep.subr.bf16.mxu0 %v2427_v43 }
 0x990   : > { %2459 = vmatpush1.bf16.xpose.msra.mxu0 %v2426_v57  ;;  %v4930_v57 = vld [vmem:[#allocation21_spill] sm:$0xff] }
 0x991   : > { %v738_v49 = vadd.f32 %v4930_v57, %v489_v1  ;;  %v4941_v57 = vld [vmem:[#allocation7_spill] sm:$0xff] }
 0x997   : > { %2477 = vmatmul.mubr.bf16.vlgmr.msra.gmra.mxu0 %v2442_v17  ;;  %v4931_v17 = vld [vmem:[#allocation17_spill] sm:$0xff] }
 0x998   : > { %2484 = vmatprep.mubr.bf16.mxu0 %v4911_v10 }
 0x99f   : > { %2485 = vmatmul.mubr.bf16.gmra.mxu0 %v4911_v10 }
 0x9a0   : > { %3154 = vmatprep.mubr.msk.bf16.mxu0 %vm575_vm0, %v3278_v14  ;;  %v722_v14 = vadd.f32 %v4931_v17, %v469_v27  ;;  %v4938_v27 = vld [vmem:[#allocation14_spill] sm:$0xff] }
 0x9a1   : > { %v4942_v17 = vld [vmem:[#allocation10_spill] sm:$0xff] }
 0xa57   : > { %v2478_v37 = vpop.f32.mrf.mxu0 }
 0xa59   : > { %v2480_v41 = vpop.f32.mrf.mxu0 }
 0xa5b   : > { %v2481_v20 = vpop.f32.mrf.mxu0 }
 0xa5d   : > { %v2483_v13 = vpop.f32.mrf.mxu0 }
 0xa5f   : > { %v2486_v61 = vpop.f32.mrf.mxu0 }
 0xa60   : > { %3556 = vrcp.f32 %v2486_v61  ;;  %v4933_v61 = vld [vmem:[#allocation15_spill] sm:$0xff] }
 0xa61   : > { %v2488_v39 = vpop.f32.mrf.mxu0 }
 0xa62   : > { %v719_v39 = vadd.f32 %v4933_v61, %v464_v52 }
 0xa63   : > { %v2489_v62 = vpop.f32.mrf.mxu0 }
 0xa64   : > { %v444_v62 = vpop.permute.xlu1 %443 }
 0xa65   : > { %v2490_v46 = vpop.f32.mrf.mxu0  ;;  %v703_v40 = vadd.f32 %v4937_v59, %v444_v62 }
 0xa68   : > { %v434_v55 = vpop.permute.xlu1 %433 }
 0xa6d   : > { %v3557_v0 = vpop.eup %3556 }
 0xa6e   : > { %v2496_v32 = vrot.slane %v3557_v0, %v4150_v47  ;;  %v3280_v47 = vld [vmem:[%s4865_s4 + $0x10] sm:$0xff]  }
 0xa70   : > { %v2497_v58 = vmul.f32 %v2496_v32, %v2478_v37  ;;  %v2498_v10 = vmul.f32 %v2496_v32, %v2481_v20  ;;  %v4932_v37 = vld [vmem:[#allocation22_spill] sm:$0xff] }
 0xa71   : > { %v730_v41 = vadd.f32 %v4932_v37, %v479_v25 }
 0xa72   : > { %v2502_v35 = vpack.c.bf16 %v2498_v10, %v2497_v58 }
 0xa74   : > { %3146 = vmatprep.subr.bf16.mxu0 %v2502_v35 }
 0xa75   : > { %3147 = vmatpush3.bf16.msra.mxu0 %v2502_v35  ;;  %v4934_v35 = vld [vmem:[#allocation18_spill] sm:$0xff] }
 0xa76   : > { %3148 = vmatprep.subr.bf16.mxu0 %v4493_v9 }
 0xa79   : > { %3149 = vmatpush3.bf16.msra.mxu0 %v4493_v9  ;;  %v3282_v9 = vld [vmem:[%s4865_s4 + $0x20] sm:$0xff]  }
 0xa7a   : > { %3150 = vmatprep.subr.bf16.mxu0 %v4326_v12 }
 0xa7d   : > { %3151 = vmatpush3.bf16.msra.mxu0 %v4326_v12  ;;  %v3281_v12 = vld [vmem:[%s4865_s4 + $0x18] sm:$0xff]  }
 0xa7e   : > { %3152 = vmatprep.subr.bf16.mxu0 %v4927_v54 }
 0xa81   : > { %3153 = vmatpush3.bf16.msra.mxu0 %v4927_v54  ;;  %v714_v54 = vadd.f32 %v4934_v35, %v459_v5  ;;  %v424_v5 = vpop.permute.xlu1 %423 }
 0xa84   : > { %3155 = vmatmul.mubr.msk.bf16.vlgmr.msra.gmra.mxu0 %vm575_vm0, %v3279_v3 }
 0xa85   : > { %3158 = vmatprep.mubr.msk.bf16.mxu0 %vm575_vm0, %v3280_v47 }
 0xa8c   : > { %3159 = vmatmul.mubr.msk.bf16.gmra.mxu0 %vm575_vm0, %v3281_v12 }
 0xa8d   : > { %3162 = vmatprep.mubr.msk.bf16.mxu0 %vm575_vm0, %v3282_v9 }
 0xa94   : > { %3163 = vmatmul.mubr.msk.bf16.gmra.mxu0 %vm575_vm0, %v3283_v2  ;;  %v439_v2 = vpop.permute.xlu0 %438 }
 0xa95   : > { %3166 = vmatprep.mubr.msk.bf16.mxu0 %vm575_vm0, %v3284_v48  ;;  %v4935_v48 = vld [vmem:[#allocation16_spill] sm:$0xff] }
 0xa98   : > { %v429_v25 = vpop.permute.xlu0 %428 }
 0xa9c   : > { %3167 = vmatmul.mubr.msk.bf16.gmra.mxu0 %vm575_vm0, %v3285_v30  ;;  %v711_v30 = vadd.f32 %v4935_v48, %v454_v23 }
 0xb44   : > { %v4753_v16 = vpop.f32.mrf.mxu0 }
 0xb46   : > { %v4755_v19 = vpop.f32.mrf.mxu0 }
 0xb48   : > { %v4757_v26 = vpop.f32.mrf.mxu0 }
 0xb4a   : > { %v4759_v7 = vpop.f32.mrf.mxu0 }
 0xb4c   : > { %v3160_v53 = vpop.f32.mrf.mxu0 }
 0xb4d   : > { %v2686_v52 = vadd.f32 %v3160_v53, %v703_v40 }
 0xb4e   : > { %v4761_v34 = vpop.f32.mrf.mxu0 }
 0xb4f   : > { %v2702_v33 = vmax.f32 %v2686_v52, 0.0 }
 0xb50   : > { %v3161_v60 = vpop.f32.mrf.mxu0 }
 0xb51   : > { %v2687_v50 = vadd.f32 %v3161_v60, %v706_v45 }
 0xb52   : > { %v2636_v56 = vpop.f32.mrf.mxu0 }
 0xb54   : > { %v3164_v22 = vpop.f32.mrf.mxu0 }
 0xb55   : > { %v2690_v3 = vadd.f32 %v3164_v22, %v719_v39  ;;  %v698_v22 = vadd.f32 %v4938_v27, %v439_v2  ;;  %v3571_v2 = vld [vmem:[%s3749_s29] sm:$0xff]  }
 0xb56   : > { %v2649_v21 = vpop.f32.mrf.mxu0  ;;  %v2849_v48 = vunpack.c.l.bf16 %v3571_v2 }
 0xb57   : > { %v2706_v6 = vmax.f32 %v2690_v3, 0.0  ;;  %v2688_v4 = vadd.f32 %v2649_v21, %v711_v30  ;;  %v2685_v15 = vadd.f32 %v2636_v56, %v698_v22  ;;  %v4940_v21 = vld [vmem:[#allocation9_spill] sm:$0xff] }
 0xb58   : > { %v3165_v8 = vpop.f32.mrf.mxu0 }
 0xb59   : > { %v2691_v0 = vadd.f32 %v3165_v8, %v722_v14  ;;  %v2704_v8 = vmax.f32 %v2688_v4, 0.0  ;;  %v2701_v38 = vmax.f32 %v2685_v15, 0.0  ;;  %v2850_v4 = vunpack.c.h.bf16 %v3571_v2 }
 0xb5a   : > { %v2652_v24 = vpop.f32.mrf.mxu0 }
 0xb5b   : > { %v2707_v36 = vmax.f32 %v2691_v0, 0.0  ;;  %v2689_v28 = vadd.f32 %v2652_v24, %v714_v54  ;;  %v4939_v24 = vld [vmem:[#allocation12_spill] sm:$0xff]  ;;  %v3570_v54 = vld [vmem:[%s3749_s29 + $0x8] sm:$0xff]  }
 0xb5c   : > { %v3168_v31 = vpop.f32.mrf.mxu0  ;;  %v695_v23 = vadd.f32 %v4939_v24, %v434_v55  ;;  %v2851_v3 = vunpack.c.l.bf16 %v3570_v54  ;;  %v2852_v55 = vunpack.c.h.bf16 %v3570_v54 }
 0xb5d   : > { %v2694_v29 = vadd.f32 %v3168_v31, %v735_v63  ;;  %v2725_v1 = vpack.c.bf16 %v2707_v36, %v2706_v6  ;;  %v2705_v44 = vmax.f32 %v2689_v28, 0.0  ;;  %v2703_v31 = vmax.f32 %v2687_v50, 0.0  ;;  %v3572_v50 = vld [vmem:[%s3749_s29 + $0x18] sm:$0xff]  }
 0xb5e   : > { %v2665_v43 = vpop.f32.mrf.mxu0  ;;  %v2684_v60 = vadd.f32 %v4761_v34, %v695_v23 }
 0xb5f   : > { %v2692_v20 = vadd.f32 %v2665_v43, %v727_v51  ;;  %v2710_v32 = vmax.f32 %v2694_v29, 0.0  ;;  %v2724_v63 = vpack.c.bf16 %v2705_v44, %v2704_v8  ;;  %v690_v43 = vadd.f32 %v4940_v21, %v429_v25  ;;  %v419_v51 = vpop.permute.xlu0 %418  ;;  %v3573_v8 = vld [vmem:[%s3749_s29 + $0x10] sm:$0xff]   ;;  %s2887_s29 = sshll.u32 %s4798_s16, 4  ;;  %s4815_s29 = int_to_ptr.vmem [resolvable:$true] %s2887_s29 }
 0xb60   : > { %v3169_v18 = vpop.f32.mrf.mxu0  ;;  %v2723_v29 = vpack.c.bf16 %v2703_v31, %v2702_v33  ;;  %v682_v14 = vadd.f32 %v4942_v17, %v419_v51  ;;  %v2700_v37 = vmax.f32 %v2684_v60, 0.0  ;;  %v2856_v31 = vunpack.c.h.bf16 %v3572_v50  ;;  %s3574_s21 = scalar_lea.vmem %s4815_s29, 1024  ;;  %p3581_p0 = scmp.lt.s32.totalorder %s4815_s29, %s3579_s23 }
 0xb61   : > { %v2695_v13 = vadd.f32 %v3169_v18, %v738_v49  ;;  %v2708_v47 = vmax.f32 %v2692_v20, 0.0  ;;  %v687_v49 = vadd.f32 %v4941_v57, %v424_v5  ;;  %v2683_v53 = vadd.f32 %v4757_v26, %v690_v43  ;;  %v414_v18 = vpop.permute.xlu1 %413  ;;  %p3575_p11 = scmp.ne.s32.totalorder %s4815_s29, %s3574_s21  ;;  %p3582_p1 = scmp.lt.s32.totalorder %s3580_s8, %s3574_s21 }
 0xb62   : > { %v2668_v46 = vpop.f32.mrf.mxu0  ;;  %v2681_v34 = vadd.f32 %v4759_v7, %v682_v14  ;;  %v2722_v61 = vpack.c.bf16 %v2701_v38, %v2700_v37  ;;  %v3287_v7 = vld [vmem:[%s4866_s5 + $0x8] sm:$0xff]   ;;  %v2853_v5 = vunpack.c.l.bf16 %v3573_v8  ;;  %v2854_v60 = vunpack.c.h.bf16 %v3573_v8 }
 0xb63   : > { %v2711_v58 = vmax.f32 %v2695_v13, 0.0  ;;  %v2693_v10 = vadd.f32 %v2668_v46, %v730_v41  ;;  %v2682_v56 = vadd.f32 %v4753_v16, %v687_v49  ;;  %v4943_v41 = vld [vmem:[#allocation8_spill] sm:$0xff]  ;;  %v2699_v13 = vmax.f32 %v2683_v53, 0.0  ;;  %v2734_v35 = vpop.permute.xlu0 %2733  ;;  %p3576_p12 = pnand %p3575_p11, %p3721_p5  ;;  %p3583_p2 = por %p3582_p1, %p3581_p0 }
 0xb64   : > { %v679_v20 = vadd.f32 %v4943_v41, %v414_v18  ;;  %v2697_v46 = vmax.f32 %v2681_v34, 0.0 }
 0xb65   : > { %v2727_v12 = vpack.c.bf16 %v2711_v58, %v2710_v32  ;;  %v2709_v9 = vmax.f32 %v2693_v10, 0.0  ;;  %v2698_v39 = vmax.f32 %v2682_v56, 0.0  ;;  %v3289_v32 = vld [vmem:[%s4866_s5 + $0x18] sm:$0xff]   ;;  %v2730_v58 = vpop.permute.xlu1 %2729  ;;  %p3577_p13 = pneg %p3576_p12 }
 0xb66   : > { %v2680_v26 = vadd.f32 %v4755_v19, %v679_v20  ;;  %v3288_v19 = vld [vmem:[%s4866_s5 + $0x10] sm:$0xff]  }
 0xb67   : > { %v2726_v11 = vpack.c.bf16 %v2709_v9, %v2708_v47  ;;  %3170 = vmatprep.subr.bf16.mxu1 %v2727_v12  ;;  %v2721_v62 = vpack.c.bf16 %v2699_v13, %v2698_v39  ;;  %v2746_v36 = vpop.permute.xlu0 %2745  ;;  %p3584_p3 = pnand %p3583_p2, %p3577_p13 }
 0xb68   : > { %3171 = vmatpush3.bf16.msra.mxu1 %v2727_v12  ;;  %v2696_v0 = vmax.f32 %v2680_v26, 0.0 }
 0xb69   : > { %3172 = vmatprep.subr.bf16.mxu1 %v2726_v11  ;;  %v2738_v10 = vpop.permute.xlu1 %2737 }
 0xb6a   : > { %v2720_v16 = vpack.c.bf16 %v2697_v46, %v2696_v0 }
 0xb6b   : > { %v2754_v22 = vpop.permute.xlu0 %2753 }
 0xb6c   : > { %3173 = vmatpush3.bf16.msra.mxu1 %v2726_v11 }
 0xb6d   : > { %3174 = vmatprep.subr.bf16.mxu1 %v2725_v1  ;;  %v2742_v12 = vpop.permute.xlu1 %2741 }
 0xb70   : > { %3175 = vmatpush3.bf16.msra.mxu1 %v2725_v1  ;;  %v2855_v1 = vunpack.c.l.bf16 %v3572_v50 }
 0xb71   : > { %3176 = vmatprep.subr.bf16.mxu1 %v2724_v63  ;;  %v2750_v40 = vpop.permute.xlu1 %2749 }
 0xb74   : > { %3177 = vmatpush3.bf16.msra.mxu1 %v2724_v63 }
 0xb75   : > { %3178 = vmatprep.subr.bf16.mxu1 %v2723_v29  ;;  %v2758_v43 = vpop.permute.xlu1 %2757 }
 0xb78   : > { %3179 = vmatpush3.bf16.msra.mxu1 %v2723_v29 }
 0xb79   : > { %3180 = vmatprep.subr.bf16.mxu1 %v2722_v61 }
 0xb7c   : > { %3181 = vmatpush3.bf16.msra.mxu1 %v2722_v61 }
 0xb7d   : > { %3182 = vmatprep.subr.bf16.mxu1 %v2721_v62 }
 0xb80   : > { %3183 = vmatpush3.bf16.msra.mxu1 %v2721_v62 }
 0xb81   : > { %3184 = vmatprep.subr.bf16.mxu1 %v2720_v16 }
 0xb84   : > { %3185 = vmatpush3.bf16.msra.mxu1 %v2720_v16 }
 0xb87   : > { %3187 = vmatmul.mubr.bf16.vlgmr.msra.gmra.mxu1 %v3287_v7 }
 0xb88   : > { %3190 = vmatprep.mubr.bf16.mxu1 %v3288_v19 }
 0xb8f   : > { %3191 = vmatmul.mubr.bf16.gmra.mxu1 %v3289_v32 }
 0xc47   : > { %v3188_v47 = vpop.f32.mrf.mxu1 }
 0xc48   : > { %v2827_v9 = vadd.f32 %v3188_v47, %v2738_v10 }
 0xc49   : > { %v2818_v30 = vpop.f32.mrf.mxu1 }
 0xc4a   : > { %v2859_v28 = vadd.f32 %v2851_v3, %v2827_v9  ;;  %v2819_v11 = vadd.f32 %v2818_v30, %v2730_v58 }
 0xc4b   : > { %v3189_v42 = vpop.f32.mrf.mxu1 }
 0xc4c   : > { %2867 = vst [vmem:[%s4798_s16 + $0x10] sm:$0xff] %v2859_v28  ;;  %v2857_v45 = vadd.f32 %v2849_v48, %v2819_v11  ;;  %v2830_v6 = vadd.f32 %v3189_v42, %v2742_v12 }
 0xc4d   : > { %v2821_v59 = vpop.f32.mrf.mxu1 }
 0xc4e   : > { %2865 = vst [vmem:[%s4798_s16] sm:$0xff] %v2857_v45  ;;  %v2860_v44 = vadd.f32 %v2852_v55, %v2830_v6  ;;  %v2822_v25 = vadd.f32 %v2821_v59, %v2734_v35 }
 0xc4f   : > { %v3192_v27 = vpop.f32.mrf.mxu1 }
 0xc50   : > { %2868 = vst [vmem:[%s4798_s16 + $0x18] sm:$0xff] %v2860_v44  ;;  %v2858_v52 = vadd.f32 %v2850_v4, %v2822_v25  ;;  %v2843_v24 = vadd.f32 %v3192_v27, %v2754_v22 }
 0xc51   : > { %v2834_v23 = vpop.f32.mrf.mxu1 }
 0xc52   : > { %2866 = vst [vmem:[%s4798_s16 + $0x8] sm:$0xff] %v2858_v52  ;;  %v2835_v15 = vadd.f32 %v2834_v23, %v2746_v36  ;;  %v2863_v63 = vadd.f32 %v2855_v1, %v2843_v24 }
 0xc53   : > { %v3193_v21 = vpop.f32.mrf.mxu1 }
 0xc54   : > { %v2846_v33 = vadd.f32 %v3193_v21, %v2758_v43  ;;  %v2861_v51 = vadd.f32 %v2853_v5, %v2835_v15  ;;  %2871 = vst [vmem:[%s4798_s16 + $0x30] sm:$0xff] %v2863_v63 }
 0xc55   : > { %v2837_v57 = vpop.f32.mrf.mxu1 }
 0xc56   : > { %v2864_v49 = vadd.f32 %v2856_v31, %v2846_v33  ;;  %v2838_v53 = vadd.f32 %v2837_v57, %v2750_v40  ;;  %2869 = vst [vmem:[%s4798_s16 + $0x20] sm:$0xff] %v2861_v51 }
 0xc58   : > { %2872 = vst [vmem:[%s4798_s16 + $0x38] sm:$0xff] %v2864_v49  ;;  %v2862_v29 = vadd.f32 %v2854_v60, %v2838_v53 }
 0xc5a   : > { %2870 = vst [vmem:[%s4798_s16 + $0x28] sm:$0xff] %v2862_v29 }
 0xc5b   : > { %3587 = shalt.err (!%p3584_p3)
}
 0xc5c   : > { %s3588_s9 = scalar_lea.hbm %s4813_s20, 1024  ;;  %s3592_s15 = scalar_lea.hbm %s4868_s7, 2048 }
 0xc5d   : > { %p3589_p4 = scmp.ne.s32.totalorder %s4813_s20, %s3588_s9  ;;  %p3593_p9 = scmp.lt.s32.totalorder %s4813_s20, %s4868_s7 }
 0xc5e   : > { %p3594_p10 = scmp.lt.s32.totalorder %s3592_s15, %s3588_s9 }
 0xc5f   : > { %p3590_p7 = pnand %p3589_p4, %p3721_p5 }
 0xc60   : > { %p3595_p11 = por %p3594_p10, %p3593_p9 }
 0xc61   : > { %p3591_p8 = pneg %p3590_p7 }
 0xc63   : > { %p3596_p12 = pnand %p3595_p11, %p3591_p8 }
 0xc65   : > { %3599 = shalt.err (!%p3596_p12)
}
 0xc66   : > { %s3641_s18 = smov 128   ;;  %s3642_s19 = smov 8  }
 0xc67   : > { %3194 = dma.vmem_to_hbm [thread:$0]  (%p3721_p5), %s4815_s29, 1024, %s4813_s20, %s4821_s28, %s3641_s18, %s3641_s18, %s3642_s19  }
 0xc68 PF: > { %p3200_p13 = scmp.ge.s32.totalorder %s3634_s27, 2  ;;  %s2902_s21 = sand.u32 1, %s3622_s24  }
 0xc69   : > { %s2903_s22 = scalar_lea.sflag [#allocation3], %s2902_s21 }
 0xc6a   : > { %p3197_p0 = pnand %p3200_p13, %p3725_p6 }
 0xc6c   : > { %p3198_p1 = pneg %p3197_p0 }
 0xc6e   : > { %3617 = dma.done.wait (%p3198_p1), %s2903_s22, 1024  }
 0xc6f   : > { %3619 = vsyncadd (%p3198_p1), %s2903_s22, 4294966272  ;;  %p17_p2 = scmp.ge.s32.totalorder %s3708_s30, 4   ;;  %s4944_s24 = smov %s3626_s25 }
 0xc70   : > { %s4945_s25 = smov %s3630_s26  ;;  %s4946_s26 = smov %s3719_s10 }
 0xc71   : > { %s4947_s27 = smov %s3708_s30  ;;  %19 = sbr.rel (!%p17_p2) target bundleno = 3 (0x3), region = 86 }
 0xc76   :  { %2908 = vsyncpa [#allocation3], 1 }
 0xc77   :  { %2910 = vsyncpa [#allocation3 + $0x1], 1 }

</bundles_post_ra>
